<compile_context>
chip_gen: v7x
topology: tpu7x:2x2x1
jax: 0.10.0
libtpu: 0.0.40
codegen_flags: <defaults>
</compile_context>

<pallas_src>
import math

import jax
import jax.numpy as jnp
from jax.experimental import pallas as pl
from jax.experimental.pallas import tpu as pltpu

BN_EPS = 1e-5


def _bn_relu(y, g, be, axis):
    """Training-mode BatchNorm (biased var, eps=1e-5) + ReLU on a bias-free input.

    Centered two-pass variance (no E[y^2]-E[y]^2 cancellation); all math in f32.
    """
    mean = jnp.mean(y, axis=axis, keepdims=True)
    d = y - mean
    var = jnp.mean(d * d, axis=axis, keepdims=True)
    scale = g * jax.lax.rsqrt(var + BN_EPS)
    return jnp.maximum(d * scale + be, 0.0)


def _make_kernel(B, N, dims_conv, dims_fc, P, mxu_dtype):
    """Fused STDLearner forward kernel for static (B, N)."""
    bottleneck = dims_conv[-1][1]

    def std_kernel(x_ref, convw_ref, convgb_ref, aux_ref, fcw_hbm, headw_hbm,
                   out_ref, fcw_vmem, headw_vmem, sem):
        # Kick off the FC-slab / head-weight DMAs now; they complete behind the
        # conv-stage matmuls (overlap the ~1 MB parameter load with compute).
        fc_cp = pltpu.make_async_copy(fcw_hbm, fcw_vmem, sem.at[0])
        head_cp = pltpu.make_async_copy(headw_hbm, headw_vmem, sem.at[1])
        fc_cp.start()
        head_cp.start()

        # ---- pointwise conv stage, channels-major: h is (C, B*N), points on lanes ----
        h = x_ref[...]                                            # (3, B*N) mxu_dtype
        off = 0
        for i, (ci, co) in enumerate(dims_conv):
            w = convw_ref[off:off + co, :ci]                      # (co, ci) mxu_dtype
            off += co
            y = jnp.dot(w, h, preferred_element_type=jnp.float32)  # (co, B*N) f32
            g = convgb_ref[:co, 2 * i:2 * i + 1]                  # (co, 1) f32
            be = convgb_ref[:co, 2 * i + 1:2 * i + 2]             # (co, 1) f32
            h = _bn_relu(y, g, be, axis=1).astype(mxu_dtype)

        # ---- global max pool over points (transpose stays in the compute dtype) ----
        # TODO(synk): for B<=8 a per-batch lane-max (no (C, B*N) transpose) is a
        # candidate alternative; benchmark before switching (reintroduces unrolling).
        pooled = jnp.max(h.T.reshape(B, N, bottleneck), axis=1)   # (B, bottleneck)
        z = pooled.astype(jnp.float32)

        # ---- FC stage in f32 (tiny-batch training-mode BN is numerically fragile) ----
        fc_cp.wait()
        off = 0
        for i, (ci, co) in enumerate(dims_fc):
            w = fcw_vmem[off:off + ci, :]                         # (ci, 256) f32
            off += ci
            y = jnp.dot(z, w, preferred_element_type=jnp.float32)  # (B, 256) f32
            g = aux_ref[2 * i:2 * i + 1, :co]                     # (1, 256) f32
            be = aux_ref[2 * i + 1:2 * i + 2, :co]                # (1, 256) f32
            z = _bn_relu(y, g, be, axis=0)

        # ---- fused fc4a|fc4b head: one lane-dense (B, 6P) matmul + bias ----
        head_cp.wait()
        b_head = aux_ref[6:7, :6 * P]                             # (1, 6P) f32
        out_ref[...] = (jnp.dot(z.astype(mxu_dtype), headw_vmem[...],
                                preferred_element_type=jnp.float32) + b_head)

    return std_kernel


def init_params(key, bottleneck_size=128, num_out_points=64):
    """PyTorch-style init (uniform +-1/sqrt(fan_in); BN gamma=1, beta=0).

    Biases of BN-followed layers are omitted (mathematically cancelled).
    Layout (26 arrays):
      conv1..conv5 : [W (Cout, Cin), gamma (Cout, 1), beta (Cout, 1)]  x5
      fc1..fc3     : [W (Cin, Cout), gamma (1, Cout), beta (1, Cout)]  x3
      heads        : [W_head (256, 6*P) = [fc4a | fc4b], b_head (1, 6*P)]
    """
    dims_conv = [(3, 64), (64, 64), (64, 64), (64, 128), (128, bottleneck_size)]
    dims_fc = [(bottleneck_size, 256), (256, 256), (256, 256)]
    P = num_out_points
    keys = jax.random.split(key, 10)
    ki = 0
    params = []
    for (ci, co) in dims_conv:
        bound = 1.0 / math.sqrt(ci)
        w = jax.random.uniform(keys[ki], (co, ci), jnp.float32, -bound, bound)
        ki += 1
        params += [w, jnp.ones((co, 1), jnp.float32), jnp.zeros((co, 1), jnp.float32)]
    for (ci, co) in dims_fc:
        bound = 1.0 / math.sqrt(ci)
        w = jax.random.uniform(keys[ki], (ci, co), jnp.float32, -bound, bound)
        ki += 1
        params += [w, jnp.ones((1, co), jnp.float32), jnp.zeros((1, co), jnp.float32)]
    hw, hb = [], []
    for _ in range(2):                       # fc4a then fc4b
        k1, k2 = jax.random.split(keys[ki]); ki += 1
        bound = 1.0 / math.sqrt(256)
        hw.append(jax.random.uniform(k1, (256, 3 * P), jnp.float32, -bound, bound))
        hb.append(jax.random.uniform(k2, (1, 3 * P), jnp.float32, -bound, bound))
    params += [jnp.concatenate(hw, axis=1), jnp.concatenate(hb, axis=1)]
    return params


def _pack_params(params, dims_conv, dims_fc, P, mxu_dtype):
    """Collapse 25 parameter arrays into 5 DMA-friendly slabs (wrapper-side, exact)."""
    ci_max = max(ci for ci, _ in dims_conv)
    co_max = max(co for _, co in dims_conv)
    # Conv weight slab: each (co, ci) lane-padded to ci_max, stacked on sublanes.
    conv_w = jnp.concatenate(
        [jnp.pad(params[3 * i], ((0, 0), (0, ci_max - ci)))
         for i, (ci, _) in enumerate(dims_conv)], axis=0).astype(mxu_dtype)
    # Conv gamma/beta: column 2i = gamma_i, 2i+1 = beta_i (sublane-major -> (co,1)
    # broadcasts over (co, B*N) with no transpose in-kernel).
    cols = []
    for i, (_, co) in enumerate(dims_conv):
        cols.append(jnp.pad(params[3 * i + 1], ((0, co_max - co), (0, 0))))
        cols.append(jnp.pad(params[3 * i + 2], ((0, co_max - co), (0, 0))))
    conv_gb = jnp.concatenate(cols, axis=1).astype(jnp.float32)          # (co_max, 10)
    # FC gamma/beta rows + head bias row, lane-padded to max(256, 6P).
    width = max(max(co for _, co in dims_fc), 6 * P)
    rows = []
    for i, (_, co) in enumerate(dims_fc):
        rows.append(jnp.pad(params[16 + 3 * i], ((0, 0), (0, width - co))))
        rows.append(jnp.pad(params[17 + 3 * i], ((0, 0), (0, width - co))))
    rows.append(jnp.pad(params[25], ((0, 0), (0, width - 6 * P))))
    aux = jnp.concatenate(rows, axis=0).astype(jnp.float32)              # (7, width)
    # FC weight slab stays f32 (see header note); it is DMA'd manually and its load
    # is hidden behind the conv stage.  Head weights go to the MXU in mxu_dtype.
    fc_w = jnp.concatenate([params[15], params[18], params[21]],
                           axis=0).astype(jnp.float32)                   # (sum ci, 256)
    head_w = params[24].astype(mxu_dtype)                                # (256, 6P)
    return conv_w, conv_gb, aux, fc_w, head_w


def std_learner_forward(x, params, num_out_points=64, mxu_dtype=jnp.bfloat16):
    """x: (B, 3, N) float32 (PyTorch NCL).  Returns (ya, yb): (B, 3, num_out_points)."""
    B, C, N = x.shape
    assert C == 3
    assert N % 8 == 0, "N must be a multiple of 8 (layout-preserving pool reshape)"
    P = num_out_points
    dims_conv = [tuple(params[3 * i].shape[::-1]) for i in range(5)]     # (ci, co)
    dims_fc = [tuple(params[15 + 3 * i].shape) for i in range(3)]        # (ci, co)
    bottleneck = dims_conv[-1][1]
    assert params[24].shape == (dims_fc[-1][1], 6 * P)

    # Wrapper-side packing + dtype casts: bf16 MXU operands, f32 BN math in-kernel.
    x_cm = jnp.transpose(x, (1, 0, 2)).reshape(3, B * N).astype(mxu_dtype)
    conv_w, conv_gb, aux, fc_w, head_w = _pack_params(params, dims_conv, dims_fc, P,
                                                      mxu_dtype)

    itm = jnp.finfo(mxu_dtype).bits // 8
    co_max = max(co for _, co in dims_conv)
    ci_max = max(ci for ci, _ in dims_conv)
    sum_co = sum(co for _, co in dims_conv)
    sum_ci_fc = sum(ci for ci, _ in dims_fc)
    width = max(max(co for _, co in dims_fc), 6 * P)
    rup = lambda v, m: -(-v // m) * m
    lane_bn = rup(B * N, 128)

    # Everything-resident footprint guard (conservative: f32 BN temporaries, pool
    # transpose copy, padded slabs).  24 MiB keeps headroom on v7x (64 MiB/TC).
    act_bytes = lane_bn * co_max * (4 * 4 + 2 * itm)
    pool_bytes = rup(B * N, 8) * rup(co_max, 128) * (4 + itm)
    param_bytes = ((sum_co * ci_max + dims_fc[-1][1] * rup(6 * P, 128)) * itm
                   + (co_max * 128 + sum_ci_fc * 256 + 8 * rup(width, 128)) * 4)
    est_bytes = act_bytes + pool_bytes + param_bytes + (2 << 20)
    assert est_bytes < 24 * 1024 * 1024, (
        "B*N too large for the resident path; tile the point axis with a "
        "two-pass BN-stats grid for large point counts")
    vmem_limit = int(min(48 * 1024 * 1024, max(32 * 1024 * 1024, 2 * est_bytes)))
    try:  # stay well below per-core physical VMEM (64 MiB on v7x), leave headroom
        cap = int(pltpu.get_tpu_info().vmem_capacity_bytes)
        vmem_limit = max(min(vmem_limit, cap - (16 << 20)), 16 << 20)
    except Exception:
        pass

    kernel = _make_kernel(B, N, dims_conv, dims_fc, P, mxu_dtype)
    vmem = pl.BlockSpec(memory_space=pltpu.MemorySpace.VMEM)
    hbm = pl.BlockSpec(memory_space=pl.ANY)
    out = pl.pallas_call(
        kernel,
        out_shape=jax.ShapeDtypeStruct((B, 6 * P), jnp.float32),
        in_specs=[vmem, vmem, vmem, vmem, hbm, hbm],
        out_specs=vmem,
        scratch_shapes=[
            pltpu.VMEM((sum_ci_fc, dims_fc[0][1]), jnp.float32),   # FC weight slab
            pltpu.VMEM((dims_fc[-1][1], 6 * P), mxu_dtype),        # fused head weights
            pltpu.SemaphoreType.DMA((2,)),
        ],
        compiler_params=pltpu.CompilerParams(vmem_limit_bytes=vmem_limit),
    )(x_cm, conv_w, conv_gb, aux, fc_w, head_w)

    ya = out[:, :3 * P].reshape(B, 3, P)     # matches torch .view(-1, 3, P)
    yb = out[:, 3 * P:].reshape(B, 3, P)
    return ya, yb


def _reference_forward(x, params, P):
    """Plain-JAX reference of the same forward math (for correctness checking)."""
    B, _, N = x.shape
    h = jnp.transpose(x, (1, 0, 2)).reshape(3, B * N)
    for i in range(5):
        w, g, be = params[3 * i], params[3 * i + 1], params[3 * i + 2]
        y = w @ h
        mean = jnp.mean(y, axis=1, keepdims=True)
        var = jnp.mean((y - mean) ** 2, axis=1, keepdims=True)
        h = jnp.maximum(g * (y - mean) / jnp.sqrt(var + BN_EPS) + be, 0.0)
    pooled = jnp.max(h.reshape(-1, B, N), axis=2).T            # (B, bottleneck)
    z = pooled
    for i in range(3):
        w, g, be = params[15 + 3 * i], params[16 + 3 * i], params[17 + 3 * i]
        y = z @ w
        mean = jnp.mean(y, axis=0, keepdims=True)
        var = jnp.mean((y - mean) ** 2, axis=0, keepdims=True)
        z = jnp.maximum(g * (y - mean) / jnp.sqrt(var + BN_EPS) + be, 0.0)
    out = z @ params[24] + params[25]
    return out[:, :3 * P].reshape(B, 3, P), out[:, 3 * P:].reshape(B, 3, P)


if __name__ == "__main__":
    key = jax.random.PRNGKey(0)
    kx1, kx2, kp = jax.random.split(key, 3)
    num_out_points = 64
    params = init_params(kp, bottleneck_size=128, num_out_points=num_out_points)

    # ---- production path: bf16 MXU operands, B*N = 256 (fills the 256-wide MXU) ----
    B1, N1 = 4, 64
    x1 = jax.random.normal(kx1, (B1, 3, N1), dtype=jnp.float32)
    ya, yb = std_learner_forward(x1, params, num_out_points=num_out_points)
    jax.block_until_ready(ya)
    jax.block_until_ready(yb)
    assert ya.shape == (B1, 3, num_out_points) and yb.shape == (B1, 3, num_out_points)
    assert bool(jnp.all(jnp.isfinite(ya))) and bool(jnp.all(jnp.isfinite(yb)))

    # ---- strict numerical check: identical kernel in f32 mode vs plain-JAX reference.
    # (The bf16 path is not bit-compared: training-mode BatchNorm over a 2-4 sample
    #  batch snaps activations to +-1 and amplifies operand rounding discontinuously —
    #  a property of the module at tiny batch sizes, not of the kernel.)
    B2, N2 = 2, 64
    x2 = jax.random.normal(kx2, (B2, 3, N2), dtype=jnp.float32)
    ya2, yb2 = std_learner_forward(x2, params, num_out_points=num_out_points,
                                   mxu_dtype=jnp.float32)
    jax.block_until_ready(ya2)
    ra, rb = _reference_forward(x2, params, num_out_points)
    scale = float(jnp.maximum(jnp.max(jnp.abs(ra)), jnp.max(jnp.abs(rb)))) + 1e-6
    err = float(jnp.maximum(jnp.max(jnp.abs(ya2 - ra)), jnp.max(jnp.abs(yb2 - rb))))
    assert err <= 1e-2 * scale + 1e-3, f"kernel/reference mismatch: {err} (scale {scale})"

    print("KERNEL_OK")
</pallas_src>

<mosaic_0001>
module attributes {stable_mosaic.version = 11 : i64} {
  func.func @std_kernel(%arg0: memref<3x256xbf16, #tpu.memory_space<vmem>>, %arg1: memref<448x128xbf16, #tpu.memory_space<vmem>>, %arg2: memref<128x10xf32, #tpu.memory_space<vmem>>, %arg3: memref<7x384xf32, #tpu.memory_space<vmem>>, %arg4: memref<640x256xf32, #tpu.memory_space<any>>, %arg5: memref<256x384xbf16, #tpu.memory_space<any>>, %arg6: memref<4x384xf32, #tpu.memory_space<vmem>>, %arg7: memref<640x256xf32, #tpu.memory_space<vmem>>, %arg8: memref<256x384xbf16, #tpu.memory_space<vmem>>, %arg9: memref<2x!tpu.dma_semaphore, #tpu.memory_space<semaphore_mem>>) attributes {dimension_semantics = [], scalar_prefetch = 0 : i64, scratch_operands = 3 : i64, tpu.core_type = #tpu.core_type<tc>} {
    %c0_i32 = arith.constant 0 : i32
    %0 = tpu.memref_slice %arg9[%c0_i32] : memref<2x!tpu.dma_semaphore, #tpu.memory_space<semaphore_mem>> -> memref<1x!tpu.dma_semaphore, #tpu.memory_space<semaphore_mem>>
    %1 = tpu.memref_squeeze %0 : memref<1x!tpu.dma_semaphore, #tpu.memory_space<semaphore_mem>> -> memref<!tpu.dma_semaphore, #tpu.memory_space<semaphore_mem>>
    tpu.enqueue_dma source(%arg4 : memref<640x256xf32, #tpu.memory_space<any>>) target(%arg7 : memref<640x256xf32, #tpu.memory_space<vmem>>) target_semaphore(%1 : memref<!tpu.dma_semaphore, #tpu.memory_space<semaphore_mem>>)
    %c1_i32 = arith.constant 1 : i32
    %2 = tpu.memref_slice %arg9[%c1_i32] : memref<2x!tpu.dma_semaphore, #tpu.memory_space<semaphore_mem>> -> memref<1x!tpu.dma_semaphore, #tpu.memory_space<semaphore_mem>>
    %3 = tpu.memref_squeeze %2 : memref<1x!tpu.dma_semaphore, #tpu.memory_space<semaphore_mem>> -> memref<!tpu.dma_semaphore, #tpu.memory_space<semaphore_mem>>
    tpu.enqueue_dma source(%arg5 : memref<256x384xbf16, #tpu.memory_space<any>>) target(%arg8 : memref<256x384xbf16, #tpu.memory_space<vmem>>) target_semaphore(%3 : memref<!tpu.dma_semaphore, #tpu.memory_space<semaphore_mem>>)
    %c0 = arith.constant 0 : index
    %c0_0 = arith.constant 0 : index
    %4 = vector.load %arg0[%c0, %c0_0] : memref<3x256xbf16, #tpu.memory_space<vmem>>, vector<3x256xbf16>
    %c0_1 = arith.constant 0 : index
    %c0_2 = arith.constant 0 : index
    %5 = vector.load %arg1[%c0_1, %c0_2] : memref<448x128xbf16, #tpu.memory_space<vmem>>, vector<64x3xbf16>
    %cst = arith.constant dense<0.000000e+00> : vector<64x256xf32>
    %6 = tpu.matmul %5, %4, %cst {dimension_numbers = #tpu.dot_dimension_numbers<[1], [0], [0], [1], [0, 0, 1, 1], [], []>} : vector<64x3xbf16>, vector<3x256xbf16>, vector<64x256xf32> -> vector<64x256xf32>
    %c0_3 = arith.constant 0 : index
    %c0_4 = arith.constant 0 : index
    %7 = vector.load %arg2[%c0_3, %c0_4] : memref<128x10xf32, #tpu.memory_space<vmem>>, vector<64x1xf32>
    %c0_5 = arith.constant 0 : index
    %c1 = arith.constant 1 : index
    %8 = vector.load %arg2[%c0_5, %c1] : memref<128x10xf32, #tpu.memory_space<vmem>>, vector<64x1xf32>
    %cst_6 = arith.constant dense<0.000000e+00> : vector<64xf32>
    %9 = vector.multi_reduction <add>, %6, %cst_6 [1] : vector<64x256xf32> to vector<64xf32>
    %10 = vector.shape_cast %9 : vector<64xf32> to vector<64x1xf32>
    %cst_7 = arith.constant 2.560000e+02 : f32
    %11 = vector.broadcast %cst_7 : f32 to vector<64x1xf32>
    %12 = arith.divf %10, %11 : vector<64x1xf32>
    %13 = vector.broadcast %12 : vector<64x1xf32> to vector<64x256xf32>
    %14 = arith.subf %6, %13 : vector<64x256xf32>
    %15 = arith.mulf %14, %14 : vector<64x256xf32>
    %cst_8 = arith.constant dense<0.000000e+00> : vector<64xf32>
    %16 = vector.multi_reduction <add>, %15, %cst_8 [1] : vector<64x256xf32> to vector<64xf32>
    %17 = vector.shape_cast %16 : vector<64xf32> to vector<64x1xf32>
    %cst_9 = arith.constant 2.560000e+02 : f32
    %18 = vector.broadcast %cst_9 : f32 to vector<64x1xf32>
    %19 = arith.divf %17, %18 : vector<64x1xf32>
    %cst_10 = arith.constant 9.99999974E-6 : f32
    %20 = vector.broadcast %cst_10 : f32 to vector<64x1xf32>
    %21 = arith.addf %19, %20 : vector<64x1xf32>
    %22 = math.rsqrt %21 : vector<64x1xf32>
    %23 = arith.mulf %7, %22 : vector<64x1xf32>
    %24 = vector.broadcast %23 : vector<64x1xf32> to vector<64x256xf32>
    %25 = arith.mulf %14, %24 : vector<64x256xf32>
    %26 = vector.broadcast %8 : vector<64x1xf32> to vector<64x256xf32>
    %27 = arith.addf %25, %26 : vector<64x256xf32>
    %cst_11 = arith.constant 0.000000e+00 : f32
    %28 = vector.broadcast %cst_11 : f32 to vector<64x256xf32>
    %29 = arith.maximumf %27, %28 : vector<64x256xf32>
    %30 = arith.truncf %29 : vector<64x256xf32> to vector<64x256xbf16>
    %c64 = arith.constant 64 : index
    %c0_12 = arith.constant 0 : index
    %31 = vector.load %arg1[%c64, %c0_12] : memref<448x128xbf16, #tpu.memory_space<vmem>>, vector<64x64xbf16>
    %cst_13 = arith.constant dense<0.000000e+00> : vector<64x256xf32>
    %32 = tpu.matmul %31, %30, %cst_13 {dimension_numbers = #tpu.dot_dimension_numbers<[1], [0], [0], [1], [0, 0, 1, 1], [], []>} : vector<64x64xbf16>, vector<64x256xbf16>, vector<64x256xf32> -> vector<64x256xf32>
    %c0_14 = arith.constant 0 : index
    %c2 = arith.constant 2 : index
    %33 = vector.load %arg2[%c0_14, %c2] : memref<128x10xf32, #tpu.memory_space<vmem>>, vector<64x1xf32>
    %c0_15 = arith.constant 0 : index
    %c3 = arith.constant 3 : index
    %34 = vector.load %arg2[%c0_15, %c3] : memref<128x10xf32, #tpu.memory_space<vmem>>, vector<64x1xf32>
    %cst_16 = arith.constant dense<0.000000e+00> : vector<64xf32>
    %35 = vector.multi_reduction <add>, %32, %cst_16 [1] : vector<64x256xf32> to vector<64xf32>
    %36 = vector.shape_cast %35 : vector<64xf32> to vector<64x1xf32>
    %cst_17 = arith.constant 2.560000e+02 : f32
    %37 = vector.broadcast %cst_17 : f32 to vector<64x1xf32>
    %38 = arith.divf %36, %37 : vector<64x1xf32>
    %39 = vector.broadcast %38 : vector<64x1xf32> to vector<64x256xf32>
    %40 = arith.subf %32, %39 : vector<64x256xf32>
    %41 = arith.mulf %40, %40 : vector<64x256xf32>
    %cst_18 = arith.constant dense<0.000000e+00> : vector<64xf32>
    %42 = vector.multi_reduction <add>, %41, %cst_18 [1] : vector<64x256xf32> to vector<64xf32>
    %43 = vector.shape_cast %42 : vector<64xf32> to vector<64x1xf32>
    %cst_19 = arith.constant 2.560000e+02 : f32
    %44 = vector.broadcast %cst_19 : f32 to vector<64x1xf32>
    %45 = arith.divf %43, %44 : vector<64x1xf32>
    %cst_20 = arith.constant 9.99999974E-6 : f32
    %46 = vector.broadcast %cst_20 : f32 to vector<64x1xf32>
    %47 = arith.addf %45, %46 : vector<64x1xf32>
    %48 = math.rsqrt %47 : vector<64x1xf32>
    %49 = arith.mulf %33, %48 : vector<64x1xf32>
    %50 = vector.broadcast %49 : vector<64x1xf32> to vector<64x256xf32>
    %51 = arith.mulf %40, %50 : vector<64x256xf32>
    %52 = vector.broadcast %34 : vector<64x1xf32> to vector<64x256xf32>
    %53 = arith.addf %51, %52 : vector<64x256xf32>
    %cst_21 = arith.constant 0.000000e+00 : f32
    %54 = vector.broadcast %cst_21 : f32 to vector<64x256xf32>
    %55 = arith.maximumf %53, %54 : vector<64x256xf32>
    %56 = arith.truncf %55 : vector<64x256xf32> to vector<64x256xbf16>
    %c128 = arith.constant 128 : index
    %c0_22 = arith.constant 0 : index
    %57 = vector.load %arg1[%c128, %c0_22] : memref<448x128xbf16, #tpu.memory_space<vmem>>, vector<64x64xbf16>
    %cst_23 = arith.constant dense<0.000000e+00> : vector<64x256xf32>
    %58 = tpu.matmul %57, %56, %cst_23 {dimension_numbers = #tpu.dot_dimension_numbers<[1], [0], [0], [1], [0, 0, 1, 1], [], []>} : vector<64x64xbf16>, vector<64x256xbf16>, vector<64x256xf32> -> vector<64x256xf32>
    %c0_24 = arith.constant 0 : index
    %c4 = arith.constant 4 : index
    %59 = vector.load %arg2[%c0_24, %c4] : memref<128x10xf32, #tpu.memory_space<vmem>>, vector<64x1xf32>
    %c0_25 = arith.constant 0 : index
    %c5 = arith.constant 5 : index
    %60 = vector.load %arg2[%c0_25, %c5] : memref<128x10xf32, #tpu.memory_space<vmem>>, vector<64x1xf32>
    %cst_26 = arith.constant dense<0.000000e+00> : vector<64xf32>
    %61 = vector.multi_reduction <add>, %58, %cst_26 [1] : vector<64x256xf32> to vector<64xf32>
    %62 = vector.shape_cast %61 : vector<64xf32> to vector<64x1xf32>
    %cst_27 = arith.constant 2.560000e+02 : f32
    %63 = vector.broadcast %cst_27 : f32 to vector<64x1xf32>
    %64 = arith.divf %62, %63 : vector<64x1xf32>
    %65 = vector.broadcast %64 : vector<64x1xf32> to vector<64x256xf32>
    %66 = arith.subf %58, %65 : vector<64x256xf32>
    %67 = arith.mulf %66, %66 : vector<64x256xf32>
    %cst_28 = arith.constant dense<0.000000e+00> : vector<64xf32>
    %68 = vector.multi_reduction <add>, %67, %cst_28 [1] : vector<64x256xf32> to vector<64xf32>
    %69 = vector.shape_cast %68 : vector<64xf32> to vector<64x1xf32>
    %cst_29 = arith.constant 2.560000e+02 : f32
    %70 = vector.broadcast %cst_29 : f32 to vector<64x1xf32>
    %71 = arith.divf %69, %70 : vector<64x1xf32>
    %cst_30 = arith.constant 9.99999974E-6 : f32
    %72 = vector.broadcast %cst_30 : f32 to vector<64x1xf32>
    %73 = arith.addf %71, %72 : vector<64x1xf32>
    %74 = math.rsqrt %73 : vector<64x1xf32>
    %75 = arith.mulf %59, %74 : vector<64x1xf32>
    %76 = vector.broadcast %75 : vector<64x1xf32> to vector<64x256xf32>
    %77 = arith.mulf %66, %76 : vector<64x256xf32>
    %78 = vector.broadcast %60 : vector<64x1xf32> to vector<64x256xf32>
    %79 = arith.addf %77, %78 : vector<64x256xf32>
    %cst_31 = arith.constant 0.000000e+00 : f32
    %80 = vector.broadcast %cst_31 : f32 to vector<64x256xf32>
    %81 = arith.maximumf %79, %80 : vector<64x256xf32>
    %82 = arith.truncf %81 : vector<64x256xf32> to vector<64x256xbf16>
    %c192 = arith.constant 192 : index
    %c0_32 = arith.constant 0 : index
    %83 = vector.load %arg1[%c192, %c0_32] : memref<448x128xbf16, #tpu.memory_space<vmem>>, vector<128x64xbf16>
    %cst_33 = arith.constant dense<0.000000e+00> : vector<128x256xf32>
    %84 = tpu.matmul %83, %82, %cst_33 {dimension_numbers = #tpu.dot_dimension_numbers<[1], [0], [0], [1], [0, 0, 1, 1], [], []>} : vector<128x64xbf16>, vector<64x256xbf16>, vector<128x256xf32> -> vector<128x256xf32>
    %c0_34 = arith.constant 0 : index
    %c6 = arith.constant 6 : index
    %85 = vector.load %arg2[%c0_34, %c6] : memref<128x10xf32, #tpu.memory_space<vmem>>, vector<128x1xf32>
    %c0_35 = arith.constant 0 : index
    %c7 = arith.constant 7 : index
    %86 = vector.load %arg2[%c0_35, %c7] : memref<128x10xf32, #tpu.memory_space<vmem>>, vector<128x1xf32>
    %cst_36 = arith.constant dense<0.000000e+00> : vector<128xf32>
    %87 = vector.multi_reduction <add>, %84, %cst_36 [1] : vector<128x256xf32> to vector<128xf32>
    %88 = vector.shape_cast %87 : vector<128xf32> to vector<128x1xf32>
    %cst_37 = arith.constant 2.560000e+02 : f32
    %89 = vector.broadcast %cst_37 : f32 to vector<128x1xf32>
    %90 = arith.divf %88, %89 : vector<128x1xf32>
    %91 = vector.broadcast %90 : vector<128x1xf32> to vector<128x256xf32>
    %92 = arith.subf %84, %91 : vector<128x256xf32>
    %93 = arith.mulf %92, %92 : vector<128x256xf32>
    %cst_38 = arith.constant dense<0.000000e+00> : vector<128xf32>
    %94 = vector.multi_reduction <add>, %93, %cst_38 [1] : vector<128x256xf32> to vector<128xf32>
    %95 = vector.shape_cast %94 : vector<128xf32> to vector<128x1xf32>
    %cst_39 = arith.constant 2.560000e+02 : f32
    %96 = vector.broadcast %cst_39 : f32 to vector<128x1xf32>
    %97 = arith.divf %95, %96 : vector<128x1xf32>
    %cst_40 = arith.constant 9.99999974E-6 : f32
    %98 = vector.broadcast %cst_40 : f32 to vector<128x1xf32>
    %99 = arith.addf %97, %98 : vector<128x1xf32>
    %100 = math.rsqrt %99 : vector<128x1xf32>
    %101 = arith.mulf %85, %100 : vector<128x1xf32>
    %102 = vector.broadcast %101 : vector<128x1xf32> to vector<128x256xf32>
    %103 = arith.mulf %92, %102 : vector<128x256xf32>
    %104 = vector.broadcast %86 : vector<128x1xf32> to vector<128x256xf32>
    %105 = arith.addf %103, %104 : vector<128x256xf32>
    %cst_41 = arith.constant 0.000000e+00 : f32
    %106 = vector.broadcast %cst_41 : f32 to vector<128x256xf32>
    %107 = arith.maximumf %105, %106 : vector<128x256xf32>
    %108 = arith.truncf %107 : vector<128x256xf32> to vector<128x256xbf16>
    %c320 = arith.constant 320 : index
    %c0_42 = arith.constant 0 : index
    %109 = vector.load %arg1[%c320, %c0_42] : memref<448x128xbf16, #tpu.memory_space<vmem>>, vector<128x128xbf16>
    %cst_43 = arith.constant dense<0.000000e+00> : vector<128x256xf32>
    %110 = tpu.matmul %109, %108, %cst_43 {dimension_numbers = #tpu.dot_dimension_numbers<[1], [0], [0], [1], [0, 0, 1, 1], [], []>} : vector<128x128xbf16>, vector<128x256xbf16>, vector<128x256xf32> -> vector<128x256xf32>
    %c0_44 = arith.constant 0 : index
    %c8 = arith.constant 8 : index
    %111 = vector.load %arg2[%c0_44, %c8] : memref<128x10xf32, #tpu.memory_space<vmem>>, vector<128x1xf32>
    %c0_45 = arith.constant 0 : index
    %c9 = arith.constant 9 : index
    %112 = vector.load %arg2[%c0_45, %c9] : memref<128x10xf32, #tpu.memory_space<vmem>>, vector<128x1xf32>
    %cst_46 = arith.constant dense<0.000000e+00> : vector<128xf32>
    %113 = vector.multi_reduction <add>, %110, %cst_46 [1] : vector<128x256xf32> to vector<128xf32>
    %114 = vector.shape_cast %113 : vector<128xf32> to vector<128x1xf32>
    %cst_47 = arith.constant 2.560000e+02 : f32
    %115 = vector.broadcast %cst_47 : f32 to vector<128x1xf32>
    %116 = arith.divf %114, %115 : vector<128x1xf32>
    %117 = vector.broadcast %116 : vector<128x1xf32> to vector<128x256xf32>
    %118 = arith.subf %110, %117 : vector<128x256xf32>
    %119 = arith.mulf %118, %118 : vector<128x256xf32>
    %cst_48 = arith.constant dense<0.000000e+00> : vector<128xf32>
    %120 = vector.multi_reduction <add>, %119, %cst_48 [1] : vector<128x256xf32> to vector<128xf32>
    %121 = vector.shape_cast %120 : vector<128xf32> to vector<128x1xf32>
    %cst_49 = arith.constant 2.560000e+02 : f32
    %122 = vector.broadcast %cst_49 : f32 to vector<128x1xf32>
    %123 = arith.divf %121, %122 : vector<128x1xf32>
    %cst_50 = arith.constant 9.99999974E-6 : f32
    %124 = vector.broadcast %cst_50 : f32 to vector<128x1xf32>
    %125 = arith.addf %123, %124 : vector<128x1xf32>
    %126 = math.rsqrt %125 : vector<128x1xf32>
    %127 = arith.mulf %111, %126 : vector<128x1xf32>
    %128 = vector.broadcast %127 : vector<128x1xf32> to vector<128x256xf32>
    %129 = arith.mulf %118, %128 : vector<128x256xf32>
    %130 = vector.broadcast %112 : vector<128x1xf32> to vector<128x256xf32>
    %131 = arith.addf %129, %130 : vector<128x256xf32>
    %cst_51 = arith.constant 0.000000e+00 : f32
    %132 = vector.broadcast %cst_51 : f32 to vector<128x256xf32>
    %133 = arith.maximumf %131, %132 : vector<128x256xf32>
    %134 = arith.truncf %133 : vector<128x256xf32> to vector<128x256xbf16>
    %135 = tpu.transpose %134, [1, 0] : vector<128x256xbf16> -> vector<256x128xbf16>
    %136 = vector.shape_cast %135 : vector<256x128xbf16> to vector<4x64x128xbf16>
    %cst_52 = arith.constant dense<0xFF80> : vector<4x128xbf16>
    %137 = vector.multi_reduction <maximumf>, %136, %cst_52 [1] : vector<4x64x128xbf16> to vector<4x128xbf16>
    %138 = arith.extf %137 : vector<4x128xbf16> to vector<4x128xf32>
    %c0_i32_53 = arith.constant 0 : i32
    %139 = tpu.memref_slice %arg9[%c0_i32_53] : memref<2x!tpu.dma_semaphore, #tpu.memory_space<semaphore_mem>> -> memref<1x!tpu.dma_semaphore, #tpu.memory_space<semaphore_mem>>
    %140 = tpu.memref_squeeze %139 : memref<1x!tpu.dma_semaphore, #tpu.memory_space<semaphore_mem>> -> memref<!tpu.dma_semaphore, #tpu.memory_space<semaphore_mem>>
    tpu.wait_dma2 semaphore(%140 : memref<!tpu.dma_semaphore, #tpu.memory_space<semaphore_mem>>) src(%arg4 : memref<640x256xf32, #tpu.memory_space<any>>) dst(%arg7 : memref<640x256xf32, #tpu.memory_space<vmem>>)
    %c0_54 = arith.constant 0 : index
    %c0_55 = arith.constant 0 : index
    %141 = vector.load %arg7[%c0_54, %c0_55] : memref<640x256xf32, #tpu.memory_space<vmem>>, vector<128x256xf32>
    %cst_56 = arith.constant dense<0.000000e+00> : vector<4x256xf32>
    %142 = tpu.matmul %138, %141, %cst_56 {dimension_numbers = #tpu.dot_dimension_numbers<[1], [0], [0], [1], [0, 0, 1, 1], [], []>} : vector<4x128xf32>, vector<128x256xf32>, vector<4x256xf32> -> vector<4x256xf32>
    %c0_57 = arith.constant 0 : index
    %c0_58 = arith.constant 0 : index
    %143 = vector.load %arg3[%c0_57, %c0_58] : memref<7x384xf32, #tpu.memory_space<vmem>>, vector<1x256xf32>
    %c1_59 = arith.constant 1 : index
    %c0_60 = arith.constant 0 : index
    %144 = vector.load %arg3[%c1_59, %c0_60] : memref<7x384xf32, #tpu.memory_space<vmem>>, vector<1x256xf32>
    %cst_61 = arith.constant dense<0.000000e+00> : vector<256xf32>
    %145 = vector.multi_reduction <add>, %142, %cst_61 [0] : vector<4x256xf32> to vector<256xf32>
    %146 = vector.shape_cast %145 : vector<256xf32> to vector<1x256xf32>
    %cst_62 = arith.constant 4.000000e+00 : f32
    %147 = vector.broadcast %cst_62 : f32 to vector<1x256xf32>
    %148 = arith.divf %146, %147 : vector<1x256xf32>
    %149 = vector.broadcast %148 : vector<1x256xf32> to vector<4x256xf32>
    %150 = arith.subf %142, %149 : vector<4x256xf32>
    %151 = arith.mulf %150, %150 : vector<4x256xf32>
    %cst_63 = arith.constant dense<0.000000e+00> : vector<256xf32>
    %152 = vector.multi_reduction <add>, %151, %cst_63 [0] : vector<4x256xf32> to vector<256xf32>
    %153 = vector.shape_cast %152 : vector<256xf32> to vector<1x256xf32>
    %cst_64 = arith.constant 4.000000e+00 : f32
    %154 = vector.broadcast %cst_64 : f32 to vector<1x256xf32>
    %155 = arith.divf %153, %154 : vector<1x256xf32>
    %cst_65 = arith.constant 9.99999974E-6 : f32
    %156 = vector.broadcast %cst_65 : f32 to vector<1x256xf32>
    %157 = arith.addf %155, %156 : vector<1x256xf32>
    %158 = math.rsqrt %157 : vector<1x256xf32>
    %159 = arith.mulf %143, %158 : vector<1x256xf32>
    %160 = vector.broadcast %159 : vector<1x256xf32> to vector<4x256xf32>
    %161 = arith.mulf %150, %160 : vector<4x256xf32>
    %162 = vector.broadcast %144 : vector<1x256xf32> to vector<4x256xf32>
    %163 = arith.addf %161, %162 : vector<4x256xf32>
    %cst_66 = arith.constant 0.000000e+00 : f32
    %164 = vector.broadcast %cst_66 : f32 to vector<4x256xf32>
    %165 = arith.maximumf %163, %164 : vector<4x256xf32>
    %c128_67 = arith.constant 128 : index
    %c0_68 = arith.constant 0 : index
    %166 = vector.load %arg7[%c128_67, %c0_68] : memref<640x256xf32, #tpu.memory_space<vmem>>, vector<256x256xf32>
    %cst_69 = arith.constant dense<0.000000e+00> : vector<4x256xf32>
    %167 = tpu.matmul %165, %166, %cst_69 {dimension_numbers = #tpu.dot_dimension_numbers<[1], [0], [0], [1], [0, 0, 1, 1], [], []>} : vector<4x256xf32>, vector<256x256xf32>, vector<4x256xf32> -> vector<4x256xf32>
    %c2_70 = arith.constant 2 : index
    %c0_71 = arith.constant 0 : index
    %168 = vector.load %arg3[%c2_70, %c0_71] : memref<7x384xf32, #tpu.memory_space<vmem>>, vector<1x256xf32>
    %c3_72 = arith.constant 3 : index
    %c0_73 = arith.constant 0 : index
    %169 = vector.load %arg3[%c3_72, %c0_73] : memref<7x384xf32, #tpu.memory_space<vmem>>, vector<1x256xf32>
    %cst_74 = arith.constant dense<0.000000e+00> : vector<256xf32>
    %170 = vector.multi_reduction <add>, %167, %cst_74 [0] : vector<4x256xf32> to vector<256xf32>
    %171 = vector.shape_cast %170 : vector<256xf32> to vector<1x256xf32>
    %cst_75 = arith.constant 4.000000e+00 : f32
    %172 = vector.broadcast %cst_75 : f32 to vector<1x256xf32>
    %173 = arith.divf %171, %172 : vector<1x256xf32>
    %174 = vector.broadcast %173 : vector<1x256xf32> to vector<4x256xf32>
    %175 = arith.subf %167, %174 : vector<4x256xf32>
    %176 = arith.mulf %175, %175 : vector<4x256xf32>
    %cst_76 = arith.constant dense<0.000000e+00> : vector<256xf32>
    %177 = vector.multi_reduction <add>, %176, %cst_76 [0] : vector<4x256xf32> to vector<256xf32>
    %178 = vector.shape_cast %177 : vector<256xf32> to vector<1x256xf32>
    %cst_77 = arith.constant 4.000000e+00 : f32
    %179 = vector.broadcast %cst_77 : f32 to vector<1x256xf32>
    %180 = arith.divf %178, %179 : vector<1x256xf32>
    %cst_78 = arith.constant 9.99999974E-6 : f32
    %181 = vector.broadcast %cst_78 : f32 to vector<1x256xf32>
    %182 = arith.addf %180, %181 : vector<1x256xf32>
    %183 = math.rsqrt %182 : vector<1x256xf32>
    %184 = arith.mulf %168, %183 : vector<1x256xf32>
    %185 = vector.broadcast %184 : vector<1x256xf32> to vector<4x256xf32>
    %186 = arith.mulf %175, %185 : vector<4x256xf32>
    %187 = vector.broadcast %169 : vector<1x256xf32> to vector<4x256xf32>
    %188 = arith.addf %186, %187 : vector<4x256xf32>
    %cst_79 = arith.constant 0.000000e+00 : f32
    %189 = vector.broadcast %cst_79 : f32 to vector<4x256xf32>
    %190 = arith.maximumf %188, %189 : vector<4x256xf32>
    %c384 = arith.constant 384 : index
    %c0_80 = arith.constant 0 : index
    %191 = vector.load %arg7[%c384, %c0_80] : memref<640x256xf32, #tpu.memory_space<vmem>>, vector<256x256xf32>
    %cst_81 = arith.constant dense<0.000000e+00> : vector<4x256xf32>
    %192 = tpu.matmul %190, %191, %cst_81 {dimension_numbers = #tpu.dot_dimension_numbers<[1], [0], [0], [1], [0, 0, 1, 1], [], []>} : vector<4x256xf32>, vector<256x256xf32>, vector<4x256xf32> -> vector<4x256xf32>
    %c4_82 = arith.constant 4 : index
    %c0_83 = arith.constant 0 : index
    %193 = vector.load %arg3[%c4_82, %c0_83] : memref<7x384xf32, #tpu.memory_space<vmem>>, vector<1x256xf32>
    %c5_84 = arith.constant 5 : index
    %c0_85 = arith.constant 0 : index
    %194 = vector.load %arg3[%c5_84, %c0_85] : memref<7x384xf32, #tpu.memory_space<vmem>>, vector<1x256xf32>
    %cst_86 = arith.constant dense<0.000000e+00> : vector<256xf32>
    %195 = vector.multi_reduction <add>, %192, %cst_86 [0] : vector<4x256xf32> to vector<256xf32>
    %196 = vector.shape_cast %195 : vector<256xf32> to vector<1x256xf32>
    %cst_87 = arith.constant 4.000000e+00 : f32
    %197 = vector.broadcast %cst_87 : f32 to vector<1x256xf32>
    %198 = arith.divf %196, %197 : vector<1x256xf32>
    %199 = vector.broadcast %198 : vector<1x256xf32> to vector<4x256xf32>
    %200 = arith.subf %192, %199 : vector<4x256xf32>
    %201 = arith.mulf %200, %200 : vector<4x256xf32>
    %cst_88 = arith.constant dense<0.000000e+00> : vector<256xf32>
    %202 = vector.multi_reduction <add>, %201, %cst_88 [0] : vector<4x256xf32> to vector<256xf32>
    %203 = vector.shape_cast %202 : vector<256xf32> to vector<1x256xf32>
    %cst_89 = arith.constant 4.000000e+00 : f32
    %204 = vector.broadcast %cst_89 : f32 to vector<1x256xf32>
    %205 = arith.divf %203, %204 : vector<1x256xf32>
    %cst_90 = arith.constant 9.99999974E-6 : f32
    %206 = vector.broadcast %cst_90 : f32 to vector<1x256xf32>
    %207 = arith.addf %205, %206 : vector<1x256xf32>
    %208 = math.rsqrt %207 : vector<1x256xf32>
    %209 = arith.mulf %193, %208 : vector<1x256xf32>
    %210 = vector.broadcast %209 : vector<1x256xf32> to vector<4x256xf32>
    %211 = arith.mulf %200, %210 : vector<4x256xf32>
    %212 = vector.broadcast %194 : vector<1x256xf32> to vector<4x256xf32>
    %213 = arith.addf %211, %212 : vector<4x256xf32>
    %cst_91 = arith.constant 0.000000e+00 : f32
    %214 = vector.broadcast %cst_91 : f32 to vector<4x256xf32>
    %215 = arith.maximumf %213, %214 : vector<4x256xf32>
    %c1_i32_92 = arith.constant 1 : i32
    %216 = tpu.memref_slice %arg9[%c1_i32_92] : memref<2x!tpu.dma_semaphore, #tpu.memory_space<semaphore_mem>> -> memref<1x!tpu.dma_semaphore, #tpu.memory_space<semaphore_mem>>
    %217 = tpu.memref_squeeze %216 : memref<1x!tpu.dma_semaphore, #tpu.memory_space<semaphore_mem>> -> memref<!tpu.dma_semaphore, #tpu.memory_space<semaphore_mem>>
    tpu.wait_dma2 semaphore(%217 : memref<!tpu.dma_semaphore, #tpu.memory_space<semaphore_mem>>) src(%arg5 : memref<256x384xbf16, #tpu.memory_space<any>>) dst(%arg8 : memref<256x384xbf16, #tpu.memory_space<vmem>>)
    %c6_93 = arith.constant 6 : index
    %c0_94 = arith.constant 0 : index
    %218 = vector.load %arg3[%c6_93, %c0_94] : memref<7x384xf32, #tpu.memory_space<vmem>>, vector<1x384xf32>
    %219 = arith.truncf %215 : vector<4x256xf32> to vector<4x256xbf16>
    %c0_95 = arith.constant 0 : index
    %c0_96 = arith.constant 0 : index
    %220 = vector.load %arg8[%c0_95, %c0_96] : memref<256x384xbf16, #tpu.memory_space<vmem>>, vector<256x384xbf16>
    %cst_97 = arith.constant dense<0.000000e+00> : vector<4x384xf32>
    %221 = tpu.matmul %219, %220, %cst_97 {dimension_numbers = #tpu.dot_dimension_numbers<[1], [0], [0], [1], [0, 0, 1, 1], [], []>} : vector<4x256xbf16>, vector<256x384xbf16>, vector<4x384xf32> -> vector<4x384xf32>
    %222 = vector.broadcast %218 : vector<1x384xf32> to vector<4x384xf32>
    %223 = arith.addf %221, %222 : vector<4x384xf32>
    %c0_98 = arith.constant 0 : index
    %c0_99 = arith.constant 0 : index
    %224 = vector.load %arg6[%c0_98, %c0_99] : memref<4x384xf32, #tpu.memory_space<vmem>>, vector<4x384xf32>
    tpu.vector_store %arg6[%c0_98, %c0_99], %223 {strides = array<i32>} : memref<4x384xf32, #tpu.memory_space<vmem>>, vector<4x384xf32>,
    return
  }
}

</mosaic_0001>

<bundles_post_ra>
// kernel: tpu_custom_call.1
= control target key start
LH: loop header
LB: loop body
LE: loop exit
PB: predicated region body
PF: predicated region fallthrough
CT: control target
= control target key end

     0   :  { %11 = vsyncpa [#allocation6], 0  ;;  %s5507_s0 = inlined_call_operand.vmem [shape: bf16[3,256], index: 0, kind: input, shape index: {}]   ;;  %s5508_s1 = inlined_call_operand.hbm [shape: bf16[448,128], index: 1, kind: input, shape index: {}]   ;;  %s5509_s2 = inlined_call_operand.vmem [shape: f32[128,10], index: 2, kind: input, shape index: {}]   ;;  %s5510_s3 = inlined_call_operand.vmem [shape: f32[7,384], index: 3, kind: input, shape index: {}]   ;;  %s5511_s4 = inlined_call_operand.hbm [shape: f32[640,256], index: 4, kind: input, shape index: {}]   ;;  %s5512_s5 = inlined_call_operand.hbm [shape: bf16[256,384], index: 5, kind: input, shape index: {}]   ;;  %s5513_s6 = inlined_call_operand.hbm [shape: f32[4,384], index: 6, kind: output, shape index: {}]  }
   0x1   :  { %12 = vsyncpa [#allocation7], 0  ;;  %s4088_s21 = smov [#allocation5]   ;;  %s4014_s25 = scalar_lea.hbm %s5508_s1, 3584 }
   0x2   :  { %s20_s22 = sshll.u32 %s4088_s21, 4  ;;  %p4015_p0 = scmp.ne.s32.totalorder %s5508_s1, %s4014_s25  ;;  %s21_s22 = int_to_ptr.vmem [resolvable:$true] %s20_s22 }
   0x3   :  { %p4018_p1 = scmp.lt.u32.totalorder %s4014_s25, %s5508_s1 }
   0x5   :  { %p4020_p2 = pnand %p4018_p1, %p4015_p0 }
   0x7   :  { %4023 = shalt.err (!%p4020_p2)
}
   0x8   :  { %s4024_s30 = scalar_lea.vmem %s21_s22, 3584  ;;  %p4029_p4 = scmp.lt.s32.totalorder %s21_s22, %s21_s22 }
   0x9   :  { %p4025_p3 = scmp.ne.s32.totalorder %s21_s22, %s4024_s30  ;;  %p4030_p5 = scmp.lt.s32.totalorder %s4024_s30, %s4024_s30 }
   0xb   :  { %p4031_p6 = por %p4030_p5, %p4029_p4 }
   0xd   :  { %p4032_p7 = pnand %p4031_p6, %p4025_p3 }
   0xf   :  { %4035 = shalt.err (!%p4032_p7)
}
  0x10   :  { %s4089_s7 = smov 64   ;;  %s4090_s8 = smov 4  }
  0x11   :  { %26 = dma.hbm_to_vmem [thread:$0]  %s5508_s1, 3584, %s21_s22, [#allocation6], %s4089_s7, %s4089_s7, %s4090_s8  }
  0x12   :  { %4080 = dma.done.wait [#allocation6], 3584  }
  0x13   :  { %4081 = vsyncadd [#allocation6], 4294963712  ;;  %s51_s11 = sld [smem:[#allocation0]]   ;;  %s4091_s12 = smov 384   ;;  %v5514_v0 = vmov 0  }
  0x14   :  { %63 = sst [smem:[#allocation14]] %s4091_s12  ;;  %175 = vmatprep.mubr.bf16.mxu0 %v5514_v0  ;;  %3803 = vset.pattern.permute.xlu0 %v5514_v0  ;;  %s4093_s13 = smov 3  }
  0x15   :  { %65 = sst [smem:[#allocation14 + $0x1]] %s4091_s12  ;;  %554 = vmatprep.mubr.bf16.mxu1 %v5514_v0  ;;  %s4094_s14 = smov 128  }
  0x16   :  { %67 = sst [smem:[#allocation14 + $0x2]] %s4093_s13  ;;  %s4095_s15 = smov 2  }
  0x17   :  { %69 = sst [smem:[#allocation14 + $0x3]] %s4089_s7  ;;  %s4096_s1 = smov [#allocation2]  }
  0x18   :  { %71 = sst [smem:[#allocation14 + $0x4]] %s4094_s14  ;;  %s42_s16 = sshll.u32 %s4096_s1, 4  ;;  %s43_s16 = int_to_ptr.vmem [resolvable:$true] %s42_s16 }
  0x19   :  { %73 = sst [smem:[#allocation14 + $0x5]] %s4095_s15  ;;  %s3535_s17 = sshll.u32 %s51_s11, 26 }
  0x1a   :  { %s4097_s18 = smov 192   ;;  %s3536_s19 = sadd.s32 134217728, %s3535_s17 }
  0x1b   :  { %75 = sst [smem:[#allocation14 + $0x6]] %s4097_s18  ;;  %s4036_s22 = scalar_lea.hbm %s5511_s4, 20480 }
  0x1c   :  { %77 = sst [smem:[#allocation14 + $0x7]] %s4089_s7  ;;  %p4037_p8 = scmp.ne.s32.totalorder %s5511_s4, %s4036_s22 }
  0x1d   :  { %79 = sst [smem:[#allocation14 + $0x8]] %s4090_s8  ;;  %p4040_p9 = scmp.lt.u32.totalorder %s4036_s22, %s5511_s4 }
  0x1f   :  { %p4042_p10 = pnand %p4040_p9, %p4037_p8 }
  0x21   :  { %4045 = shalt.err (!%p4042_p10)  }
  0x22   :  { %s4046_s27 = scalar_lea.vmem %s43_s16, 20480  ;;  %p4051_p12 = scmp.lt.s32.totalorder %s43_s16, %s43_s16 }
  0x23   :  { %p4047_p11 = scmp.ne.s32.totalorder %s43_s16, %s4046_s27  ;;  %p4052_p13 = scmp.lt.s32.totalorder %s4046_s27, %s4046_s27 }
  0x25   :  { %p4053_p0 = por %p4052_p13, %p4051_p12 }
  0x27   :  { %p4054_p1 = pnand %p4053_p0, %p4047_p11 }
  0x29   :  { %4057 = shalt.err (!%p4054_p1)  }
  0x2a   :  { %45 = dma.hbm_to_vmem [thread:$0]  %s5511_s4, 20480, %s43_s16, [#allocation4]  ;;  %vm133_vm0 = vcmask 1040384   ;;  %vm134_vm1 = vcmask 1041408   ;;  %v4101_v1 = vmov 65535   ;;  %vm120_vm2 = vcmask 23552  }
  0x2b   :  { %s4098_s30 = smov [#allocation3]   ;;  %s4099_s8 = smov [#allocation4 + $0x1]   ;;  %v135_v2 = vsel %vm133_vm0, 4294967295, %v4101_v1  ;;  %v4102_v36 = vmov 1   ;;  %vm509_vm3 = vcmask 523264  }
  0x2c   :  { %s59_s7 = sshll.u32 %s4098_s30, 4  ;;  %s4100_s9 = smov [#allocation13]   ;;  %v136_v3 = vsel %vm134_vm1, %v135_v2, 0  ;;  %3802 = vset.pattern.permute.xlu1 %v4102_v36  ;;  %s60_s7 = int_to_ptr.vmem [resolvable:$true] %s59_s7 }
  0x2d   :  { %81 = dma.general %s5512_s5, 6144, %s60_s7, %s4099_s8, %s4100_s9, [#allocation14], %s3536_s19, 0  }
  0x2e   :  { %v3541_v4 = vld.sshfl [vmem:[%s5507_s0] sm:$0x33 pattern:$0x76325410]  ;;  %v3840_v9 = vld [vmem:[#allocation5 + $0x8] sm:$0xff]   ;;  %v3841_v10 = vld [vmem:[#allocation5 + $0x10] sm:$0xff]  }
  0x2f   :  { %v119_v5 = vcombine.high %v3541_v4, %v3541_v4  ;;  %v138_v6 = vand.u32 %v3541_v4, %v136_v3  ;;  %v3839_v8 = vld [vmem:[#allocation5] sm:$0xff]   ;;  %v3842_v11 = vld [vmem:[#allocation5 + $0x18] sm:$0xff]  }
  0x31   :  { %v141_v7 = vand.u32 %v136_v3, %v119_v5 }
  0x33   :  { %143 = vmatprep.subr.bf16.mxu0 %v141_v7 }
  0x34   :  { %144 = vmatpush1.bf16.msra.mxu0 %v138_v6 }
  0x37   :  { %3542 = vmatmul.mubr.msk.bf16.vlgmr.msra.gmra.mrb[0].mxu0 %vm120_vm2, %v3839_v8 }
  0x38   :  { %185 = vmatprep.mubr.bf16.mxu0 %v5514_v0 }
  0x3f   :  { %3543 = vmatmul.mubr.msk.bf16.gmra.mrb[4].mxu0 %vm120_vm2, %v3840_v9 }
  0x40   :  { %195 = vmatprep.mubr.bf16.mxu0 %v5514_v0 }
  0x47   :  { %3544 = vmatmul.mubr.msk.bf16.gmra.mrb[8].mxu0 %vm120_vm2, %v3841_v10 }
  0x48   :  { %205 = vmatprep.mubr.bf16.mxu0 %v5514_v0 }
  0x4f   :  { %3545 = vmatmul.mubr.msk.bf16.gmra.mrb[12].mxu0 %vm120_vm2, %v3842_v11 }
  0x50   :  { %915 = vmatprep.mubr.bf16.mxu0 %v5514_v0 }
 0x10a   :  { %v177_v12 = vpop.f32.mrb[0].mxu0 }
 0x10b   :  { %v179_v13 = vpop.f32.mrb[1].mxu0 }
 0x10c   :  { %v181_v14 = vpop.f32.mrb[2].mxu0  ;;  %v224_v15 = vadd.f32 %v179_v13, %v177_v12 }
 0x10d   :  { %v183_v16 = vpop.f32.mrb[3].mxu0 }
 0x10e   :  { %225 = vadd.xlane.f32.xlu0 %v224_v15  ;;  %v227_v17 = vadd.f32 %v183_v16, %v181_v14 }
 0x112   :  { %228 = vadd.xlane.f32.xlu0 %v227_v17  ;;  %v187_v18 = vpop.f32.mrb[4].mxu0 }
 0x113   :  { %v189_v19 = vpop.f32.mrb[5].mxu0 }
 0x114   :  { %v191_v20 = vpop.f32.mrb[6].mxu0  ;;  %v230_v21 = vadd.f32 %v189_v19, %v187_v18 }
 0x115   :  { %v193_v22 = vpop.f32.mrb[7].mxu0 }
 0x116   :  { %231 = vadd.xlane.f32.xlu1 %v230_v21  ;;  %v233_v23 = vadd.f32 %v193_v22, %v191_v20 }
 0x11a   :  { %234 = vadd.xlane.f32.xlu1 %v233_v23  ;;  %v197_v24 = vpop.f32.mrb[8].mxu0 }
 0x11b   :  { %v199_v25 = vpop.f32.mrb[9].mxu0 }
 0x11c   :  { %v201_v26 = vpop.f32.mrb[10].mxu0  ;;  %v236_v27 = vadd.f32 %v199_v25, %v197_v24 }
 0x11d   :  { %v203_v28 = vpop.f32.mrb[11].mxu0 }
 0x11e   :  { %237 = vadd.xlane.f32.xlu0 %v236_v27  ;;  %v239_v29 = vadd.f32 %v203_v28, %v201_v26 }
 0x120   :  { %240 = vadd.xlane.f32.xlu1 %v239_v29 }
 0x122   :  { %v207_v30 = vpop.f32.mrb[12].mxu0 }
 0x123   :  { %v209_v31 = vpop.f32.mrb[13].mxu0 }
 0x124   :  { %v211_v32 = vpop.f32.mrb[14].mxu0  ;;  %v242_v33 = vadd.f32 %v209_v31, %v207_v30 }
 0x125   :  { %v213_v34 = vpop.f32.mrb[15].mxu0 }
 0x126   :  { %243 = vadd.xlane.f32.xlu0 %v242_v33  ;;  %v245_v35 = vadd.f32 %v213_v34, %v211_v32  ;;  %v4272_v33 = vld [vmem:[%s5509_s2 + $0x18] sm:$0xff] }
 0x128   :  { %246 = vadd.xlane.f32.xlu1 %v245_v35 }
 0x19b   :  { %v226_v37 = vpop.xlane.xlu0 %225 }
 0x19c   :  { %v249_v38 = vmul.f32 0.00390625, %v226_v37 }
 0x19e   :  { %v4187_v39 = vsub.f32 %v177_v12, %v249_v38  ;;  %v4189_v40 = vsub.f32 %v179_v13, %v249_v38 }
 0x19f   :  { %v229_v41 = vpop.xlane.xlu0 %228 }
 0x1a0   :  { %v250_v42 = vmul.f32 0.00390625, %v229_v41  ;;  %v273_v43 = vmul.f32 %v4187_v39, %v4187_v39  ;;  %v274_v44 = vmul.f32 %v4189_v40, %v4189_v40 }
 0x1a2   :  { %v4195_v45 = vsub.f32 %v181_v14, %v250_v42  ;;  %v4197_v46 = vsub.f32 %v183_v16, %v250_v42  ;;  %v289_v47 = vadd.f32 %v274_v44, %v273_v43 }
 0x1a3   :  { %v232_v48 = vpop.xlane.xlu1 %231 }
 0x1a4   :  { %v251_v49 = vmul.f32 0.00390625, %v232_v48  ;;  %290 = vadd.xlane.f32.xlu0 %v289_v47  ;;  %v275_v50 = vmul.f32 %v4195_v45, %v4195_v45  ;;  %v276_v51 = vmul.f32 %v4197_v46, %v4197_v46 }
 0x1a6   :  { %v4203_v52 = vsub.f32 %v187_v18, %v251_v49  ;;  %v4205_v53 = vsub.f32 %v189_v19, %v251_v49  ;;  %v292_v54 = vadd.f32 %v276_v51, %v275_v50 }
 0x1a7   :  { %v235_v55 = vpop.xlane.xlu1 %234 }
 0x1a8   :  { %v252_v56 = vmul.f32 0.00390625, %v235_v55  ;;  %293 = vadd.xlane.f32.xlu1 %v292_v54  ;;  %v277_v57 = vmul.f32 %v4203_v52, %v4203_v52  ;;  %v278_v58 = vmul.f32 %v4205_v53, %v4205_v53 }
 0x1aa   :  { %v4211_v59 = vsub.f32 %v191_v20, %v252_v56  ;;  %v4213_v60 = vsub.f32 %v193_v22, %v252_v56  ;;  %v295_v61 = vadd.f32 %v278_v58, %v277_v57 }
 0x1ab   :  { %v238_v62 = vpop.xlane.xlu0 %237 }
 0x1ac   :  { %v253_v63 = vmul.f32 0.00390625, %v238_v62  ;;  %296 = vadd.xlane.f32.xlu0 %v295_v61  ;;  %v279_v1 = vmul.f32 %v4211_v59, %v4211_v59  ;;  %v280_v2 = vmul.f32 %v4213_v60, %v4213_v60 }
 0x1ad   :  { %v241_v3 = vpop.xlane.xlu1 %240 }
 0x1ae   :  { %v4219_v4 = vsub.f32 %v197_v24, %v253_v63  ;;  %v4221_v5 = vsub.f32 %v199_v25, %v253_v63  ;;  %v254_v6 = vmul.f32 0.00390625, %v241_v3  ;;  %v298_v7 = vadd.f32 %v280_v2, %v279_v1  ;;  %v4287_v2 = vld [vmem:[%s5509_s2 + $0x28] sm:$0xff] }
 0x1b0   :  { %v4223_v8 = vsub.f32 %v201_v26, %v254_v6  ;;  %v4225_v9 = vsub.f32 %v203_v28, %v254_v6  ;;  %299 = vadd.xlane.f32.xlu1 %v298_v7  ;;  %v281_v10 = vmul.f32 %v4219_v4, %v4219_v4  ;;  %v282_v11 = vmul.f32 %v4221_v5, %v4221_v5 }
 0x1b2   :  { %v301_v12 = vadd.f32 %v282_v11, %v281_v10  ;;  %v283_v13 = vmul.f32 %v4223_v8, %v4223_v8  ;;  %v284_v14 = vmul.f32 %v4225_v9, %v4225_v9 }
 0x1b3   :  { %v244_v15 = vpop.xlane.xlu0 %243 }
 0x1b4   :  { %v255_v16 = vmul.f32 0.00390625, %v244_v15  ;;  %302 = vadd.xlane.f32.xlu0 %v301_v12  ;;  %v304_v17 = vadd.f32 %v284_v14, %v283_v13 }
 0x1b5   :  { %v247_v18 = vpop.xlane.xlu1 %246 }
 0x1b6   :  { %v4235_v19 = vsub.f32 %v207_v30, %v255_v16  ;;  %v4237_v20 = vsub.f32 %v209_v31, %v255_v16  ;;  %v256_v21 = vmul.f32 0.00390625, %v247_v18  ;;  %305 = vadd.xlane.f32.xlu1 %v304_v17  ;;  %v4254_v30 = vld [vmem:[%s5509_s2] sm:$0xff]  ;;  %v4260_v31 = vld [vmem:[%s5509_s2 + $0x8] sm:$0xff] }
 0x1b8   :  { %v4239_v22 = vsub.f32 %v211_v32, %v256_v21  ;;  %v4241_v23 = vsub.f32 %v213_v34, %v256_v21  ;;  %v285_v24 = vmul.f32 %v4235_v19, %v4235_v19  ;;  %v286_v25 = vmul.f32 %v4237_v20, %v4237_v20  ;;  %v4266_v32 = vld [vmem:[%s5509_s2 + $0x10] sm:$0xff]  ;;  %v4278_v34 = vld [vmem:[%s5509_s2 + $0x20] sm:$0xff] }
 0x1ba   :  { %v307_v26 = vadd.f32 %v286_v25, %v285_v24  ;;  %v287_v27 = vmul.f32 %v4239_v22, %v4239_v22  ;;  %v288_v28 = vmul.f32 %v4241_v23, %v4241_v23 }
 0x1bc   :  { %308 = vadd.xlane.f32.xlu0 %v307_v26  ;;  %v310_v29 = vadd.f32 %v288_v28, %v287_v27  ;;  %v4299_v26 = vld [vmem:[%s5509_s2 + $0x30] sm:$0xff] }
 0x1be   :  { %311 = vadd.xlane.f32.xlu1 %v310_v29 }
 0x1cf   :  { %403 = vperm.xlu1 %3802, %v4254_v30  }
 0x1d3   :  { %408 = vperm.xlu1 %3802, %v4260_v31  }
 0x1d7   :  { %413 = vperm.xlu1 %3802, %v4266_v32  }
 0x1db   :  { %418 = vperm.xlu1 %3802, %v4272_v33  }
 0x1df   :  { %423 = vperm.xlu1 %3802, %v4278_v34  }
 0x1e3   :  { %3805 = vset.pattern.permute.xlu1 %v5514_v0 }
 0x231   :  { %v291_v35 = vpop.xlane.xlu0 %290 }
 0x232   :  { %v313_v37 = vmul.f32 0.00390625, %v291_v35  ;;  %v4307_v35 = vld [vmem:[%s5509_s2 + $0x38] sm:$0xff] }
 0x234   :  { %v321_v38 = vadd.f32 1e-05, %v313_v37 }
 0x235   :  { %v294_v41 = vpop.xlane.xlu1 %293 }
 0x236   :  { %3867 = vrsqrt.f32 %v321_v38  ;;  %v314_v42 = vmul.f32 0.00390625, %v294_v41 }
 0x238   :  { %v322_v43 = vadd.f32 1e-05, %v314_v42 }
 0x239   :  { %v297_v44 = vpop.xlane.xlu0 %296 }
 0x23a   :  { %3869 = vrsqrt.f32 %v322_v43  ;;  %v315_v47 = vmul.f32 0.00390625, %v297_v44 }
 0x23c   :  { %v323_v48 = vadd.f32 1e-05, %v315_v47 }
 0x23d   :  { %v300_v49 = vpop.xlane.xlu1 %299 }
 0x23e   :  { %3871 = vrsqrt.f32 %v323_v48  ;;  %v316_v50 = vmul.f32 0.00390625, %v300_v49 }
 0x240   :  { %v3868_v51 = vpop.eup %3867  ;;  %v324_v54 = vadd.f32 1e-05, %v316_v50 }
 0x241   :  { %v303_v55 = vpop.xlane.xlu0 %302  ;;  %v337_v56 = vmul.f32 %v3868_v51, %v4254_v30 }
 0x242   :  { %3873 = vrsqrt.f32 %v324_v54  ;;  %v317_v57 = vmul.f32 0.00390625, %v303_v55 }
 0x243   :  { %347 = vperm.xlu0 %3803, %v337_v56   ;;  %v306_v58 = vpop.xlane.xlu1 %305 }
 0x244   :  { %v3870_v61 = vpop.eup %3869  ;;  %v325_v62 = vadd.f32 1e-05, %v317_v57  ;;  %v318_v63 = vmul.f32 0.00390625, %v306_v58 }
 0x245   :  { %v338_v1 = vmul.f32 %v3870_v61, %v4260_v31 }
 0x246   :  { %3875 = vrsqrt.f32 %v325_v62  ;;  %v326_v3 = vadd.f32 1e-05, %v318_v63 }
 0x247   :  { %352 = vperm.xlu1 %3805, %v338_v1   ;;  %3804 = vset.pattern.permute.xlu0 %v4102_v36 }
 0x248   :  { %v3872_v6 = vpop.eup %3871  ;;  %3877 = vrsqrt.f32 %v326_v3  ;;  %428 = vperm.xlu0 %3804, %v4287_v2  }
 0x249   :  { %v309_v7 = vpop.xlane.xlu0 %308  ;;  %v339_v10 = vmul.f32 %v3872_v6, %v4266_v32 }
 0x24a   :  { %v319_v11 = vmul.f32 0.00390625, %v309_v7 }
 0x24b   :  { %357 = vperm.xlu1 %3805, %v339_v10   ;;  %v312_v12 = vpop.xlane.xlu1 %311 }
 0x24c   :  { %v3874_v13 = vpop.eup %3873  ;;  %v327_v14 = vadd.f32 1e-05, %v319_v11  ;;  %v320_v15 = vmul.f32 0.00390625, %v312_v12  ;;  %3806 = vset.pattern.permute.xlu0 %v5514_v0 }
 0x24d   :  { %v340_v16 = vmul.f32 %v3874_v13, %v4272_v33 }
 0x24e   :  { %3879 = vrsqrt.f32 %v327_v14  ;;  %v328_v17 = vadd.f32 1e-05, %v320_v15 }
 0x24f   :  { %362 = vperm.xlu1 %3805, %v340_v16   ;;  %v404_v38 = vpop.permute.xlu1 %403 }
 0x250   :  { %v3876_v18 = vpop.eup %3875  ;;  %3881 = vrsqrt.f32 %v328_v17 }
 0x251   :  { %v341_v21 = vmul.f32 %v3876_v18, %v4278_v34 }
 0x252   :  { %v3878_v24 = vpop.eup %3877 }
 0x253   :  { %367 = vperm.xlu1 %3805, %v341_v21   ;;  %v342_v25 = vmul.f32 %v3878_v24, %v4287_v2  ;;  %v409_v41 = vpop.permute.xlu1 %408 }
 0x255   :  { %372 = vperm.xlu0 %3806, %v342_v25  }
 0x257   :  { %v414_v42 = vpop.permute.xlu1 %413 }
 0x258   :  { %v3880_v27 = vpop.eup %3879 }
 0x259   :  { %v343_v28 = vmul.f32 %v3880_v27, %v4299_v26  ;;  %3807 = vset.pattern.permute.xlu0 %v4102_v36 }
 0x25a   :  { %v3882_v29 = vpop.eup %3881  ;;  %433 = vperm.xlu0 %3807, %v4299_v26  }
 0x25b   :  { %377 = vperm.xlu1 %3805, %v343_v28   ;;  %v344_v37 = vmul.f32 %v3882_v29, %v4307_v35  ;;  %v419_v43 = vpop.permute.xlu1 %418 }
 0x25f   :  { %382 = vperm.xlu1 %3805, %v344_v37   ;;  %v424_v44 = vpop.permute.xlu1 %423 }
 0x263   :  { %3808 = vset.pattern.permute.xlu1 %v4102_v36 }
 0x264   :  { %438 = vperm.xlu1 %3808, %v4307_v35  }
 0x2c2   :  { %v348_v47 = vpop.permute.xlu0 %347 }
 0x2c3   :  { %v385_v48 = vmul.f32 %v348_v47, %v4187_v39  ;;  %v386_v49 = vmul.f32 %v348_v47, %v4189_v40 }
 0x2c5   :  { %v442_v55 = vadd.f32 %v404_v38, %v386_v49  ;;  %v441_v56 = vadd.f32 %v404_v38, %v385_v48 }
 0x2c6   :  { %v353_v50 = vpop.permute.xlu1 %352 }
 0x2c7   :  { %v387_v51 = vmul.f32 %v353_v50, %v4195_v45  ;;  %v388_v54 = vmul.f32 %v353_v50, %v4197_v46  ;;  %v458_v61 = vmax.f32 %v442_v55, 0.0  ;;  %v457_v63 = vmax.f32 %v441_v56, 0.0  ;;  %v429_v10 = vpop.permute.xlu0 %428 }
 0x2c9   :  { %v444_v36 = vadd.f32 %v409_v41, %v388_v54  ;;  %v443_v57 = vadd.f32 %v409_v41, %v387_v51 }
 0x2ca   :  { %v358_v58 = vpop.permute.xlu1 %357 }
 0x2cb   :  { %v460_v62 = vmax.f32 %v444_v36, 0.0  ;;  %v459_v1 = vmax.f32 %v443_v57, 0.0  ;;  %v389_v3 = vmul.f32 %v358_v58, %v4203_v52  ;;  %v390_v39 = vmul.f32 %v358_v58, %v4205_v53 }
 0x2cd   :  { %v474_v6 = vpack.c.bf16 %v460_v62, %v458_v61  ;;  %v473_v40 = vpack.c.bf16 %v459_v1, %v457_v63  ;;  %v445_v11 = vadd.f32 %v414_v42, %v389_v3  ;;  %v446_v12 = vadd.f32 %v414_v42, %v390_v39  ;;  %v3846_v3 = vld [vmem:[#allocation5 + $0x38] sm:$0xff]  }
 0x2ce   :  { %v363_v7 = vpop.permute.xlu1 %362 }
 0x2cf   :  { %v391_v45 = vmul.f32 %v363_v7, %v4211_v59  ;;  %v392_v46 = vmul.f32 %v363_v7, %v4213_v60  ;;  %522 = vmatprep.subr.bf16.mxu1 %v474_v6  ;;  %v462_v21 = vmax.f32 %v446_v12, 0.0  ;;  %v461_v24 = vmax.f32 %v445_v11, 0.0 }
 0x2d0   :  { %523 = vmatpush1.bf16.msra.mxu1 %v473_v40 }
 0x2d1   :  { %v447_v13 = vadd.f32 %v419_v43, %v391_v45  ;;  %v448_v14 = vadd.f32 %v419_v43, %v392_v46 }
 0x2d2   :  { %v368_v15 = vpop.permute.xlu1 %367 }
 0x2d3   :  { %v393_v16 = vmul.f32 %v368_v15, %v4219_v4  ;;  %v394_v52 = vmul.f32 %v368_v15, %v4221_v5  ;;  %v464_v53 = vmax.f32 %v448_v14, 0.0  ;;  %v463_v17 = vmax.f32 %v447_v13, 0.0 }
 0x2d4   :  { %v373_v18 = vpop.permute.xlu0 %372 }
 0x2d5   :  { %v449_v25 = vadd.f32 %v424_v44, %v393_v16  ;;  %v450_v59 = vadd.f32 %v424_v44, %v394_v52  ;;  %v395_v60 = vmul.f32 %v373_v18, %v4223_v8  ;;  %v396_v27 = vmul.f32 %v373_v18, %v4225_v9 }
 0x2d6   :  { %v476_v28 = vpack.c.bf16 %v464_v53, %v462_v21  ;;  %v475_v29 = vpack.c.bf16 %v463_v17, %v461_v24 }
 0x2d7   :  { %v451_v37 = vadd.f32 %v429_v10, %v395_v60  ;;  %v452_v38 = vadd.f32 %v429_v10, %v396_v27  ;;  %v466_v4 = vmax.f32 %v450_v59, 0.0  ;;  %v465_v5 = vmax.f32 %v449_v25, 0.0 }
 0x2d8   :  { %524 = vmatprep.subr.bf16.mxu1 %v476_v28 }
 0x2d9   :  { %525 = vmatpush1.bf16.msra.mxu1 %v475_v29  ;;  %v468_v41 = vmax.f32 %v452_v38, 0.0  ;;  %v467_v42 = vmax.f32 %v451_v37, 0.0  ;;  %v434_v49 = vpop.permute.xlu0 %433  ;;  %v4103_v29 = vmov 3  }
 0x2da   :  { %v378_v43 = vpop.permute.xlu1 %377  ;;  %3809 = vset.pattern.permute.xlu1 %v4103_v29 }
 0x2db   :  { %v478_v47 = vpack.c.bf16 %v468_v41, %v466_v4  ;;  %v477_v48 = vpack.c.bf16 %v467_v42, %v465_v5  ;;  %v397_v44 = vmul.f32 %v378_v43, %v4235_v19  ;;  %v398_v8 = vmul.f32 %v378_v43, %v4237_v20  ;;  %v3843_v20 = vld [vmem:[#allocation5 + $0x20] sm:$0xff]  }
 0x2dd   :  { %526 = vmatprep.subr.bf16.mxu1 %v478_v47  ;;  %v453_v50 = vadd.f32 %v434_v49, %v397_v44  ;;  %v454_v51 = vadd.f32 %v434_v49, %v398_v8 }
 0x2de   :  { %527 = vmatpush1.bf16.msra.mxu1 %v477_v48  ;;  %v383_v9 = vpop.permute.xlu1 %382 }
 0x2df   :  { %v399_v54 = vmul.f32 %v383_v9, %v4239_v22  ;;  %v400_v55 = vmul.f32 %v383_v9, %v4241_v23  ;;  %v469_v58 = vmax.f32 %v453_v50, 0.0  ;;  %v470_v61 = vmax.f32 %v454_v51, 0.0  ;;  %v3844_v22 = vld [vmem:[#allocation5 + $0x28] sm:$0xff]   ;;  %v3845_v23 = vld [vmem:[#allocation5 + $0x30] sm:$0xff]  }
 0x2e3   :  { %v439_v56 = vpop.permute.xlu1 %438 }
 0x2e4   :  { %v455_v36 = vadd.f32 %v439_v56, %v399_v54  ;;  %v456_v57 = vadd.f32 %v439_v56, %v400_v55 }
 0x2e6   :  { %v471_v62 = vmax.f32 %v455_v36, 0.0  ;;  %v472_v63 = vmax.f32 %v456_v57, 0.0 }
 0x2e8   :  { %v480_v1 = vpack.c.bf16 %v472_v63, %v470_v61  ;;  %v479_v19 = vpack.c.bf16 %v471_v62, %v469_v58 }
 0x2ea   :  { %528 = vmatprep.subr.bf16.mxu1 %v480_v1 }
 0x2eb   :  { %529 = vmatpush1.bf16.msra.mxu1 %v479_v19 }
 0x2ee   :  { %3550 = vmatmul.mubr.msk.bf16.vlgmr.msra.gmra.mrb[0].mxu1 %vm509_vm3, %v3843_v20 }
 0x2ef   :  { %564 = vmatprep.mubr.bf16.mxu1 %v5514_v0 }
 0x2f6   :  { %3551 = vmatmul.mubr.msk.bf16.gmra.mrb[4].mxu1 %vm509_vm3, %v3844_v22 }
 0x2f7   :  { %574 = vmatprep.mubr.bf16.mxu1 %v5514_v0 }
 0x2fe   :  { %3552 = vmatmul.mubr.msk.bf16.gmra.mrb[8].mxu1 %vm509_vm3, %v3845_v23 }
 0x2ff   :  { %584 = vmatprep.mubr.bf16.mxu1 %v5514_v0 }
 0x306   :  { %3553 = vmatmul.mubr.msk.bf16.gmra.mrb[12].mxu1 %vm509_vm3, %v3846_v3 }
 0x307   :  { %1316 = vmatprep.mubr.bf16.mxu1 %v5514_v0 }
 0x3c1   :  { %v556_v39 = vpop.f32.mrb[0].mxu1 }
 0x3c2   :  { %v558_v6 = vpop.f32.mrb[1].mxu1 }
 0x3c3   :  { %v560_v40 = vpop.f32.mrb[2].mxu1  ;;  %v595_v7 = vadd.f32 %v558_v6, %v556_v39 }
 0x3c4   :  { %v562_v10 = vpop.f32.mrb[3].mxu1 }
 0x3c5   :  { %596 = vadd.xlane.f32.xlu0 %v595_v7  ;;  %v598_v45 = vadd.f32 %v562_v10, %v560_v40 }
 0x3c7   :  { %599 = vadd.xlane.f32.xlu1 %v598_v45 }
 0x3c9   :  { %v566_v46 = vpop.f32.mrb[4].mxu1 }
 0x3ca   :  { %v568_v11 = vpop.f32.mrb[5].mxu1 }
 0x3cb   :  { %v570_v12 = vpop.f32.mrb[6].mxu1  ;;  %v601_v13 = vadd.f32 %v568_v11, %v566_v46 }
 0x3cc   :  { %v572_v14 = vpop.f32.mrb[7].mxu1 }
 0x3cd   :  { %602 = vadd.xlane.f32.xlu0 %v601_v13  ;;  %v604_v15 = vadd.f32 %v572_v14, %v570_v12 }
 0x3d1   :  { %605 = vadd.xlane.f32.xlu0 %v604_v15  ;;  %v576_v16 = vpop.f32.mrb[8].mxu1 }
 0x3d2   :  { %v578_v52 = vpop.f32.mrb[9].mxu1 }
 0x3d3   :  { %v580_v53 = vpop.f32.mrb[10].mxu1  ;;  %v607_v17 = vadd.f32 %v578_v52, %v576_v16 }
 0x3d4   :  { %v582_v18 = vpop.f32.mrb[11].mxu1 }
 0x3d5   :  { %608 = vadd.xlane.f32.xlu1 %v607_v17  ;;  %v610_v21 = vadd.f32 %v582_v18, %v580_v53 }
 0x3d7   :  { %611 = vadd.xlane.f32.xlu0 %v610_v21 }
 0x3d9   :  { %v586_v24 = vpop.f32.mrb[12].mxu1 }
 0x3da   :  { %v588_v25 = vpop.f32.mrb[13].mxu1 }
 0x3db   :  { %v590_v59 = vpop.f32.mrb[14].mxu1  ;;  %v613_v60 = vadd.f32 %v588_v25, %v586_v24 }
 0x3dc   :  { %v592_v27 = vpop.f32.mrb[15].mxu1 }
 0x3dd   :  { %614 = vadd.xlane.f32.xlu1 %v613_v60  ;;  %v616_v28 = vadd.f32 %v592_v27, %v590_v59 }
 0x3df   :  { %617 = vadd.xlane.f32.xlu0 %v616_v28 }
 0x452   :  { %v597_v37 = vpop.xlane.xlu0 %596 }
 0x453   :  { %v619_v38 = vmul.f32 0.00390625, %v597_v37 }
 0x454   :  { %v600_v4 = vpop.xlane.xlu1 %599 }
 0x455   :  { %v4337_v41 = vsub.f32 %v556_v39, %v619_v38  ;;  %v4339_v5 = vsub.f32 %v558_v6, %v619_v38  ;;  %v620_v42 = vmul.f32 0.00390625, %v600_v4 }
 0x457   :  { %v4341_v43 = vsub.f32 %v560_v40, %v620_v42  ;;  %v4343_v47 = vsub.f32 %v562_v10, %v620_v42  ;;  %v643_v48 = vmul.f32 %v4337_v41, %v4337_v41  ;;  %v644_v44 = vmul.f32 %v4339_v5, %v4339_v5 }
 0x459   :  { %v659_v8 = vadd.f32 %v644_v44, %v643_v48  ;;  %v645_v9 = vmul.f32 %v4341_v43, %v4341_v43  ;;  %v646_v49 = vmul.f32 %v4343_v47, %v4343_v47 }
 0x45a   :  { %v603_v50 = vpop.xlane.xlu0 %602 }
 0x45b   :  { %v621_v51 = vmul.f32 0.00390625, %v603_v50  ;;  %660 = vadd.xlane.f32.xlu1 %v659_v8  ;;  %v662_v54 = vadd.f32 %v646_v49, %v645_v9 }
 0x45d   :  { %v4353_v55 = vsub.f32 %v566_v46, %v621_v51  ;;  %v4355_v56 = vsub.f32 %v568_v11, %v621_v51  ;;  %663 = vadd.xlane.f32.xlu0 %v662_v54 }
 0x45e   :  { %v606_v36 = vpop.xlane.xlu0 %605 }
 0x45f   :  { %v622_v57 = vmul.f32 0.00390625, %v606_v36  ;;  %v647_v58 = vmul.f32 %v4353_v55, %v4353_v55  ;;  %v648_v61 = vmul.f32 %v4355_v56, %v4355_v56 }
 0x461   :  { %v4361_v62 = vsub.f32 %v570_v12, %v622_v57  ;;  %v4363_v63 = vsub.f32 %v572_v14, %v622_v57  ;;  %v665_v1 = vadd.f32 %v648_v61, %v647_v58 }
 0x462   :  { %v609_v19 = vpop.xlane.xlu1 %608 }
 0x463   :  { %v623_v20 = vmul.f32 0.00390625, %v609_v19  ;;  %666 = vadd.xlane.f32.xlu1 %v665_v1  ;;  %v649_v22 = vmul.f32 %v4361_v62, %v4361_v62  ;;  %v650_v23 = vmul.f32 %v4363_v63, %v4363_v63 }
 0x464   :  { %v612_v3 = vpop.xlane.xlu0 %611 }
 0x465   :  { %v4369_v39 = vsub.f32 %v576_v16, %v623_v20  ;;  %v4371_v6 = vsub.f32 %v578_v52, %v623_v20  ;;  %v624_v40 = vmul.f32 0.00390625, %v612_v3  ;;  %v668_v7 = vadd.f32 %v650_v23, %v649_v22 }
 0x467   :  { %v4373_v10 = vsub.f32 %v580_v53, %v624_v40  ;;  %v4375_v45 = vsub.f32 %v582_v18, %v624_v40  ;;  %669 = vadd.xlane.f32.xlu0 %v668_v7  ;;  %v651_v46 = vmul.f32 %v4369_v39, %v4369_v39  ;;  %v652_v11 = vmul.f32 %v4371_v6, %v4371_v6 }
 0x469   :  { %v671_v12 = vadd.f32 %v652_v11, %v651_v46  ;;  %v653_v13 = vmul.f32 %v4373_v10, %v4373_v10  ;;  %v654_v14 = vmul.f32 %v4375_v45, %v4375_v45 }
 0x46a   :  { %v615_v15 = vpop.xlane.xlu1 %614 }
 0x46b   :  { %v625_v16 = vmul.f32 0.00390625, %v615_v15  ;;  %672 = vadd.xlane.f32.xlu1 %v671_v12  ;;  %v674_v52 = vadd.f32 %v654_v14, %v653_v13 }
 0x46c   :  { %v618_v53 = vpop.xlane.xlu0 %617 }
 0x46d   :  { %v4385_v17 = vsub.f32 %v586_v24, %v625_v16  ;;  %v4387_v18 = vsub.f32 %v588_v25, %v625_v16  ;;  %v626_v21 = vmul.f32 0.00390625, %v618_v53  ;;  %675 = vadd.xlane.f32.xlu0 %v674_v52 }
 0x46f   :  { %v4389_v60 = vsub.f32 %v590_v59, %v626_v21  ;;  %v4391_v28 = vsub.f32 %v592_v27, %v626_v21  ;;  %v655_v37 = vmul.f32 %v4385_v17, %v4385_v17  ;;  %v656_v38 = vmul.f32 %v4387_v18, %v4387_v18 }
 0x470   :  { %v4104_v59 = vmov 2  }
 0x471   :  { %v677_v4 = vadd.f32 %v656_v38, %v655_v37  ;;  %v657_v42 = vmul.f32 %v4389_v60, %v4389_v60  ;;  %v658_v24 = vmul.f32 %v4391_v28, %v4391_v28  ;;  %3811 = vset.pattern.permute.xlu0 %v4104_v59 }
 0x473   :  { %678 = vadd.xlane.f32.xlu1 %v677_v4  ;;  %v680_v25 = vadd.f32 %v658_v24, %v657_v42 }
 0x475   :  { %681 = vadd.xlane.f32.xlu0 %v680_v25 }
 0x484   :  { %772 = vperm.xlu1 %3809, %v4254_v30  }
 0x488   :  { %776 = vperm.xlu1 %3809, %v4260_v31  }
 0x48c   :  { %780 = vperm.xlu1 %3809, %v4266_v32  }
 0x490   :  { %784 = vperm.xlu1 %3809, %v4272_v33  }
 0x494   :  { %3810 = vset.pattern.permute.xlu1 %v4104_v59 }
 0x4e8   :  { %v661_v27 = vpop.xlane.xlu1 %660 }
 0x4e9   :  { %v683_v48 = vmul.f32 0.00390625, %v661_v27 }
 0x4ea   :  { %v664_v44 = vpop.xlane.xlu0 %663 }
 0x4eb   :  { %v691_v8 = vadd.f32 1e-05, %v683_v48  ;;  %v684_v9 = vmul.f32 0.00390625, %v664_v44 }
 0x4ed   :  { %3883 = vrsqrt.f32 %v691_v8  ;;  %v692_v49 = vadd.f32 1e-05, %v684_v9 }
 0x4ef   :  { %3885 = vrsqrt.f32 %v692_v49 }
 0x4f0   :  { %v667_v50 = vpop.xlane.xlu1 %666 }
 0x4f1   :  { %v685_v51 = vmul.f32 0.00390625, %v667_v50 }
 0x4f3   :  { %v693_v54 = vadd.f32 1e-05, %v685_v51 }
 0x4f4   :  { %v670_v36 = vpop.xlane.xlu0 %669 }
 0x4f5   :  { %3887 = vrsqrt.f32 %v693_v54  ;;  %v686_v57 = vmul.f32 0.00390625, %v670_v36 }
 0x4f7   :  { %v3884_v58 = vpop.eup %3883  ;;  %v694_v61 = vadd.f32 1e-05, %v686_v57 }
 0x4f8   :  { %v673_v1 = vpop.xlane.xlu1 %672  ;;  %v707_v19 = vmul.f32 %v3884_v58, %v4254_v30 }
 0x4f9   :  { %v3886_v20 = vpop.eup %3885  ;;  %3889 = vrsqrt.f32 %v694_v61  ;;  %v687_v22 = vmul.f32 0.00390625, %v673_v1 }
 0x4fa   :  { %717 = vperm.xlu1 %3810, %v707_v19   ;;  %v676_v23 = vpop.xlane.xlu0 %675  ;;  %v708_v3 = vmul.f32 %v3886_v20, %v4260_v31 }
 0x4fb   :  { %v695_v40 = vadd.f32 1e-05, %v687_v22  ;;  %v688_v7 = vmul.f32 0.00390625, %v676_v23 }
 0x4fc   :  { %722 = vperm.xlu0 %3811, %v708_v3  }
 0x4fd   :  { %3891 = vrsqrt.f32 %v695_v40  ;;  %v696_v46 = vadd.f32 1e-05, %v688_v7 }
 0x4fe   :  { %3813 = vset.pattern.permute.xlu1 %v4103_v29 }
 0x4ff   :  { %v3888_v11 = vpop.eup %3887  ;;  %792 = vperm.xlu1 %3813, %v4287_v2   ;;  %3893 = vrsqrt.f32 %v696_v46 }
 0x500   :  { %v679_v12 = vpop.xlane.xlu1 %678  ;;  %3812 = vset.pattern.permute.xlu0 %v4103_v29  ;;  %v709_v31 = vmul.f32 %v3888_v11, %v4266_v32 }
 0x501   :  { %v689_v30 = vmul.f32 0.00390625, %v679_v12  ;;  %788 = vperm.xlu0 %3812, %v4278_v34  }
 0x502   :  { %v682_v13 = vpop.xlane.xlu0 %681 }
 0x503   :  { %v3890_v14 = vpop.eup %3889  ;;  %v697_v15 = vadd.f32 1e-05, %v689_v30  ;;  %v690_v16 = vmul.f32 0.00390625, %v682_v13  ;;  %3814 = vset.pattern.permute.xlu1 %v4104_v59 }
 0x504   :  { %727 = vperm.xlu1 %3814, %v709_v31   ;;  %v710_v53 = vmul.f32 %v3890_v14, %v4272_v33  ;;  %v773_v33 = vpop.permute.xlu1 %772 }
 0x505   :  { %3895 = vrsqrt.f32 %v697_v15  ;;  %v698_v52 = vadd.f32 1e-05, %v690_v16  ;;  %3815 = vset.pattern.permute.xlu0 %v4104_v59 }
 0x507   :  { %v3892_v21 = vpop.eup %3891  ;;  %3897 = vrsqrt.f32 %v698_v52 }
 0x508   :  { %732 = vperm.xlu1 %3814, %v710_v53   ;;  %v711_v37 = vmul.f32 %v3892_v21, %v4278_v34  ;;  %v777_v34 = vpop.permute.xlu1 %776 }
 0x509   :  { %v3894_v38 = vpop.eup %3893 }
 0x50a   :  { %v712_v4 = vmul.f32 %v3894_v38, %v4287_v2 }
 0x50c   :  { %737 = vperm.xlu1 %3814, %v711_v37   ;;  %v781_v59 = vpop.permute.xlu1 %780 }
 0x50f   :  { %v3896_v32 = vpop.eup %3895 }
 0x510   :  { %742 = vperm.xlu1 %3814, %v712_v4   ;;  %v713_v24 = vmul.f32 %v3896_v32, %v4299_v26  ;;  %v785_v27 = vpop.permute.xlu1 %784 }
 0x511   :  { %v3898_v42 = vpop.eup %3897 }
 0x512   :  { %v714_v25 = vmul.f32 %v3898_v42, %v4307_v35 }
 0x514   :  { %747 = vperm.xlu1 %3814, %v713_v24   ;;  %752 = vperm.xlu0 %3815, %v714_v25  }
 0x518   :  { %3816 = vset.pattern.permute.xlu1 %v4103_v29 }
 0x519   :  { %796 = vperm.xlu1 %3816, %v4299_v26  }
 0x51d   :  { %800 = vperm.xlu1 %3816, %v4307_v35  }
 0x579   :  { %v718_v2 = vpop.permute.xlu1 %717 }
 0x57a   :  { %v755_v48 = vmul.f32 %v718_v2, %v4337_v41  ;;  %v756_v44 = vmul.f32 %v718_v2, %v4339_v5 }
 0x57b   :  { %v723_v8 = vpop.permute.xlu0 %722 }
 0x57c   :  { %v803_v9 = vadd.f32 %v773_v33, %v755_v48  ;;  %v804_v49 = vadd.f32 %v773_v33, %v756_v44  ;;  %v757_v50 = vmul.f32 %v723_v8, %v4341_v43  ;;  %v758_v29 = vmul.f32 %v723_v8, %v4343_v47 }
 0x57e   :  { %v805_v51 = vadd.f32 %v777_v34, %v757_v50  ;;  %v806_v26 = vadd.f32 %v777_v34, %v758_v29  ;;  %v793_v54 = vpop.permute.xlu1 %792  ;;  %v819_v35 = vmax.f32 %v803_v9, 0.0  ;;  %v820_v57 = vmax.f32 %v804_v49, 0.0 }
 0x580   :  { %v821_v36 = vmax.f32 %v805_v51, 0.0  ;;  %v822_v58 = vmax.f32 %v806_v26, 0.0  ;;  %v789_v13 = vpop.permute.xlu0 %788 }
 0x582   :  { %v836_v61 = vpack.c.bf16 %v822_v58, %v820_v57  ;;  %v835_v1 = vpack.c.bf16 %v821_v36, %v819_v35 }
 0x583   :  { %v728_v19 = vpop.permute.xlu1 %727 }
 0x584   :  { %v759_v41 = vmul.f32 %v728_v19, %v4353_v55  ;;  %v760_v5 = vmul.f32 %v728_v19, %v4355_v56  ;;  %883 = vmatprep.subr.bf16.mxu0 %v836_v61 }
 0x585   :  { %884 = vmatpush1.bf16.msra.mxu0 %v835_v1 }
 0x586   :  { %v807_v20 = vadd.f32 %v781_v59, %v759_v41  ;;  %v808_v22 = vadd.f32 %v781_v59, %v760_v5 }
 0x587   :  { %v733_v43 = vpop.permute.xlu1 %732 }
 0x588   :  { %v761_v47 = vmul.f32 %v733_v43, %v4361_v62  ;;  %v762_v23 = vmul.f32 %v733_v43, %v4363_v63  ;;  %v823_v7 = vmax.f32 %v807_v20, 0.0  ;;  %v824_v30 = vmax.f32 %v808_v22, 0.0 }
 0x58a   :  { %v809_v3 = vadd.f32 %v785_v27, %v761_v47  ;;  %v810_v40 = vadd.f32 %v785_v27, %v762_v23 }
 0x58b   :  { %v738_v46 = vpop.permute.xlu1 %737 }
 0x58c   :  { %v825_v11 = vmax.f32 %v809_v3, 0.0  ;;  %v763_v12 = vmul.f32 %v738_v46, %v4369_v39  ;;  %v826_v55 = vmax.f32 %v810_v40, 0.0  ;;  %v764_v56 = vmul.f32 %v738_v46, %v4371_v6 }
 0x58e   :  { %v838_v31 = vpack.c.bf16 %v826_v55, %v824_v30  ;;  %v837_v14 = vpack.c.bf16 %v825_v11, %v823_v7  ;;  %v811_v16 = vadd.f32 %v789_v13, %v763_v12  ;;  %v812_v52 = vadd.f32 %v789_v13, %v764_v56 }
 0x58f   :  { %v743_v15 = vpop.permute.xlu1 %742  ;;  %v4105_v56 = vmov 5  }
 0x590   :  { %v765_v62 = vmul.f32 %v743_v15, %v4373_v10  ;;  %v766_v63 = vmul.f32 %v743_v15, %v4375_v45  ;;  %885 = vmatprep.subr.bf16.mxu0 %v838_v31  ;;  %v827_v39 = vmax.f32 %v811_v16, 0.0  ;;  %v828_v4 = vmax.f32 %v812_v52, 0.0  ;;  %3817 = vset.pattern.permute.xlu1 %v4105_v56 }
 0x591   :  { %886 = vmatpush1.bf16.msra.mxu0 %v837_v14 }
 0x592   :  { %v813_v53 = vadd.f32 %v793_v54, %v765_v62  ;;  %v814_v21 = vadd.f32 %v793_v54, %v766_v63 }
 0x593   :  { %v748_v37 = vpop.permute.xlu1 %747  ;;  %v753_v24 = vpop.permute.xlu0 %752 }
 0x594   :  { %v829_v38 = vmax.f32 %v813_v53, 0.0  ;;  %v830_v32 = vmax.f32 %v814_v21, 0.0  ;;  %v767_v33 = vmul.f32 %v748_v37, %v4385_v17  ;;  %v768_v10 = vmul.f32 %v748_v37, %v4387_v18  ;;  %v3847_v17 = vld [vmem:[#allocation5 + $0x40] sm:$0xff]   ;;  %v3848_v18 = vld [vmem:[#allocation5 + $0x48] sm:$0xff]  }
 0x595   :  { %v769_v45 = vmul.f32 %v753_v24, %v4389_v60  ;;  %v770_v34 = vmul.f32 %v753_v24, %v4391_v28  ;;  %v3849_v60 = vld [vmem:[#allocation5 + $0x50] sm:$0xff]   ;;  %v3850_v28 = vld [vmem:[#allocation5 + $0x58] sm:$0xff]  }
 0x596   :  { %v839_v6 = vpack.c.bf16 %v829_v38, %v827_v39  ;;  %v840_v42 = vpack.c.bf16 %v830_v32, %v828_v4 }
 0x598   :  { %v797_v25 = vpop.permute.xlu1 %796  ;;  %887 = vmatprep.subr.bf16.mxu0 %v840_v42 }
 0x599   :  { %888 = vmatpush1.bf16.msra.mxu0 %v839_v6  ;;  %v815_v59 = vadd.f32 %v797_v25, %v767_v33  ;;  %v816_v27 = vadd.f32 %v797_v25, %v768_v10 }
 0x59b   :  { %v831_v8 = vmax.f32 %v815_v59, 0.0  ;;  %v832_v9 = vmax.f32 %v816_v27, 0.0 }
 0x59c   :  { %v801_v2 = vpop.permute.xlu1 %800 }
 0x59d   :  { %v817_v48 = vadd.f32 %v801_v2, %v769_v45  ;;  %v818_v44 = vadd.f32 %v801_v2, %v770_v34 }
 0x59f   :  { %v833_v49 = vmax.f32 %v817_v48, 0.0  ;;  %v834_v50 = vmax.f32 %v818_v44, 0.0 }
 0x5a1   :  { %v841_v29 = vpack.c.bf16 %v833_v49, %v831_v8  ;;  %v842_v51 = vpack.c.bf16 %v834_v50, %v832_v9 }
 0x5a3   :  { %889 = vmatprep.subr.bf16.mxu0 %v842_v51 }
 0x5a4   :  { %890 = vmatpush1.bf16.msra.mxu0 %v841_v29 }
 0x5a7   :  { %3558 = vmatmul.mubr.msk.bf16.vlgmr.msra.gmra.mrb[16].mxu0 %vm509_vm3, %v3847_v17 }
 0x5a8   :  { %925 = vmatprep.mubr.bf16.mxu0 %v5514_v0 }
 0x5af   :  { %3559 = vmatmul.mubr.msk.bf16.gmra.mrb[20].mxu0 %vm509_vm3, %v3848_v18 }
 0x5b0   :  { %935 = vmatprep.mubr.bf16.mxu0 %v5514_v0 }
 0x5b7   :  { %3560 = vmatmul.mubr.msk.bf16.gmra.mrb[24].mxu0 %vm509_vm3, %v3849_v60 }
 0x5b8   :  { %945 = vmatprep.mubr.bf16.mxu0 %v5514_v0 }
 0x5bf   :  { %3561 = vmatmul.mubr.msk.bf16.gmra.mrb[28].mxu0 %vm509_vm3, %v3850_v28 }
 0x5c0   :  { %2021 = vmatprep.mubr.bf16.mxu0 %v5514_v0 }
 0x67a   :  { %v917_v26 = vpop.f32.mrb[16].mxu0 }
 0x67b   :  { %v919_v54 = vpop.f32.mrb[17].mxu0 }
 0x67c   :  { %v921_v35 = vpop.f32.mrb[18].mxu0  ;;  %v956_v36 = vadd.f32 %v919_v54, %v917_v26 }
 0x67d   :  { %v923_v57 = vpop.f32.mrb[19].mxu0 }
 0x67e   :  { %957 = vadd.xlane.f32.xlu0 %v956_v36  ;;  %v959_v58 = vadd.f32 %v923_v57, %v921_v35 }
 0x680   :  { %960 = vadd.xlane.f32.xlu1 %v959_v58 }
 0x682   :  { %v927_v61 = vpop.f32.mrb[20].mxu0 }
 0x683   :  { %v929_v1 = vpop.f32.mrb[21].mxu0 }
 0x684   :  { %v931_v19 = vpop.f32.mrb[22].mxu0  ;;  %v962_v41 = vadd.f32 %v929_v1, %v927_v61 }
 0x685   :  { %v933_v5 = vpop.f32.mrb[23].mxu0 }
 0x686   :  { %963 = vadd.xlane.f32.xlu0 %v962_v41  ;;  %v965_v20 = vadd.f32 %v933_v5, %v931_v19 }
 0x68a   :  { %966 = vadd.xlane.f32.xlu0 %v965_v20  ;;  %v937_v43 = vpop.f32.mrb[24].mxu0 }
 0x68b   :  { %v939_v22 = vpop.f32.mrb[25].mxu0 }
 0x68c   :  { %v941_v47 = vpop.f32.mrb[26].mxu0  ;;  %v968_v23 = vadd.f32 %v939_v22, %v937_v43 }
 0x68d   :  { %v943_v3 = vpop.f32.mrb[27].mxu0 }
 0x68e   :  { %969 = vadd.xlane.f32.xlu0 %v968_v23  ;;  %v971_v40 = vadd.f32 %v943_v3, %v941_v47 }
 0x690   :  { %972 = vadd.xlane.f32.xlu1 %v971_v40 }
 0x692   :  { %v947_v7 = vpop.f32.mrb[28].mxu0 }
 0x693   :  { %v949_v46 = vpop.f32.mrb[29].mxu0 }
 0x694   :  { %v951_v11 = vpop.f32.mrb[30].mxu0  ;;  %v974_v12 = vadd.f32 %v949_v46, %v947_v7 }
 0x695   :  { %v953_v30 = vpop.f32.mrb[31].mxu0 }
 0x696   :  { %975 = vadd.xlane.f32.xlu0 %v974_v12  ;;  %v977_v55 = vadd.f32 %v953_v30, %v951_v11  ;;  %v3981_v12 = vld [vmem:[%s5509_s2 + $0x10] sm:$0xff] }
 0x698   :  { %978 = vadd.xlane.f32.xlu1 %v977_v55  ;;  %v3983_v55 = vld [vmem:[%s5509_s2 + $0x20] sm:$0xff] }
 0x70b   :  { %v958_v13 = vpop.xlane.xlu0 %957 }
 0x70c   :  { %v980_v31 = vmul.f32 0.00390625, %v958_v13 }
 0x70d   :  { %v961_v14 = vpop.xlane.xlu1 %960 }
 0x70e   :  { %v4445_v15 = vsub.f32 %v917_v26, %v980_v31  ;;  %v4447_v16 = vsub.f32 %v919_v54, %v980_v31  ;;  %v981_v62 = vmul.f32 0.00390625, %v961_v14 }
 0x710   :  { %v4449_v63 = vsub.f32 %v921_v35, %v981_v62  ;;  %v4451_v52 = vsub.f32 %v923_v57, %v981_v62  ;;  %v1004_v53 = vmul.f32 %v4445_v15, %v4445_v15  ;;  %v1005_v21 = vmul.f32 %v4447_v16, %v4447_v16 }
 0x712   :  { %v1020_v37 = vadd.f32 %v1005_v21, %v1004_v53  ;;  %v1006_v39 = vmul.f32 %v4449_v63, %v4449_v63  ;;  %v1007_v38 = vmul.f32 %v4451_v52, %v4451_v52 }
 0x713   :  { %v964_v4 = vpop.xlane.xlu0 %963 }
 0x714   :  { %v982_v32 = vmul.f32 0.00390625, %v964_v4  ;;  %1021 = vadd.xlane.f32.xlu0 %v1020_v37  ;;  %v1023_v6 = vadd.f32 %v1007_v38, %v1006_v39 }
 0x716   :  { %v4461_v42 = vsub.f32 %v927_v61, %v982_v32  ;;  %v4463_v24 = vsub.f32 %v929_v1, %v982_v32  ;;  %1024 = vadd.xlane.f32.xlu1 %v1023_v6 }
 0x717   :  { %v967_v25 = vpop.xlane.xlu0 %966 }
 0x718   :  { %v983_v33 = vmul.f32 0.00390625, %v967_v25  ;;  %v1008_v10 = vmul.f32 %v4461_v42, %v4461_v42  ;;  %v1009_v45 = vmul.f32 %v4463_v24, %v4463_v24 }
 0x71a   :  { %v4469_v34 = vsub.f32 %v931_v19, %v983_v33  ;;  %v4471_v59 = vsub.f32 %v933_v5, %v983_v33  ;;  %v1026_v27 = vadd.f32 %v1009_v45, %v1008_v10 }
 0x71b   :  { %v970_v2 = vpop.xlane.xlu0 %969 }
 0x71c   :  { %v984_v48 = vmul.f32 0.00390625, %v970_v2  ;;  %1027 = vadd.xlane.f32.xlu0 %v1026_v27  ;;  %v1010_v44 = vmul.f32 %v4469_v34, %v4469_v34  ;;  %v1011_v8 = vmul.f32 %v4471_v59, %v4471_v59 }
 0x71d   :  { %v973_v9 = vpop.xlane.xlu1 %972 }
 0x71e   :  { %v4477_v49 = vsub.f32 %v937_v43, %v984_v48  ;;  %v4479_v50 = vsub.f32 %v939_v22, %v984_v48  ;;  %v985_v29 = vmul.f32 0.00390625, %v973_v9  ;;  %v1029_v51 = vadd.f32 %v1011_v8, %v1010_v44 }
 0x720   :  { %v4481_v17 = vsub.f32 %v941_v47, %v985_v29  ;;  %v4483_v18 = vsub.f32 %v943_v3, %v985_v29  ;;  %1030 = vadd.xlane.f32.xlu1 %v1029_v51  ;;  %v1012_v60 = vmul.f32 %v4477_v49, %v4477_v49  ;;  %v1013_v28 = vmul.f32 %v4479_v50, %v4479_v50  ;;  %v3984_v51 = vld [vmem:[%s5509_s2 + $0x28] sm:$0xff] }
 0x722   :  { %v1032_v26 = vadd.f32 %v1013_v28, %v1012_v60  ;;  %v1014_v54 = vmul.f32 %v4481_v17, %v4481_v17  ;;  %v1015_v35 = vmul.f32 %v4483_v18, %v4483_v18 }
 0x723   :  { %v976_v36 = vpop.xlane.xlu0 %975 }
 0x724   :  { %v986_v57 = vmul.f32 0.00390625, %v976_v36  ;;  %1033 = vadd.xlane.f32.xlu0 %v1032_v26  ;;  %v1035_v58 = vadd.f32 %v1015_v35, %v1014_v54 }
 0x725   :  { %v979_v61 = vpop.xlane.xlu1 %978 }
 0x726   :  { %v4493_v1 = vsub.f32 %v947_v7, %v986_v57  ;;  %v4495_v19 = vsub.f32 %v949_v46, %v986_v57  ;;  %v987_v41 = vmul.f32 0.00390625, %v979_v61  ;;  %1036 = vadd.xlane.f32.xlu1 %v1035_v58  ;;  %v4106_v7 = vmov 4   ;;  %v3979_v46 = vld [vmem:[%s5509_s2] sm:$0xff] }
 0x727   :  { %3818 = vset.pattern.permute.xlu0 %v4106_v7 }
 0x728   :  { %v4497_v5 = vsub.f32 %v951_v11, %v987_v41  ;;  %v4499_v20 = vsub.f32 %v953_v30, %v987_v41  ;;  %v1016_v43 = vmul.f32 %v4493_v1, %v4493_v1  ;;  %v1017_v22 = vmul.f32 %v4495_v19, %v4495_v19  ;;  %v3980_v11 = vld [vmem:[%s5509_s2 + $0x8] sm:$0xff]  ;;  %v3982_v30 = vld [vmem:[%s5509_s2 + $0x18] sm:$0xff] }
 0x72a   :  { %v1038_v47 = vadd.f32 %v1017_v22, %v1016_v43  ;;  %v1018_v23 = vmul.f32 %v4497_v5, %v4497_v5  ;;  %v1019_v3 = vmul.f32 %v4499_v20, %v4499_v20 }
 0x72c   :  { %1039 = vadd.xlane.f32.xlu0 %v1038_v47  ;;  %v1041_v40 = vadd.f32 %v1019_v3, %v1018_v23  ;;  %v3985_v3 = vld [vmem:[%s5509_s2 + $0x30] sm:$0xff] }
 0x72e   :  { %1042 = vadd.xlane.f32.xlu1 %v1041_v40 }
 0x73f   :  { %1133 = vperm.xlu1 %3817, %v3979_v46  }
 0x743   :  { %1137 = vperm.xlu1 %3817, %v3980_v11  }
 0x747   :  { %1141 = vperm.xlu1 %3817, %v3981_v12  }
 0x74b   :  { %1145 = vperm.xlu1 %3817, %v3982_v30  }
 0x74f   :  { %1149 = vperm.xlu1 %3817, %v3983_v55  }
 0x753   :  { %3820 = vset.pattern.permute.xlu1 %v4106_v7 }
 0x7a1   :  { %v1022_v13 = vpop.xlane.xlu0 %1021 }
 0x7a2   :  { %v1044_v31 = vmul.f32 0.00390625, %v1022_v13 }
 0x7a3   :  { %v1025_v14 = vpop.xlane.xlu1 %1024 }
 0x7a4   :  { %v1052_v62 = vadd.f32 1e-05, %v1044_v31  ;;  %v1045_v53 = vmul.f32 0.00390625, %v1025_v14 }
 0x7a6   :  { %3899 = vrsqrt.f32 %v1052_v62  ;;  %v1053_v21 = vadd.f32 1e-05, %v1045_v53 }
 0x7a8   :  { %3901 = vrsqrt.f32 %v1053_v21 }
 0x7a9   :  { %v1028_v37 = vpop.xlane.xlu0 %1027 }
 0x7aa   :  { %v1046_v39 = vmul.f32 0.00390625, %v1028_v37 }
 0x7ac   :  { %v1054_v38 = vadd.f32 1e-05, %v1046_v39 }
 0x7ad   :  { %v1031_v4 = vpop.xlane.xlu1 %1030 }
 0x7ae   :  { %3903 = vrsqrt.f32 %v1054_v38  ;;  %v1047_v32 = vmul.f32 0.00390625, %v1031_v4 }
 0x7b0   :  { %v3900_v6 = vpop.eup %3899  ;;  %v1055_v25 = vadd.f32 1e-05, %v1047_v32 }
 0x7b1   :  { %v1034_v33 = vpop.xlane.xlu0 %1033  ;;  %v1068_v10 = vmul.f32 %v3979_v46, %v3900_v6  ;;  %v3986_v46 = vld [vmem:[%s5509_s2 + $0x38] sm:$0xff] }
 0x7b2   :  { %v3902_v45 = vpop.eup %3901  ;;  %3905 = vrsqrt.f32 %v1055_v25  ;;  %v1048_v27 = vmul.f32 0.00390625, %v1034_v33 }
 0x7b3   :  { %1078 = vperm.xlu0 %3818, %v1068_v10   ;;  %v1037_v2 = vpop.xlane.xlu1 %1036  ;;  %v1069_v48 = vmul.f32 %v3980_v11, %v3902_v45 }
 0x7b4   :  { %v1056_v44 = vadd.f32 1e-05, %v1048_v27  ;;  %v1049_v8 = vmul.f32 0.00390625, %v1037_v2 }
 0x7b5   :  { %1083 = vperm.xlu1 %3820, %v1069_v48  }
 0x7b6   :  { %3907 = vrsqrt.f32 %v1056_v44  ;;  %v1057_v9 = vadd.f32 1e-05, %v1049_v8 }
 0x7b7   :  { %3819 = vset.pattern.permute.xlu0 %v4105_v56 }
 0x7b8   :  { %v3904_v29 = vpop.eup %3903  ;;  %3909 = vrsqrt.f32 %v1057_v9  ;;  %1153 = vperm.xlu0 %3819, %v3984_v51  }
 0x7b9   :  { %v1040_v60 = vpop.xlane.xlu0 %1039  ;;  %v1070_v28 = vmul.f32 %v3981_v12, %v3904_v29 }
 0x7ba   :  { %v1050_v26 = vmul.f32 0.00390625, %v1040_v60 }
 0x7bb   :  { %1088 = vperm.xlu1 %3820, %v1070_v28   ;;  %v1043_v54 = vpop.xlane.xlu1 %1042 }
 0x7bc   :  { %v3906_v35 = vpop.eup %3905  ;;  %v1058_v36 = vadd.f32 1e-05, %v1050_v26  ;;  %v1051_v57 = vmul.f32 0.00390625, %v1043_v54  ;;  %3821 = vset.pattern.permute.xlu0 %v4106_v7 }
 0x7bd   :  { %v1071_v58 = vmul.f32 %v3982_v30, %v3906_v35 }
 0x7be   :  { %3911 = vrsqrt.f32 %v1058_v36  ;;  %v1059_v61 = vadd.f32 1e-05, %v1051_v57 }
 0x7bf   :  { %1093 = vperm.xlu1 %3820, %v1071_v58   ;;  %v1134_v12 = vpop.permute.xlu1 %1133 }
 0x7c0   :  { %v3908_v41 = vpop.eup %3907  ;;  %3913 = vrsqrt.f32 %v1059_v61 }
 0x7c1   :  { %v1072_v43 = vmul.f32 %v3983_v55, %v3908_v41 }
 0x7c2   :  { %v3910_v22 = vpop.eup %3909 }
 0x7c3   :  { %1098 = vperm.xlu1 %3820, %v1072_v43   ;;  %v1073_v47 = vmul.f32 %v3984_v51, %v3910_v22  ;;  %v1138_v30 = vpop.permute.xlu1 %1137 }
 0x7c5   :  { %1103 = vperm.xlu0 %3821, %v1073_v47  }
 0x7c7   :  { %v1142_v55 = vpop.permute.xlu1 %1141 }
 0x7c8   :  { %v3912_v23 = vpop.eup %3911 }
 0x7c9   :  { %v1074_v40 = vmul.f32 %v3985_v3, %v3912_v23  ;;  %3822 = vset.pattern.permute.xlu0 %v4105_v56 }
 0x7ca   :  { %v3914_v7 = vpop.eup %3913  ;;  %1157 = vperm.xlu0 %3822, %v3985_v3  }
 0x7cb   :  { %1108 = vperm.xlu1 %3820, %v1074_v40   ;;  %v1075_v11 = vmul.f32 %v3986_v46, %v3914_v7  ;;  %v1146_v13 = vpop.permute.xlu1 %1145 }
 0x7cf   :  { %1113 = vperm.xlu1 %3820, %v1075_v11   ;;  %v1150_v31 = vpop.permute.xlu1 %1149 }
 0x7d3   :  { %3823 = vset.pattern.permute.xlu1 %v4105_v56 }
 0x7d4   :  { %1161 = vperm.xlu1 %3823, %v3986_v46  }
 0x832   :  { %v1079_v14 = vpop.permute.xlu0 %1078 }
 0x833   :  { %v1116_v62 = vmul.f32 %v1079_v14, %v4445_v15  ;;  %v1117_v53 = vmul.f32 %v1079_v14, %v4447_v16 }
 0x834   :  { %v1084_v21 = vpop.permute.xlu1 %1083 }
 0x835   :  { %v1164_v37 = vadd.f32 %v1134_v12, %v1116_v62  ;;  %v1165_v39 = vadd.f32 %v1134_v12, %v1117_v53  ;;  %v1118_v38 = vmul.f32 %v1084_v21, %v4449_v63  ;;  %v1119_v4 = vmul.f32 %v1084_v21, %v4451_v52 }
 0x837   :  { %v1166_v32 = vadd.f32 %v1138_v30, %v1118_v38  ;;  %v1167_v56 = vadd.f32 %v1138_v30, %v1119_v4  ;;  %v1180_v6 = vmax.f32 %v1164_v37, 0.0  ;;  %v1181_v33 = vmax.f32 %v1165_v39, 0.0  ;;  %v1154_v44 = vpop.permute.xlu0 %1153  ;;  %v3852_v4 = vld [vmem:[#allocation5 + $0x68] sm:$0xff]  }
 0x839   :  { %v1182_v25 = vmax.f32 %v1166_v32, 0.0  ;;  %v1183_v10 = vmax.f32 %v1167_v56, 0.0  ;;  %v3855_v32 = vld [vmem:[#allocation5 + $0x80] sm:$0xff]   ;;  %v3856_v56 = vld [vmem:[#allocation5 + $0x88] sm:$0xff]  }
 0x83a   :  { %v1089_v45 = vpop.permute.xlu1 %1088 }
 0x83b   :  { %v1197_v27 = vpack.c.bf16 %v1183_v10, %v1181_v33  ;;  %v1196_v2 = vpack.c.bf16 %v1182_v25, %v1180_v6  ;;  %v1120_v15 = vmul.f32 %v1089_v45, %v4461_v42  ;;  %v1121_v16 = vmul.f32 %v1089_v45, %v4463_v24  ;;  %v3857_v6 = vld [vmem:[#allocation5 + $0x90] sm:$0xff]   ;;  %v3858_v25 = vld [vmem:[#allocation5 + $0x98] sm:$0xff]  }
 0x83d   :  { %1284 = vmatprep.subr.bf16.mxu1 %v1197_v27  ;;  %v1168_v8 = vadd.f32 %v1142_v55, %v1120_v15  ;;  %v1169_v9 = vadd.f32 %v1142_v55, %v1121_v16 }
 0x83e   :  { %1285 = vmatpush1.bf16.msra.mxu1 %v1196_v2  ;;  %v1094_v48 = vpop.permute.xlu1 %1093 }
 0x83f   :  { %v1122_v63 = vmul.f32 %v1094_v48, %v4469_v34  ;;  %v1123_v52 = vmul.f32 %v1094_v48, %v4471_v59  ;;  %v1184_v24 = vmax.f32 %v1168_v8, 0.0  ;;  %v1185_v36 = vmax.f32 %v1169_v9, 0.0 }
 0x841   :  { %v1170_v29 = vadd.f32 %v1146_v13, %v1122_v63  ;;  %v1171_v51 = vadd.f32 %v1146_v13, %v1123_v52 }
 0x842   :  { %v1099_v60 = vpop.permute.xlu1 %1098 }
 0x843   :  { %v1186_v28 = vmax.f32 %v1170_v29, 0.0  ;;  %v1124_v26 = vmul.f32 %v1099_v60, %v4477_v49  ;;  %v1125_v42 = vmul.f32 %v1099_v60, %v4479_v50  ;;  %v1187_v54 = vmax.f32 %v1171_v51, 0.0 }
 0x844   :  { %v1104_v35 = vpop.permute.xlu0 %1103 }
 0x845   :  { %v1172_v57 = vadd.f32 %v1150_v31, %v1124_v26  ;;  %v1173_v58 = vadd.f32 %v1150_v31, %v1125_v42  ;;  %v1126_v34 = vmul.f32 %v1104_v35, %v4481_v17  ;;  %v1127_v59 = vmul.f32 %v1104_v35, %v4483_v18 }
 0x846   :  { %v1199_v61 = vpack.c.bf16 %v1187_v54, %v1185_v36  ;;  %v1198_v41 = vpack.c.bf16 %v1186_v28, %v1184_v24 }
 0x847   :  { %v1174_v43 = vadd.f32 %v1154_v44, %v1126_v34  ;;  %v1175_v22 = vadd.f32 %v1154_v44, %v1127_v59  ;;  %v1188_v47 = vmax.f32 %v1172_v57, 0.0  ;;  %v1189_v49 = vmax.f32 %v1173_v58, 0.0 }
 0x848   :  { %1286 = vmatprep.subr.bf16.mxu1 %v1199_v61 }
 0x849   :  { %v1190_v23 = vmax.f32 %v1174_v43, 0.0  ;;  %1287 = vmatpush1.bf16.msra.mxu1 %v1198_v41  ;;  %v1191_v50 = vmax.f32 %v1175_v22, 0.0  ;;  %v1158_v11 = vpop.permute.xlu0 %1157 }
 0x84a   :  { %v1109_v3 = vpop.permute.xlu1 %1108 }
 0x84b   :  { %v1201_v40 = vpack.c.bf16 %v1191_v50, %v1189_v49  ;;  %v1200_v7 = vpack.c.bf16 %v1190_v23, %v1188_v47  ;;  %v1128_v46 = vmul.f32 %v1109_v3, %v4493_v1  ;;  %v1129_v17 = vmul.f32 %v1109_v3, %v4495_v19  ;;  %v3851_v19 = vld [vmem:[#allocation5 + $0x60] sm:$0xff]  }
 0x84d   :  { %1288 = vmatprep.subr.bf16.mxu1 %v1201_v40  ;;  %v1176_v12 = vadd.f32 %v1158_v11, %v1128_v46  ;;  %v1177_v30 = vadd.f32 %v1158_v11, %v1129_v17 }
 0x84e   :  { %1289 = vmatpush1.bf16.msra.mxu1 %v1200_v7  ;;  %v1114_v18 = vpop.permute.xlu1 %1113 }
 0x84f   :  { %v1130_v55 = vmul.f32 %v1114_v18, %v4497_v5  ;;  %v1131_v13 = vmul.f32 %v1114_v18, %v4499_v20  ;;  %v1192_v53 = vmax.f32 %v1176_v12, 0.0  ;;  %v1193_v21 = vmax.f32 %v1177_v30, 0.0  ;;  %v3853_v5 = vld [vmem:[#allocation5 + $0x70] sm:$0xff]   ;;  %v3854_v20 = vld [vmem:[#allocation5 + $0x78] sm:$0xff]  }
 0x853   :  { %v1162_v31 = vpop.permute.xlu1 %1161 }
 0x854   :  { %v1178_v14 = vadd.f32 %v1162_v31, %v1130_v55  ;;  %v1179_v62 = vadd.f32 %v1162_v31, %v1131_v13 }
 0x856   :  { %v1194_v37 = vmax.f32 %v1178_v14, 0.0  ;;  %v1195_v39 = vmax.f32 %v1179_v62, 0.0  ;;  %v4107_v62 = vmov 7  }
 0x857   :  { %3824 = vset.pattern.permute.xlu1 %v4107_v62  ;;  %3825 = vset.pattern.permute.xlu0 %v4107_v62 }
 0x858   :  { %v1202_v38 = vpack.c.bf16 %v1194_v37, %v1192_v53  ;;  %v1203_v1 = vpack.c.bf16 %v1195_v39, %v1193_v21 }
 0x85a   :  { %1290 = vmatprep.subr.bf16.mxu1 %v1203_v1 }
 0x85b   :  { %1291 = vmatpush1.bf16.msra.mxu1 %v1202_v38 }
 0x85e   :  { %3570 = vmatmul.mubr.msk.bf16.vlgmr.msra.gmra.mrb[16].mxu1 %vm509_vm3, %v3851_v19 }
 0x85f   :  { %1326 = vmatprep.mubr.bf16.mxu1 %v5514_v0 }
 0x866   :  { %3571 = vmatmul.mubr.msk.bf16.gmra.mrb[20].mxu1 %vm509_vm3, %v3852_v4 }
 0x867   :  { %1336 = vmatprep.mubr.bf16.mxu1 %v5514_v0 }
 0x86e   :  { %3572 = vmatmul.mubr.msk.bf16.gmra.mrb[24].mxu1 %vm509_vm3, %v3853_v5 }
 0x86f   :  { %1346 = vmatprep.mubr.bf16.mxu1 %v5514_v0 }
 0x876   :  { %3573 = vmatmul.mubr.msk.bf16.gmra.mrb[28].mxu1 %vm509_vm3, %v3854_v20 }
 0x877   :  { %1356 = vmatprep.mubr.bf16.mxu1 %v5514_v0 }
 0x87e   :  { %3574 = vmatmul.mubr.msk.bf16.gmra.mrb[32].mxu1 %vm509_vm3, %v3855_v32 }
 0x87f   :  { %1366 = vmatprep.mubr.bf16.mxu1 %v5514_v0 }
 0x886   :  { %3575 = vmatmul.mubr.msk.bf16.gmra.mrb[36].mxu1 %vm509_vm3, %v3856_v56 }
 0x887   :  { %1376 = vmatprep.mubr.bf16.mxu1 %v5514_v0 }
 0x88e   :  { %3576 = vmatmul.mubr.msk.bf16.gmra.mrb[40].mxu1 %vm509_vm3, %v3857_v6 }
 0x88f   :  { %1386 = vmatprep.mubr.bf16.mxu1 %v5514_v0 }
 0x896   :  { %3577 = vmatmul.mubr.msk.bf16.gmra.mrb[44].mxu1 %vm509_vm3, %v3858_v25 }
 0x931   :  { %v4567_v33 = vpop.f32.mrb[16].mxu1 }
 0x932   :  { %v4569_v10 = vpop.f32.mrb[17].mxu1 }
 0x933   :  { %v4571_v45 = vpop.f32.mrb[18].mxu1  ;;  %v1413_v27 = vadd.f32 %v4569_v10, %v4567_v33 }
 0x934   :  { %v4575_v2 = vpop.f32.mrb[19].mxu1 }
 0x935   :  { %v1416_v15 = vadd.f32 %v4575_v2, %v4571_v45  ;;  %1414 = vadd.xlane.f32.xlu0 %v1413_v27 }
 0x937   :  { %1417 = vadd.xlane.f32.xlu1 %v1416_v15 }
 0x939   :  { %v4579_v16 = vpop.f32.mrb[20].mxu1 }
 0x93a   :  { %v4581_v48 = vpop.f32.mrb[21].mxu1 }
 0x93b   :  { %v4583_v44 = vpop.f32.mrb[22].mxu1  ;;  %v1419_v63 = vadd.f32 %v4581_v48, %v4579_v16 }
 0x93c   :  { %v4587_v52 = vpop.f32.mrb[23].mxu1 }
 0x93d   :  { %1420 = vadd.xlane.f32.xlu0 %v1419_v63  ;;  %v1422_v8 = vadd.f32 %v4587_v52, %v4583_v44 }
 0x941   :  { %1423 = vadd.xlane.f32.xlu0 %v1422_v8  ;;  %v4591_v9 = vpop.f32.mrb[24].mxu1 }
 0x942   :  { %v4593_v29 = vpop.f32.mrb[25].mxu1 }
 0x943   :  { %v1425_v51 = vadd.f32 %v4593_v29, %v4591_v9  ;;  %v4597_v60 = vpop.f32.mrb[26].mxu1 }
 0x944   :  { %v4599_v28 = vpop.f32.mrb[27].mxu1 }
 0x945   :  { %1426 = vadd.xlane.f32.xlu1 %v1425_v51  ;;  %v1428_v26 = vadd.f32 %v4599_v28, %v4597_v60 }
 0x947   :  { %1429 = vadd.xlane.f32.xlu0 %v1428_v26 }
 0x949   :  { %v4603_v42 = vpop.f32.mrb[28].mxu1 }
 0x94a   :  { %v4605_v54 = vpop.f32.mrb[29].mxu1 }
 0x94b   :  { %v1431_v24 = vadd.f32 %v4605_v54, %v4603_v42  ;;  %v4609_v35 = vpop.f32.mrb[30].mxu1 }
 0x94c   :  { %v4611_v36 = vpop.f32.mrb[31].mxu1 }
 0x94d   :  { %1432 = vadd.xlane.f32.xlu1 %v1431_v24  ;;  %v1434_v57 = vadd.f32 %v4611_v36, %v4609_v35 }
 0x94f   :  { %1435 = vadd.xlane.f32.xlu0 %v1434_v57 }
 0x951   :  { %v4615_v58 = vpop.f32.mrb[32].mxu1 }
 0x952   :  { %v4617_v34 = vpop.f32.mrb[33].mxu1 }
 0x953   :  { %v1437_v59 = vadd.f32 %v4617_v34, %v4615_v58  ;;  %v4621_v61 = vpop.f32.mrb[34].mxu1 }
 0x954   :  { %v4623_v41 = vpop.f32.mrb[35].mxu1 }
 0x955   :  { %1438 = vadd.xlane.f32.xlu1 %v1437_v59  ;;  %v1440_v43 = vadd.f32 %v4623_v41, %v4621_v61 }
 0x957   :  { %1441 = vadd.xlane.f32.xlu0 %v1440_v43 }
 0x959   :  { %v4627_v22 = vpop.f32.mrb[36].mxu1 }
 0x95a   :  { %v4629_v47 = vpop.f32.mrb[37].mxu1 }
 0x95b   :  { %v1443_v23 = vadd.f32 %v4629_v47, %v4627_v22  ;;  %v4633_v49 = vpop.f32.mrb[38].mxu1 }
 0x95c   :  { %v4635_v50 = vpop.f32.mrb[39].mxu1 }
 0x95d   :  { %1444 = vadd.xlane.f32.xlu1 %v1443_v23  ;;  %v1446_v3 = vadd.f32 %v4635_v50, %v4633_v49 }
 0x95f   :  { %1447 = vadd.xlane.f32.xlu0 %v1446_v3 }
 0x961   :  { %v4639_v40 = vpop.f32.mrb[40].mxu1 }
 0x962   :  { %v4641_v7 = vpop.f32.mrb[41].mxu1 }
 0x963   :  { %v1449_v46 = vadd.f32 %v4641_v7, %v4639_v40  ;;  %v4645_v17 = vpop.f32.mrb[42].mxu1 }
 0x964   :  { %v4647_v18 = vpop.f32.mrb[43].mxu1 }
 0x965   :  { %1450 = vadd.xlane.f32.xlu1 %v1449_v46  ;;  %v1452_v11 = vadd.f32 %v4647_v18, %v4645_v17 }
 0x967   :  { %1453 = vadd.xlane.f32.xlu0 %v1452_v11 }
 0x969   :  { %v4651_v12 = vpop.f32.mrb[44].mxu1 }
 0x96a   :  { %v4653_v30 = vpop.f32.mrb[45].mxu1 }
 0x96b   :  { %v1455_v55 = vadd.f32 %v4653_v30, %v4651_v12  ;;  %v4657_v13 = vpop.f32.mrb[46].mxu1 }
 0x96c   :  { %v4659_v31 = vpop.f32.mrb[47].mxu1 }
 0x96d   :  { %v1458_v14 = vadd.f32 %v4659_v31, %v4657_v13  ;;  %1456 = vadd.xlane.f32.xlu1 %v1455_v55 }
 0x96f   :  { %1459 = vadd.xlane.f32.xlu0 %v1458_v14 }
 0x9c2   :  { %v1415_v53 = vpop.xlane.xlu0 %1414 }
 0x9c3   :  { %v1461_v21 = vmul.f32 0.00390625, %v1415_v53 }
 0x9c4   :  { %v1418_v37 = vpop.xlane.xlu1 %1417 }
 0x9c5   :  { %v4666_v39 = vsub.f32 %v4567_v33, %v1461_v21  ;;  %v4669_v38 = vsub.f32 %v4569_v10, %v1461_v21  ;;  %v1462_v1 = vmul.f32 0.00390625, %v1418_v37 }
 0x9c7   :  { %v1509_v19 = vmul.f32 %v4666_v39, %v4666_v39  ;;  %v1510_v4 = vmul.f32 %v4669_v38, %v4669_v38  ;;  %v4676_v5 = vsub.f32 %v4571_v45, %v1462_v1  ;;  %v4679_v20 = vsub.f32 %v4575_v2, %v1462_v1 }
 0x9c9   :  { %v1541_v32 = vadd.f32 %v1510_v4, %v1509_v19  ;;  %v1511_v56 = vmul.f32 %v4676_v5, %v4676_v5  ;;  %v1512_v6 = vmul.f32 %v4679_v20, %v4679_v20 }
 0x9ca   :  { %v1421_v25 = vpop.xlane.xlu0 %1420 }
 0x9cb   :  { %v1463_v33 = vmul.f32 0.00390625, %v1421_v25  ;;  %1542 = vadd.xlane.f32.xlu1 %v1541_v32  ;;  %v1544_v10 = vadd.f32 %v1512_v6, %v1511_v56 }
 0x9cd   :  { %v4686_v27 = vsub.f32 %v4579_v16, %v1463_v33  ;;  %v4689_v45 = vsub.f32 %v4581_v48, %v1463_v33  ;;  %1545 = vadd.xlane.f32.xlu0 %v1544_v10 }
 0x9ce   :  { %v1424_v2 = vpop.xlane.xlu0 %1423 }
 0x9cf   :  { %v1513_v15 = vmul.f32 %v4686_v27, %v4686_v27  ;;  %v1514_v63 = vmul.f32 %v4689_v45, %v4689_v45  ;;  %v1464_v8 = vmul.f32 0.00390625, %v1424_v2 }
 0x9d1   :  { %v4696_v51 = vsub.f32 %v4583_v44, %v1464_v8  ;;  %v4699_v26 = vsub.f32 %v4587_v52, %v1464_v8  ;;  %v1547_v16 = vadd.f32 %v1514_v63, %v1513_v15 }
 0x9d2   :  { %v1427_v24 = vpop.xlane.xlu1 %1426 }
 0x9d3   :  { %v1465_v57 = vmul.f32 0.00390625, %v1427_v24  ;;  %1548 = vadd.xlane.f32.xlu1 %v1547_v16  ;;  %v1515_v48 = vmul.f32 %v4696_v51, %v4696_v51  ;;  %v1516_v59 = vmul.f32 %v4699_v26, %v4699_v26 }
 0x9d4   :  { %v1430_v43 = vpop.xlane.xlu0 %1429 }
 0x9d5   :  { %v4706_v23 = vsub.f32 %v4591_v9, %v1465_v57  ;;  %v4709_v44 = vsub.f32 %v4593_v29, %v1465_v57  ;;  %v1466_v3 = vmul.f32 0.00390625, %v1430_v43  ;;  %v1550_v52 = vadd.f32 %v1516_v59, %v1515_v48 }
 0x9d7   :  { %v1517_v46 = vmul.f32 %v4706_v23, %v4706_v23  ;;  %v1518_v11 = vmul.f32 %v4709_v44, %v4709_v44  ;;  %v4716_v55 = vsub.f32 %v4597_v60, %v1466_v3  ;;  %v4719_v14 = vsub.f32 %v4599_v28, %v1466_v3  ;;  %1551 = vadd.xlane.f32.xlu0 %v1550_v52 }
 0x9d9   :  { %v1553_v9 = vadd.f32 %v1518_v11, %v1517_v46  ;;  %v1519_v29 = vmul.f32 %v4716_v55, %v4716_v55  ;;  %v1520_v53 = vmul.f32 %v4719_v14, %v4719_v14 }
 0x9da   :  { %v1433_v21 = vpop.xlane.xlu1 %1432 }
 0x9db   :  { %v1467_v37 = vmul.f32 0.00390625, %v1433_v21  ;;  %1554 = vadd.xlane.f32.xlu1 %v1553_v9  ;;  %v1556_v1 = vadd.f32 %v1520_v53, %v1519_v29 }
 0x9dc   :  { %v1436_v19 = vpop.xlane.xlu0 %1435 }
 0x9dd   :  { %v4726_v4 = vsub.f32 %v4603_v42, %v1467_v37  ;;  %v4729_v60 = vsub.f32 %v4605_v54, %v1467_v37  ;;  %v1468_v28 = vmul.f32 0.00390625, %v1436_v19  ;;  %1557 = vadd.xlane.f32.xlu0 %v1556_v1 }
 0x9df   :  { %v1521_v32 = vmul.f32 %v4726_v4, %v4726_v4  ;;  %v1522_v56 = vmul.f32 %v4729_v60, %v4729_v60  ;;  %v4736_v6 = vsub.f32 %v4609_v35, %v1468_v28  ;;  %v4739_v25 = vsub.f32 %v4611_v36, %v1468_v28 }
 0x9e1   :  { %v1523_v42 = vmul.f32 %v4736_v6, %v4736_v6  ;;  %v1524_v54 = vmul.f32 %v4739_v25, %v4739_v25  ;;  %v1559_v33 = vadd.f32 %v1522_v56, %v1521_v32 }
 0x9e2   :  { %v1439_v10 = vpop.xlane.xlu1 %1438 }
 0x9e3   :  { %v1469_v2 = vmul.f32 0.00390625, %v1439_v10  ;;  %1560 = vadd.xlane.f32.xlu1 %v1559_v33  ;;  %v1562_v15 = vadd.f32 %v1524_v54, %v1523_v42 }
 0x9e4   :  { %v1442_v63 = vpop.xlane.xlu0 %1441 }
 0x9e5   :  { %v4746_v8 = vsub.f32 %v4615_v58, %v1469_v2  ;;  %v4749_v35 = vsub.f32 %v4617_v34, %v1469_v2  ;;  %v1470_v36 = vmul.f32 0.00390625, %v1442_v63  ;;  %1563 = vadd.xlane.f32.xlu0 %v1562_v15 }
 0x9e7   :  { %v1525_v16 = vmul.f32 %v4746_v8, %v4746_v8  ;;  %v1526_v24 = vmul.f32 %v4749_v35, %v4749_v35  ;;  %v4756_v57 = vsub.f32 %v4621_v61, %v1470_v36  ;;  %v4759_v48 = vsub.f32 %v4623_v41, %v1470_v36 }
 0x9e9   :  { %v1527_v58 = vmul.f32 %v4756_v57, %v4756_v57  ;;  %v1528_v34 = vmul.f32 %v4759_v48, %v4759_v48  ;;  %v1565_v59 = vadd.f32 %v1526_v24, %v1525_v16 }
 0x9ea   :  { %v1445_v43 = vpop.xlane.xlu1 %1444 }
 0x9eb   :  { %v1471_v3 = vmul.f32 0.00390625, %v1445_v43  ;;  %1566 = vadd.xlane.f32.xlu1 %v1565_v59  ;;  %v1568_v52 = vadd.f32 %v1528_v34, %v1527_v58 }
 0x9ec   :  { %v1448_v46 = vpop.xlane.xlu0 %1447 }
 0x9ed   :  { %v4766_v11 = vsub.f32 %v4627_v22, %v1471_v3  ;;  %v4769_v61 = vsub.f32 %v4629_v47, %v1471_v3  ;;  %v1472_v41 = vmul.f32 0.00390625, %v1448_v46  ;;  %1569 = vadd.xlane.f32.xlu0 %v1568_v52  ;;  %v1397_v46 = vld [vmem:[%s5509_s2] sm:$0xff] }
 0x9ef   :  { %v1529_v9 = vmul.f32 %v4766_v11, %v4766_v11  ;;  %v1530_v29 = vmul.f32 %v4769_v61, %v4769_v61  ;;  %v4776_v53 = vsub.f32 %v4633_v49, %v1472_v41  ;;  %v4779_v21 = vsub.f32 %v4635_v50, %v1472_v41  ;;  %v1399_v41 = vld [vmem:[%s5509_s2 + $0x10] sm:$0xff] }
 0x9f1   :  { %v1531_v22 = vmul.f32 %v4776_v53, %v4776_v53  ;;  %v1532_v47 = vmul.f32 %v4779_v21, %v4779_v21  ;;  %v1571_v37 = vadd.f32 %v1530_v29, %v1529_v9  ;;  %v4843_v9 = vld [vmem:[%s5509_s2 + $0x40] sm:$0xff]  ;;  %v4848_v29 = vld [vmem:[%s5509_s2 + $0x18] sm:$0xff] }
 0x9f2   :  { %v1451_v1 = vpop.xlane.xlu1 %1450 }
 0x9f3   :  { %v1473_v19 = vmul.f32 0.00390625, %v1451_v1  ;;  %1572 = vadd.xlane.f32.xlu1 %v1571_v37  ;;  %v1574_v28 = vadd.f32 %v1532_v47, %v1531_v22  ;;  %v4855_v22 = vld [vmem:[%s5509_s2 + $0x28] sm:$0xff]  ;;  %v4108_v47 = vmov 6   ;;  %v4861_v37 = vld [vmem:[%s5509_s2 + $0x30] sm:$0xff]  ;;  %v4867_v1 = vld [vmem:[%s5509_s2 + $0x38] sm:$0xff] }
 0x9f4   :  { %v1454_v32 = vpop.xlane.xlu0 %1453 }
 0x9f5   :  { %v4786_v56 = vsub.f32 %v4639_v40, %v1473_v19  ;;  %v4789_v49 = vsub.f32 %v4641_v7, %v1473_v19  ;;  %v1474_v50 = vmul.f32 0.00390625, %v1454_v32  ;;  %1575 = vadd.xlane.f32.xlu0 %v1574_v28  ;;  %v4873_v19 = vld [vmem:[%s5509_s2 + $0x48] sm:$0xff]  ;;  %v4879_v28 = vld [vmem:[%s5509_s2 + $0x50] sm:$0xff]  ;;  %v4885_v32 = vld [vmem:[%s5509_s2 + $0x58] sm:$0xff] }
 0x9f6   :  { %5521 = vst [vmem:[#allocation19_spill] sm:$0xff] %v4885_v32 }
 0x9f7   :  { %v1533_v42 = vmul.f32 %v4786_v56, %v4786_v56  ;;  %v1534_v54 = vmul.f32 %v4789_v49, %v4789_v49  ;;  %v4796_v33 = vsub.f32 %v4645_v17, %v1474_v50  ;;  %v4799_v10 = vsub.f32 %v4647_v18, %v1474_v50 }
 0x9f9   :  { %v1535_v40 = vmul.f32 %v4796_v33, %v4796_v33  ;;  %v1536_v7 = vmul.f32 %v4799_v10, %v4799_v10  ;;  %v1577_v2 = vadd.f32 %v1534_v54, %v1533_v42 }
 0x9fa   :  { %v1457_v15 = vpop.xlane.xlu1 %1456 }
 0x9fb   :  { %v1475_v63 = vmul.f32 0.00390625, %v1457_v15  ;;  %1578 = vadd.xlane.f32.xlu1 %v1577_v2  ;;  %v1580_v36 = vadd.f32 %v1536_v7, %v1535_v40 }
 0x9fc   :  { %v1460_v16 = vpop.xlane.xlu0 %1459 }
 0x9fd   :  { %v4806_v24 = vsub.f32 %v4651_v12, %v1475_v63  ;;  %v4809_v17 = vsub.f32 %v4653_v30, %v1475_v63  ;;  %v1476_v18 = vmul.f32 0.00390625, %v1460_v16  ;;  %1581 = vadd.xlane.f32.xlu0 %v1580_v36 }
 0x9ff   :  { %v1537_v58 = vmul.f32 %v4806_v24, %v4806_v24  ;;  %v1538_v34 = vmul.f32 %v4809_v17, %v4809_v17  ;;  %v4816_v59 = vsub.f32 %v4657_v13, %v1476_v18  ;;  %v4819_v43 = vsub.f32 %v4659_v31, %v1476_v18  ;;  %v1398_v13 = vld [vmem:[%s5509_s2 + $0x8] sm:$0xff]  ;;  %v4834_v31 = vld [vmem:[%s5509_s2 + $0x20] sm:$0xff] }
 0xa01   :  { %v1539_v12 = vmul.f32 %v4816_v59, %v4816_v59  ;;  %v1540_v30 = vmul.f32 %v4819_v43, %v4819_v43  ;;  %v1583_v3 = vadd.f32 %v1538_v34, %v1537_v58 }
 0xa03   :  { %1584 = vadd.xlane.f32.xlu1 %v1583_v3  ;;  %v1586_v52 = vadd.f32 %v1540_v30, %v1539_v12 }
 0xa05   :  { %1587 = vadd.xlane.f32.xlu0 %v1586_v52 }
 0xa14   :  { %1767 = vperm.xlu1 %3824, %v1397_v46  }
 0xa18   :  { %1772 = vperm.xlu1 %3824, %v1398_v13  }
 0xa1b   :  { %1787 = vperm.xlu0 %3825, %v4834_v31  }
 0xa1c   :  { %1777 = vperm.xlu1 %3824, %v1399_v41  }
 0xa1f   :  { %1807 = vperm.xlu0 %3825, %v4843_v9  }
 0xa20   :  { %1782 = vperm.xlu1 %3824, %v4848_v29  }
 0xa23   :  { %3827 = vset.pattern.permute.xlu0 %v4108_v47 }
 0xa24   :  { %1792 = vperm.xlu1 %3824, %v4855_v22  }
 0xa28   :  { %1797 = vperm.xlu1 %3824, %v4861_v37  }
 0xa2c   :  { %1802 = vperm.xlu1 %3824, %v4867_v1  }
 0xa30   :  { %1812 = vperm.xlu1 %3824, %v4873_v19  }
 0xa34   :  { %1817 = vperm.xlu1 %3824, %v4879_v28  }
 0xa38   :  { %1822 = vperm.xlu1 %3824, %v4885_v32  }
 0xa3c   :  { %3826 = vset.pattern.permute.xlu1 %v4108_v47 }
 0xa58   :  { %v1543_v50 = vpop.xlane.xlu1 %1542 }
 0xa59   :  { %v1589_v42 = vmul.f32 0.00390625, %v1543_v50 }
 0xa5a   :  { %v1546_v54 = vpop.xlane.xlu0 %1545 }
 0xa5b   :  { %v1605_v40 = vadd.f32 1e-05, %v1589_v42  ;;  %v1590_v7 = vmul.f32 0.00390625, %v1546_v54 }
 0xa5d   :  { %3915 = vrsqrt.f32 %v1605_v40  ;;  %v1606_v2 = vadd.f32 1e-05, %v1590_v7  ;;  %v4891_v7 = vld [vmem:[%s5509_s2 + $0x68] sm:$0xff] }
 0xa5e   :  { %5522 = vst [vmem:[#allocation20_spill] sm:$0xff] %v4891_v7 }
 0xa5f   :  { %3917 = vrsqrt.f32 %v1606_v2 }
 0xa60   :  { %v1549_v15 = vpop.xlane.xlu1 %1548 }
 0xa61   :  { %v1591_v63 = vmul.f32 0.00390625, %v1549_v15 }
 0xa63   :  { %v1607_v36 = vadd.f32 1e-05, %v1591_v63 }
 0xa64   :  { %v1552_v16 = vpop.xlane.xlu0 %1551 }
 0xa65   :  { %3919 = vrsqrt.f32 %v1607_v36  ;;  %v1592_v18 = vmul.f32 0.00390625, %v1552_v16 }
 0xa67   :  { %v3916_v58 = vpop.eup %3915  ;;  %v1608_v34 = vadd.f32 1e-05, %v1592_v18 }
 0xa68   :  { %v1555_v12 = vpop.xlane.xlu1 %1554  ;;  %v1637_v30 = vmul.f32 %v3916_v58, %v1397_v46  ;;  %v4897_v46 = vld [vmem:[%s5509_s2 + $0x60] sm:$0xff] }
 0xa69   :  { %v3918_v3 = vpop.eup %3917  ;;  %3921 = vrsqrt.f32 %v1608_v34  ;;  %v1593_v52 = vmul.f32 0.00390625, %v1555_v12  ;;  %5523 = vst [vmem:[#allocation21_spill] sm:$0xff] %v4897_v46 }
 0xa6a   :  { %1655 = vperm.xlu1 %3826, %v1637_v30   ;;  %v1558_v50 = vpop.xlane.xlu0 %1557  ;;  %v1638_v42 = vmul.f32 %v3918_v3, %v1398_v13 }
 0xa6b   :  { %v1609_v54 = vadd.f32 1e-05, %v1593_v52  ;;  %v1594_v40 = vmul.f32 0.00390625, %v1558_v50 }
 0xa6c   :  { %1660 = vperm.xlu0 %3827, %v1638_v42  }
 0xa6d   :  { %3923 = vrsqrt.f32 %v1609_v54  ;;  %v1610_v2 = vadd.f32 1e-05, %v1594_v40 }
 0xa6e   :  { %3829 = vset.pattern.permute.xlu1 %v4107_v62 }
 0xa6f   :  { %v3920_v15 = vpop.eup %3919  ;;  %1832 = vperm.xlu1 %3829, %v4891_v7   ;;  %3925 = vrsqrt.f32 %v1610_v2 }
 0xa70   :  { %v1561_v13 = vpop.xlane.xlu1 %1560  ;;  %3828 = vset.pattern.permute.xlu0 %v4107_v62  ;;  %v1639_v16 = vmul.f32 %v3920_v15, %v1399_v41 }
 0xa71   :  { %v1595_v63 = vmul.f32 0.00390625, %v1561_v13  ;;  %1827 = vperm.xlu0 %3828, %v4897_v46  }
 0xa72   :  { %v1564_v36 = vpop.xlane.xlu0 %1563 }
 0xa73   :  { %v3922_v18 = vpop.eup %3921  ;;  %v1611_v58 = vadd.f32 1e-05, %v1595_v63  ;;  %v1596_v34 = vmul.f32 0.00390625, %v1564_v36  ;;  %3830 = vset.pattern.permute.xlu1 %v4108_v47 }
 0xa74   :  { %1665 = vperm.xlu1 %3830, %v1639_v16   ;;  %v1640_v30 = vmul.f32 %v3922_v18, %v4848_v29 }
 0xa75   :  { %3927 = vrsqrt.f32 %v1611_v58  ;;  %v1612_v12 = vadd.f32 1e-05, %v1596_v34  ;;  %3831 = vset.pattern.permute.xlu0 %v4108_v47 }
 0xa77   :  { %v3924_v3 = vpop.eup %3923  ;;  %3929 = vrsqrt.f32 %v1612_v12 }
 0xa78   :  { %v1567_v52 = vpop.xlane.xlu1 %1566  ;;  %1670 = vperm.xlu1 %3830, %v1640_v30   ;;  %v1641_v54 = vmul.f32 %v3924_v3, %v4834_v31 }
 0xa79   :  { %v1597_v50 = vmul.f32 0.00390625, %v1567_v52  ;;  %v3926_v40 = vpop.eup %3925 }
 0xa7a   :  { %v1570_v42 = vpop.xlane.xlu0 %1569  ;;  %v1642_v13 = vmul.f32 %v3926_v40, %v4855_v22 }
 0xa7b   :  { %v1613_v41 = vadd.f32 1e-05, %v1597_v50  ;;  %v1598_v2 = vmul.f32 0.00390625, %v1570_v42 }
 0xa7c   :  { %1675 = vperm.xlu1 %3830, %v1641_v54  }
 0xa7d   :  { %3931 = vrsqrt.f32 %v1613_v41  ;;  %v1614_v15 = vadd.f32 1e-05, %v1598_v2 }
 0xa7f   :  { %v3928_v63 = vpop.eup %3927  ;;  %3933 = vrsqrt.f32 %v1614_v15 }
 0xa80   :  { %v1573_v47 = vpop.xlane.xlu1 %1572  ;;  %1680 = vperm.xlu1 %3830, %v1642_v13   ;;  %v1643_v18 = vmul.f32 %v3928_v63, %v4861_v37 }
 0xa81   :  { %v3930_v29 = vpop.eup %3929  ;;  %v1599_v36 = vmul.f32 0.00390625, %v1573_v47 }
 0xa82   :  { %v1576_v16 = vpop.xlane.xlu0 %1575  ;;  %v1644_v58 = vmul.f32 %v3930_v29, %v4867_v1 }
 0xa83   :  { %v1615_v31 = vadd.f32 1e-05, %v1599_v36  ;;  %v1600_v34 = vmul.f32 0.00390625, %v1576_v16 }
 0xa84   :  { %1685 = vperm.xlu1 %3830, %v1643_v18   ;;  %1690 = vperm.xlu0 %3831, %v1644_v58  }
 0xa85   :  { %3935 = vrsqrt.f32 %v1615_v31  ;;  %v1616_v12 = vadd.f32 1e-05, %v1600_v34 }
 0xa87   :  { %v3932_v30 = vpop.eup %3931  ;;  %3937 = vrsqrt.f32 %v1616_v12 }
 0xa88   :  { %v1579_v22 = vpop.xlane.xlu1 %1578  ;;  %v1645_v3 = vmul.f32 %v3932_v30, %v4843_v9  ;;  %v4916_v30 = vld [vmem:[%s5509_s2 + $0x70] sm:$0xff] }
 0xa89   :  { %v3934_v52 = vpop.eup %3933  ;;  %v1601_v50 = vmul.f32 0.00390625, %v1579_v22  ;;  %5524 = vst [vmem:[#allocation22_spill] sm:$0xff] %v4916_v30 }
 0xa8a   :  { %1695 = vperm.xlu0 %3831, %v1645_v3   ;;  %v1582_v42 = vpop.xlane.xlu0 %1581  ;;  %v1646_v54 = vmul.f32 %v3934_v52, %v4873_v19  ;;  %v1412_v3 = vld [vmem:[%s5509_s2 + $0x78] sm:$0xff] }
 0xa8b   :  { %v1617_v37 = vadd.f32 1e-05, %v1601_v50  ;;  %v1602_v40 = vmul.f32 0.00390625, %v1582_v42 }
 0xa8c   :  { %1700 = vperm.xlu1 %3830, %v1646_v54  }
 0xa8d   :  { %3939 = vrsqrt.f32 %v1617_v37  ;;  %v1618_v41 = vadd.f32 1e-05, %v1602_v40 }
 0xa8f   :  { %v3936_v2 = vpop.eup %3935  ;;  %3941 = vrsqrt.f32 %v1618_v41 }
 0xa90   :  { %v1585_v15 = vpop.xlane.xlu1 %1584  ;;  %v1647_v13 = vmul.f32 %v3936_v2, %v4879_v28 }
 0xa91   :  { %v3938_v63 = vpop.eup %3937  ;;  %v1603_v47 = vmul.f32 0.00390625, %v1585_v15 }
 0xa92   :  { %1705 = vperm.xlu1 %3830, %v1647_v13   ;;  %v1588_v9 = vpop.xlane.xlu0 %1587  ;;  %v1648_v29 = vmul.f32 %v3938_v63, %v4885_v32 }
 0xa93   :  { %v1619_v36 = vadd.f32 1e-05, %v1603_v47  ;;  %v1604_v16 = vmul.f32 0.00390625, %v1588_v9 }
 0xa94   :  { %1710 = vperm.xlu0 %3831, %v1648_v29   ;;  %v1768_v54 = vpop.permute.xlu1 %1767 }
 0xa95   :  { %3943 = vrsqrt.f32 %v1619_v36  ;;  %v1620_v18 = vadd.f32 1e-05, %v1604_v16 }
 0xa97   :  { %v3940_v58 = vpop.eup %3939  ;;  %3945 = vrsqrt.f32 %v1620_v18 }
 0xa98   :  { %v1649_v31 = vmul.f32 %v3940_v58, %v4897_v46  ;;  %v1773_v37 = vpop.permute.xlu1 %1772 }
 0xa99   :  { %v3942_v34 = vpop.eup %3941 }
 0xa9a   :  { %1715 = vperm.xlu0 %3831, %v1649_v31   ;;  %v1650_v12 = vmul.f32 %v3942_v34, %v4891_v7  ;;  %v1788_v9 = vpop.permute.xlu0 %1787 }
 0xa9c   :  { %1720 = vperm.xlu1 %3830, %v1650_v12   ;;  %v1778_v40 = vpop.permute.xlu1 %1777 }
 0xa9f   :  { %v3944_v22 = vpop.eup %3943 }
 0xaa0   :  { %v1651_v52 = vmul.f32 %v3944_v22, %v4916_v30  ;;  %v1783_v41 = vpop.permute.xlu1 %1782 }
 0xaa1   :  { %v3946_v50 = vpop.eup %3945 }
 0xaa2   :  { %1725 = vperm.xlu1 %3830, %v1651_v52   ;;  %v1652_v42 = vmul.f32 %v3946_v50, %v1412_v3 }
 0xaa4   :  { %1730 = vperm.xlu0 %3831, %v1652_v42   ;;  %v1793_v2 = vpop.permute.xlu1 %1792 }
 0xaa6   :  { %3832 = vset.pattern.permute.xlu1 %v4107_v62  ;;  %v4934_v62 = vpop.permute.xlu0 %1807 }
 0xaa7   :  { %1837 = vperm.xlu1 %3832, %v4916_v30  }
 0xaa8   :  { %v4924_v15 = vpop.permute.xlu1 %1797 }
 0xaab   :  { %1842 = vperm.xlu1 %3832, %v1412_v3  }
 0xaac   :  { %v4926_v13 = vpop.permute.xlu1 %1802 }
 0xab0   :  { %v4928_v63 = vpop.permute.xlu1 %1812 }
 0xab4   :  { %v4930_v47 = vpop.permute.xlu1 %1817 }
 0xab8   :  { %v4932_v29 = vpop.permute.xlu1 %1822 }
 0xae9   :  { %v1656_v36 = vpop.permute.xlu1 %1655 }
 0xaea   :  { %v1733_v16 = vmul.f32 %v1656_v36, %v4666_v39  ;;  %v1734_v18 = vmul.f32 %v1656_v36, %v4669_v38 }
 0xaeb   :  { %v1661_v58 = vpop.permute.xlu0 %1660 }
 0xaec   :  { %v1845_v31 = vadd.f32 %v1768_v54, %v1733_v16  ;;  %v1846_v34 = vadd.f32 %v1768_v54, %v1734_v18  ;;  %v1735_v12 = vmul.f32 %v1661_v58, %v4676_v5  ;;  %v1736_v22 = vmul.f32 %v1661_v58, %v4679_v20 }
 0xaee   :  { %v1847_v3 = vadd.f32 %v1773_v37, %v1735_v12  ;;  %v1848_v52 = vadd.f32 %v1773_v37, %v1736_v22  ;;  %v4940_v50 = vpop.permute.xlu1 %1832  ;;  %v1877_v42 = vmax.f32 %v1845_v31, 0.0  ;;  %v1878_v7 = vmax.f32 %v1846_v34, 0.0 }
 0xaf0   :  { %v1879_v0 = vmax.f32 %v1847_v3, 0.0  ;;  %v1880_v30 = vmax.f32 %v1848_v52, 0.0 }
 0xaf2   :  { %v1909_v46 = vpack.c.bf16 %v1879_v0, %v1877_v42  ;;  %v1910_v32 = vpack.c.bf16 %v1880_v30, %v1878_v7 }
 0xaf3   :  { %v1666_v39 = vpop.permute.xlu1 %1665 }
 0xaf4   :  { %v1737_v38 = vmul.f32 %v1666_v39, %v4686_v27  ;;  %v1738_v36 = vmul.f32 %v1666_v39, %v4689_v45  ;;  %1989 = vmatprep.subr.bf16.mxu0 %v1910_v32  ;;  %v4948_v32 = vpop.permute.xlu0 %1827 }
 0xaf5   :  { %1990 = vmatpush1.bf16.msra.mxu0 %v1909_v46 }
 0xaf6   :  { %v1849_v5 = vadd.f32 %v1778_v40, %v1737_v38  ;;  %v1850_v54 = vadd.f32 %v1778_v40, %v1738_v36 }
 0xaf7   :  { %v1671_v20 = vpop.permute.xlu1 %1670 }
 0xaf8   :  { %v1739_v37 = vmul.f32 %v1671_v20, %v4696_v51  ;;  %v1740_v16 = vmul.f32 %v1671_v20, %v4699_v26  ;;  %v1881_v31 = vmax.f32 %v1849_v5, 0.0  ;;  %v1882_v34 = vmax.f32 %v1850_v54, 0.0 }
 0xafa   :  { %v1851_v18 = vadd.f32 %v1783_v41, %v1739_v37  ;;  %v1852_v58 = vadd.f32 %v1783_v41, %v1740_v16 }
 0xafb   :  { %v1676_v0 = vpop.permute.xlu1 %1675 }
 0xafc   :  { %v1883_v7 = vmax.f32 %v1851_v18, 0.0  ;;  %v1884_v30 = vmax.f32 %v1852_v58, 0.0  ;;  %v1741_v27 = vmul.f32 %v1676_v0, %v4706_v23  ;;  %v1742_v45 = vmul.f32 %v1676_v0, %v4709_v44 }
 0xafe   :  { %v1911_v46 = vpack.c.bf16 %v1883_v7, %v1881_v31  ;;  %v1912_v40 = vpack.c.bf16 %v1884_v30, %v1882_v34  ;;  %v1853_v12 = vadd.f32 %v1788_v9, %v1741_v27  ;;  %v1854_v22 = vadd.f32 %v1788_v9, %v1742_v45 }
 0xaff   :  { %v1681_v51 = vpop.permute.xlu1 %1680 }
 0xb00   :  { %v1743_v26 = vmul.f32 %v1681_v51, %v4716_v55  ;;  %v1744_v41 = vmul.f32 %v1681_v51, %v4719_v14  ;;  %1991 = vmatprep.subr.bf16.mxu0 %v1912_v40  ;;  %v1885_v42 = vmax.f32 %v1853_v12, 0.0  ;;  %v1886_v39 = vmax.f32 %v1854_v22, 0.0 }
 0xb01   :  { %1992 = vmatpush1.bf16.msra.mxu0 %v1911_v46 }
 0xb02   :  { %v1855_v3 = vadd.f32 %v1793_v2, %v1743_v26  ;;  %v1856_v52 = vadd.f32 %v1793_v2, %v1744_v41 }
 0xb03   :  { %v1686_v23 = vpop.permute.xlu1 %1685  ;;  %v1691_v38 = vpop.permute.xlu0 %1690 }
 0xb04   :  { %v1887_v44 = vmax.f32 %v1855_v3, 0.0  ;;  %v1888_v36 = vmax.f32 %v1856_v52, 0.0  ;;  %v1745_v5 = vmul.f32 %v1686_v23, %v4726_v4  ;;  %v1746_v54 = vmul.f32 %v1686_v23, %v4729_v60 }
 0xb05   :  { %v1747_v9 = vmul.f32 %v1691_v38, %v4736_v6  ;;  %v1748_v55 = vmul.f32 %v1691_v38, %v4739_v25 }
 0xb06   :  { %v1913_v20 = vpack.c.bf16 %v1887_v44, %v1885_v42  ;;  %v1857_v14 = vadd.f32 %v4924_v15, %v1745_v5  ;;  %v1858_v37 = vadd.f32 %v4924_v15, %v1746_v54  ;;  %v1914_v2 = vpack.c.bf16 %v1888_v36, %v1886_v39 }
 0xb07   :  { %v1859_v16 = vadd.f32 %v4926_v13, %v1747_v9  ;;  %v1860_v18 = vadd.f32 %v4926_v13, %v1748_v55 }
 0xb08   :  { %v1889_v58 = vmax.f32 %v1857_v14, 0.0  ;;  %v1890_v31 = vmax.f32 %v1858_v37, 0.0  ;;  %1993 = vmatprep.subr.bf16.mxu0 %v1914_v2 }
 0xb09   :  { %v1891_v4 = vmax.f32 %v1859_v16, 0.0  ;;  %v1892_v34 = vmax.f32 %v1860_v18, 0.0  ;;  %1994 = vmatpush1.bf16.msra.mxu0 %v1913_v20  ;;  %v1696_v60 = vpop.permute.xlu0 %1695 }
 0xb0a   :  { %v1749_v6 = vmul.f32 %v1696_v60, %v4746_v8  ;;  %v1750_v25 = vmul.f32 %v1696_v60, %v4749_v35 }
 0xb0b   :  { %v1915_v0 = vpack.c.bf16 %v1891_v4, %v1889_v58  ;;  %v1701_v7 = vpop.permute.xlu1 %1700  ;;  %v1916_v30 = vpack.c.bf16 %v1892_v34, %v1890_v31 }
 0xb0c   :  { %v1861_v15 = vadd.f32 %v4934_v62, %v1749_v6  ;;  %v1862_v27 = vadd.f32 %v4934_v62, %v1750_v25  ;;  %v1751_v13 = vmul.f32 %v1701_v7, %v4756_v57  ;;  %v1752_v45 = vmul.f32 %v1701_v7, %v4759_v48 }
 0xb0d   :  { %1995 = vmatprep.subr.bf16.mxu0 %v1916_v30 }
 0xb0e   :  { %v1863_v46 = vadd.f32 %v4928_v63, %v1751_v13  ;;  %v1864_v40 = vadd.f32 %v4928_v63, %v1752_v45  ;;  %1996 = vmatpush1.bf16.msra.mxu0 %v1915_v0  ;;  %v1893_v8 = vmax.f32 %v1861_v15, 0.0  ;;  %v1894_v12 = vmax.f32 %v1862_v27, 0.0 }
 0xb10   :  { %v1895_v35 = vmax.f32 %v1863_v46, 0.0  ;;  %v1896_v22 = vmax.f32 %v1864_v40, 0.0  ;;  %v3859_v40 = vld [vmem:[#allocation5 + $0xa0] sm:$0xff]  }
 0xb11   :  { %v1706_v51 = vpop.permute.xlu1 %1705 }
 0xb12   :  { %v1917_v26 = vpack.c.bf16 %v1895_v35, %v1893_v8  ;;  %v1753_v41 = vmul.f32 %v1706_v51, %v4766_v11  ;;  %v1754_v62 = vmul.f32 %v1706_v51, %v4769_v61  ;;  %v1918_v3 = vpack.c.bf16 %v1896_v22, %v1894_v12  ;;  %v3863_v8 = vld [vmem:[#allocation5 + $0xc0] sm:$0xff]   ;;  %v3864_v12 = vld [vmem:[#allocation5 + $0xc8] sm:$0xff]   ;;  %v3865_v35 = vld [vmem:[#allocation5 + $0xd0] sm:$0xff]  }
 0xb13   :  { %v1711_v57 = vpop.permute.xlu0 %1710  ;;  %v3866_v22 = vld [vmem:[#allocation5 + $0xd8] sm:$0xff]  }
 0xb14   :  { %v1865_v48 = vadd.f32 %v4930_v47, %v1753_v41  ;;  %v1866_v52 = vadd.f32 %v4930_v47, %v1754_v62  ;;  %v1755_v42 = vmul.f32 %v1711_v57, %v4776_v53  ;;  %v1756_v63 = vmul.f32 %v1711_v57, %v4779_v21  ;;  %1997 = vmatprep.subr.bf16.mxu0 %v1918_v3 }
 0xb15   :  { %1998 = vmatpush1.bf16.msra.mxu0 %v1917_v26 }
 0xb16   :  { %v1867_v39 = vadd.f32 %v4932_v29, %v1755_v42  ;;  %v1868_v23 = vadd.f32 %v4932_v29, %v1756_v63  ;;  %v1897_v38 = vmax.f32 %v1865_v48, 0.0  ;;  %v1898_v61 = vmax.f32 %v1866_v52, 0.0 }
 0xb18   :  { %v1899_v11 = vmax.f32 %v1867_v39, 0.0  ;;  %v1900_v44 = vmax.f32 %v1868_v23, 0.0 }
 0xb19   :  { %v1716_v36 = vpop.permute.xlu0 %1715 }
 0xb1a   :  { %v1919_v5 = vpack.c.bf16 %v1899_v11, %v1897_v38  ;;  %v1757_v54 = vmul.f32 %v1716_v36, %v4786_v56  ;;  %v1758_v47 = vmul.f32 %v1716_v36, %v4789_v49  ;;  %v1920_v9 = vpack.c.bf16 %v1900_v44, %v1898_v61 }
 0xb1b   :  { %v1721_v53 = vpop.permute.xlu1 %1720 }
 0xb1c   :  { %v1869_v21 = vadd.f32 %v4948_v32, %v1757_v54  ;;  %v1870_v55 = vadd.f32 %v4948_v32, %v1758_v47  ;;  %v1759_v20 = vmul.f32 %v1721_v53, %v4796_v33  ;;  %v1760_v29 = vmul.f32 %v1721_v53, %v4799_v10  ;;  %1999 = vmatprep.subr.bf16.mxu0 %v1920_v9 }
 0xb1d   :  { %2000 = vmatpush1.bf16.msra.mxu0 %v1919_v5 }
 0xb1e   :  { %v1871_v14 = vadd.f32 %v4940_v50, %v1759_v20  ;;  %v1872_v37 = vadd.f32 %v4940_v50, %v1760_v29  ;;  %v1901_v2 = vmax.f32 %v1869_v21, 0.0  ;;  %v1902_v56 = vmax.f32 %v1870_v55, 0.0 }
 0xb20   :  { %v1903_v16 = vmax.f32 %v1871_v14, 0.0  ;;  %v1904_v49 = vmax.f32 %v1872_v37, 0.0 }
 0xb21   :  { %v1726_v18 = vpop.permute.xlu1 %1725 }
 0xb22   :  { %v1921_v58 = vpack.c.bf16 %v1903_v16, %v1901_v2  ;;  %v1922_v31 = vpack.c.bf16 %v1904_v49, %v1902_v56  ;;  %v1761_v33 = vmul.f32 %v1726_v18, %v4806_v24  ;;  %v1762_v10 = vmul.f32 %v1726_v18, %v4809_v17  ;;  %v3860_v17 = vld [vmem:[#allocation5 + $0xa8] sm:$0xff]  }
 0xb23   :  { %v1731_v32 = vpop.permute.xlu0 %1730  ;;  %v5525_v24 = vmov 0  }
 0xb24   :  { %2001 = vmatprep.subr.bf16.mxu0 %v1922_v31  ;;  %v1763_v34 = vmul.f32 %v1731_v32, %v4816_v59  ;;  %v1764_v60 = vmul.f32 %v1731_v32, %v4819_v43  ;;  %v3861_v59 = vld [vmem:[#allocation5 + $0xb0] sm:$0xff]   ;;  %v3862_v43 = vld [vmem:[#allocation5 + $0xb8] sm:$0xff]  }
 0xb25   :  { %2002 = vmatpush1.bf16.msra.mxu0 %v1921_v58 }
 0xb26   :  { %v1838_v4 = vpop.permute.xlu1 %1837 }
 0xb27   :  { %v1873_v50 = vadd.f32 %v1838_v4, %v1761_v33  ;;  %v1874_v6 = vadd.f32 %v1838_v4, %v1762_v10 }
 0xb29   :  { %v1905_v30 = vmax.f32 %v1873_v50, 0.0  ;;  %v1906_v15 = vmax.f32 %v1874_v6, 0.0 }
 0xb2a   :  { %v1843_v25 = vpop.permute.xlu1 %1842 }
 0xb2b   :  { %v1875_v0 = vadd.f32 %v1843_v25, %v1763_v34  ;;  %v1876_v7 = vadd.f32 %v1843_v25, %v1764_v60 }
 0xb2d   :  { %v1907_v27 = vmax.f32 %v1875_v0, 0.0  ;;  %v1908_v13 = vmax.f32 %v1876_v7, 0.0 }
 0xb2f   :  { %v1923_v45 = vpack.c.bf16 %v1907_v27, %v1905_v30  ;;  %v1924_v46 = vpack.c.bf16 %v1908_v13, %v1906_v15  ;;  %v4109_v27 = vmov 9  }
 0xb30   :  { %3833 = vset.pattern.permute.xlu1 %v4109_v27  ;;  %3834 = vset.pattern.permute.xlu0 %v4109_v27 }
 0xb31   :  { %2003 = vmatprep.subr.bf16.mxu0 %v1924_v46 }
 0xb32   :  { %2004 = vmatpush1.bf16.msra.mxu0 %v1923_v45 }
 0xb35   :  { %2022 = vmatmul.mubr.bf16.vlgmr.msra.gmra.mrb[32].mxu0 %v3859_v40 }
 0xb36   :  { %2031 = vmatprep.mubr.bf16.mxu0 %v5525_v24 }
 0xb3d   :  { %2032 = vmatmul.mubr.bf16.gmra.mrb[36].mxu0 %v3860_v17 }
 0xb3e   :  { %2041 = vmatprep.mubr.bf16.mxu0 %v5525_v24 }
 0xb45   :  { %2042 = vmatmul.mubr.bf16.gmra.mrb[40].mxu0 %v3861_v59 }
 0xb46   :  { %2051 = vmatprep.mubr.bf16.mxu0 %v5525_v24 }
 0xb4d   :  { %2052 = vmatmul.mubr.bf16.gmra.mrb[44].mxu0 %v3862_v43 }
 0xb4e   :  { %2061 = vmatprep.mubr.bf16.mxu0 %v5525_v24 }
 0xb55   :  { %2062 = vmatmul.mubr.bf16.gmra.mrb[48].mxu0 %v3863_v8 }
 0xb56   :  { %2071 = vmatprep.mubr.bf16.mxu0 %v5525_v24 }
 0xb5d   :  { %2072 = vmatmul.mubr.bf16.gmra.mrb[52].mxu0 %v3864_v12 }
 0xb5e   :  { %2081 = vmatprep.mubr.bf16.mxu0 %v5525_v24 }
 0xb65   :  { %2082 = vmatmul.mubr.bf16.gmra.mrb[56].mxu0 %v3865_v35 }
 0xb66   :  { %2091 = vmatprep.mubr.bf16.mxu0 %v5525_v24 }
 0xb6d   :  { %2092 = vmatmul.mubr.bf16.gmra.mrb[60].mxu0 %v3866_v22 }
 0xc08   :  { %v4995_v51 = vpop.f32.mrb[32].mxu0 }
 0xc09   :  { %v4997_v26 = vpop.f32.mrb[33].mxu0 }
 0xc0a   :  { %v2102_v41 = vadd.f32 %v4997_v26, %v4995_v51  ;;  %v5001_v62 = vpop.f32.mrb[34].mxu0 }
 0xc0b   :  { %v5003_v3 = vpop.f32.mrb[35].mxu0 }
 0xc0c   :  { %v2105_v57 = vadd.f32 %v5003_v3, %v5001_v62  ;;  %2103 = vadd.xlane.f32.xlu0 %v2102_v41 }
 0xc0e   :  { %2106 = vadd.xlane.f32.xlu1 %v2105_v57 }
 0xc10   :  { %v5007_v48 = vpop.f32.mrb[36].mxu0 }
 0xc11   :  { %v5009_v52 = vpop.f32.mrb[37].mxu0 }
 0xc12   :  { %v2108_v42 = vadd.f32 %v5009_v52, %v5007_v48  ;;  %v5013_v63 = vpop.f32.mrb[38].mxu0 }
 0xc13   :  { %v5015_v39 = vpop.f32.mrb[39].mxu0 }
 0xc14   :  { %2109 = vadd.xlane.f32.xlu0 %v2108_v42  ;;  %v2111_v23 = vadd.f32 %v5015_v39, %v5013_v63 }
 0xc18   :  { %2112 = vadd.xlane.f32.xlu0 %v2111_v23  ;;  %v5019_v38 = vpop.f32.mrb[40].mxu0 }
 0xc19   :  { %v5021_v11 = vpop.f32.mrb[41].mxu0 }
 0xc1a   :  { %v2114_v44 = vadd.f32 %v5021_v11, %v5019_v38  ;;  %v5025_v61 = vpop.f32.mrb[42].mxu0 }
 0xc1b   :  { %v5027_v36 = vpop.f32.mrb[43].mxu0 }
 0xc1c   :  { %v2117_v5 = vadd.f32 %v5027_v36, %v5025_v61  ;;  %2115 = vadd.xlane.f32.xlu0 %v2114_v44 }
 0xc1e   :  { %2118 = vadd.xlane.f32.xlu1 %v2117_v5 }
 0xc20   :  { %v5031_v54 = vpop.f32.mrb[44].mxu0 }
 0xc21   :  { %v5033_v47 = vpop.f32.mrb[45].mxu0 }
 0xc22   :  { %v2120_v9 = vadd.f32 %v5033_v47, %v5031_v54  ;;  %v5037_v53 = vpop.f32.mrb[46].mxu0 }
 0xc23   :  { %v5039_v21 = vpop.f32.mrb[47].mxu0 }
 0xc24   :  { %v2123_v55 = vadd.f32 %v5039_v21, %v5037_v53  ;;  %2121 = vadd.xlane.f32.xlu0 %v2120_v9 }
 0xc26   :  { %2124 = vadd.xlane.f32.xlu1 %v2123_v55 }
 0xc28   :  { %v5043_v20 = vpop.f32.mrb[48].mxu0 }
 0xc29   :  { %v5045_v29 = vpop.f32.mrb[49].mxu0 }
 0xc2a   :  { %v2126_v14 = vadd.f32 %v5045_v29, %v5043_v20  ;;  %v5049_v37 = vpop.f32.mrb[50].mxu0 }
 0xc2b   :  { %v5051_v2 = vpop.f32.mrb[51].mxu0 }
 0xc2c   :  { %v2129_v56 = vadd.f32 %v5051_v2, %v5049_v37  ;;  %2127 = vadd.xlane.f32.xlu0 %v2126_v14 }
 0xc2e   :  { %2130 = vadd.xlane.f32.xlu1 %v2129_v56 }
 0xc30   :  { %v5055_v16 = vpop.f32.mrb[52].mxu0 }
 0xc31   :  { %v5057_v49 = vpop.f32.mrb[53].mxu0 }
 0xc32   :  { %v2132_v18 = vadd.f32 %v5057_v49, %v5055_v16  ;;  %v5061_v58 = vpop.f32.mrb[54].mxu0 }
 0xc33   :  { %v5063_v31 = vpop.f32.mrb[55].mxu0 }
 0xc34   :  { %v2135_v32 = vadd.f32 %v5063_v31, %v5061_v58  ;;  %2133 = vadd.xlane.f32.xlu0 %v2132_v18 }
 0xc36   :  { %2136 = vadd.xlane.f32.xlu1 %v2135_v32 }
 0xc38   :  { %v5067_v4 = vpop.f32.mrb[56].mxu0 }
 0xc39   :  { %v5069_v33 = vpop.f32.mrb[57].mxu0 }
 0xc3a   :  { %v2138_v10 = vadd.f32 %v5069_v33, %v5067_v4  ;;  %v5073_v34 = vpop.f32.mrb[58].mxu0 }
 0xc3b   :  { %v5075_v60 = vpop.f32.mrb[59].mxu0 }
 0xc3c   :  { %v2141_v50 = vadd.f32 %v5075_v60, %v5073_v34  ;;  %2139 = vadd.xlane.f32.xlu0 %v2138_v10 }
 0xc3e   :  { %2142 = vadd.xlane.f32.xlu1 %v2141_v50 }
 0xc40   :  { %v5079_v6 = vpop.f32.mrb[60].mxu0 }
 0xc41   :  { %v5081_v25 = vpop.f32.mrb[61].mxu0 }
 0xc42   :  { %v2144_v0 = vadd.f32 %v5081_v25, %v5079_v6  ;;  %v5085_v7 = vpop.f32.mrb[62].mxu0 }
 0xc43   :  { %v5087_v30 = vpop.f32.mrb[63].mxu0 }
 0xc44   :  { %v2147_v15 = vadd.f32 %v5087_v30, %v5085_v7  ;;  %2145 = vadd.xlane.f32.xlu0 %v2144_v0 }
 0xc46   :  { %2148 = vadd.xlane.f32.xlu1 %v2147_v15 }
 0xc99   :  { %v2104_v13 = vpop.xlane.xlu0 %2103 }
 0xc9a   :  { %v2150_v45 = vmul.f32 0.00390625, %v2104_v13 }
 0xc9b   :  { %v2107_v46 = vpop.xlane.xlu1 %2106 }
 0xc9c   :  { %v5094_v40 = vsub.f32 %v4995_v51, %v2150_v45  ;;  %v5097_v24 = vsub.f32 %v4997_v26, %v2150_v45  ;;  %v2151_v17 = vmul.f32 0.00390625, %v2107_v46 }
 0xc9e   :  { %v2198_v59 = vmul.f32 %v5094_v40, %v5094_v40  ;;  %v2199_v43 = vmul.f32 %v5097_v24, %v5097_v24  ;;  %v5104_v8 = vsub.f32 %v5001_v62, %v2151_v17  ;;  %v5107_v12 = vsub.f32 %v5003_v3, %v2151_v17 }
 0xca0   :  { %v2200_v35 = vmul.f32 %v5104_v8, %v5104_v8  ;;  %v2201_v22 = vmul.f32 %v5107_v12, %v5107_v12  ;;  %v2230_v51 = vadd.f32 %v2199_v43, %v2198_v59 }
 0xca1   :  { %v2110_v26 = vpop.xlane.xlu0 %2109 }
 0xca2   :  { %v2152_v41 = vmul.f32 0.00390625, %v2110_v26  ;;  %2231 = vadd.xlane.f32.xlu0 %v2230_v51  ;;  %v2233_v57 = vadd.f32 %v2201_v22, %v2200_v35 }
 0xca4   :  { %v5114_v42 = vsub.f32 %v5007_v48, %v2152_v41  ;;  %v5117_v62 = vsub.f32 %v5009_v52, %v2152_v41  ;;  %2234 = vadd.xlane.f32.xlu1 %v2233_v57 }
 0xca5   :  { %v2113_v3 = vpop.xlane.xlu0 %2112 }
 0xca6   :  { %v2202_v23 = vmul.f32 %v5114_v42, %v5114_v42  ;;  %v2203_v44 = vmul.f32 %v5117_v62, %v5117_v62  ;;  %v2153_v5 = vmul.f32 0.00390625, %v2113_v3 }
 0xca8   :  { %v5124_v9 = vsub.f32 %v5013_v63, %v2153_v5  ;;  %v5127_v55 = vsub.f32 %v5015_v39, %v2153_v5  ;;  %v2236_v48 = vadd.f32 %v2203_v44, %v2202_v23 }
 0xca9   :  { %v2116_v14 = vpop.xlane.xlu0 %2115 }
 0xcaa   :  { %v2204_v52 = vmul.f32 %v5124_v9, %v5124_v9  ;;  %v2205_v56 = vmul.f32 %v5127_v55, %v5127_v55  ;;  %v2154_v18 = vmul.f32 0.00390625, %v2116_v14  ;;  %2237 = vadd.xlane.f32.xlu0 %v2236_v48 }
 0xcab   :  { %v2119_v32 = vpop.xlane.xlu1 %2118 }
 0xcac   :  { %v5134_v10 = vsub.f32 %v5019_v38, %v2154_v18  ;;  %v5137_v63 = vsub.f32 %v5021_v11, %v2154_v18  ;;  %v2155_v50 = vmul.f32 0.00390625, %v2119_v32  ;;  %v2239_v39 = vadd.f32 %v2205_v56, %v2204_v52 }
 0xcae   :  { %v2206_v0 = vmul.f32 %v5134_v10, %v5134_v10  ;;  %v2207_v15 = vmul.f32 %v5137_v63, %v5137_v63  ;;  %v5144_v13 = vsub.f32 %v5025_v61, %v2155_v50  ;;  %v5147_v45 = vsub.f32 %v5027_v36, %v2155_v50  ;;  %2240 = vadd.xlane.f32.xlu1 %v2239_v39 }
 0xcb0   :  { %v2208_v38 = vmul.f32 %v5144_v13, %v5144_v13  ;;  %v2209_v11 = vmul.f32 %v5147_v45, %v5147_v45  ;;  %v2242_v46 = vadd.f32 %v2207_v15, %v2206_v0 }
 0xcb1   :  { %v2122_v17 = vpop.xlane.xlu0 %2121 }
 0xcb2   :  { %v2156_v59 = vmul.f32 0.00390625, %v2122_v17  ;;  %2243 = vadd.xlane.f32.xlu0 %v2242_v46  ;;  %v2245_v43 = vadd.f32 %v2209_v11, %v2208_v38 }
 0xcb3   :  { %v2125_v35 = vpop.xlane.xlu1 %2124 }
 0xcb4   :  { %v5154_v22 = vsub.f32 %v5031_v54, %v2156_v59  ;;  %v5157_v61 = vsub.f32 %v5033_v47, %v2156_v59  ;;  %v2157_v36 = vmul.f32 0.00390625, %v2125_v35  ;;  %2246 = vadd.xlane.f32.xlu1 %v2245_v43 }
 0xcb6   :  { %v2210_v51 = vmul.f32 %v5154_v22, %v5154_v22  ;;  %v2211_v26 = vmul.f32 %v5157_v61, %v5157_v61  ;;  %v5164_v41 = vsub.f32 %v5037_v53, %v2157_v36  ;;  %v5167_v57 = vsub.f32 %v5039_v21, %v2157_v36 }
 0xcb8   :  { %v2212_v54 = vmul.f32 %v5164_v41, %v5164_v41  ;;  %v2213_v47 = vmul.f32 %v5167_v57, %v5167_v57  ;;  %v2248_v3 = vadd.f32 %v2211_v26, %v2210_v51 }
 0xcb9   :  { %v2128_v23 = vpop.xlane.xlu0 %2127 }
 0xcba   :  { %v2158_v44 = vmul.f32 0.00390625, %v2128_v23  ;;  %2249 = vadd.xlane.f32.xlu0 %v2248_v3  ;;  %v2251_v5 = vadd.f32 %v2213_v47, %v2212_v54 }
 0xcbb   :  { %v2131_v48 = vpop.xlane.xlu1 %2130 }
 0xcbc   :  { %v5174_v14 = vsub.f32 %v5043_v20, %v2158_v44  ;;  %v5177_v53 = vsub.f32 %v5045_v29, %v2158_v44  ;;  %v2159_v21 = vmul.f32 0.00390625, %v2131_v48  ;;  %2252 = vadd.xlane.f32.xlu1 %v2251_v5 }
 0xcbe   :  { %v2214_v52 = vmul.f32 %v5174_v14, %v5174_v14  ;;  %v2215_v56 = vmul.f32 %v5177_v53, %v5177_v53  ;;  %v5184_v18 = vsub.f32 %v5049_v37, %v2159_v21  ;;  %v5187_v32 = vsub.f32 %v5051_v2, %v2159_v21 }
 0xcc0   :  { %v2216_v20 = vmul.f32 %v5184_v18, %v5184_v18  ;;  %v2217_v29 = vmul.f32 %v5187_v32, %v5187_v32  ;;  %v2254_v50 = vadd.f32 %v2215_v56, %v2214_v52 }
 0xcc1   :  { %v2134_v39 = vpop.xlane.xlu0 %2133 }
 0xcc2   :  { %v2160_v0 = vmul.f32 0.00390625, %v2134_v39  ;;  %2255 = vadd.xlane.f32.xlu0 %v2254_v50  ;;  %v2257_v15 = vadd.f32 %v2217_v29, %v2216_v20  ;;  %v3987_v39 = vld [vmem:[%s5509_s2] sm:$0xff] }
 0xcc3   :  { %v2137_v38 = vpop.xlane.xlu1 %2136 }
 0xcc4   :  { %v5194_v11 = vsub.f32 %v5055_v16, %v2160_v0  ;;  %v5197_v37 = vsub.f32 %v5057_v49, %v2160_v0  ;;  %v2161_v2 = vmul.f32 0.00390625, %v2137_v38  ;;  %2258 = vadd.xlane.f32.xlu1 %v2257_v15  ;;  %v5255_v0 = vld [vmem:[%s5509_s2 + $0x18] sm:$0xff]  ;;  %v5261_v15 = vld [vmem:[%s5509_s2 + $0x28] sm:$0xff]  ;;  %v5267_v38 = vld [vmem:[%s5509_s2 + $0x20] sm:$0xff] }
 0xcc6   :  { %v2218_v46 = vmul.f32 %v5194_v11, %v5194_v11  ;;  %v2219_v17 = vmul.f32 %v5197_v37, %v5197_v37  ;;  %v5204_v59 = vsub.f32 %v5061_v58, %v2161_v2  ;;  %v5207_v43 = vsub.f32 %v5063_v31, %v2161_v2  ;;  %v5273_v2 = vld [vmem:[%s5509_s2 + $0x30] sm:$0xff] }
 0xcc8   :  { %v2220_v16 = vmul.f32 %v5204_v59, %v5204_v59  ;;  %v2221_v49 = vmul.f32 %v5207_v43, %v5207_v43  ;;  %v2260_v35 = vadd.f32 %v2219_v17, %v2218_v46  ;;  %v5281_v46 = vld [vmem:[%s5509_s2 + $0x40] sm:$0xff]  ;;  %v5526_v17 = vld [vmem:[#allocation19_spill] sm:$0xff] }
 0xcc9   :  { %v2140_v36 = vpop.xlane.xlu0 %2139 }
 0xcca   :  { %v2162_v51 = vmul.f32 0.00390625, %v2140_v36  ;;  %2261 = vadd.xlane.f32.xlu0 %v2260_v35  ;;  %v2263_v26 = vadd.f32 %v2221_v49, %v2220_v16  ;;  %v5527_v16 = vld [vmem:[#allocation21_spill] sm:$0xff]  ;;  %v4110_v49 = vmov 8  }
 0xccb   :  { %v2143_v54 = vpop.xlane.xlu1 %2142 }
 0xccc   :  { %v5214_v47 = vsub.f32 %v5067_v4, %v2162_v51  ;;  %v5217_v58 = vsub.f32 %v5069_v33, %v2162_v51  ;;  %v2163_v31 = vmul.f32 0.00390625, %v2143_v54  ;;  %2264 = vadd.xlane.f32.xlu1 %v2263_v26 }
 0xcce   :  { %v2222_v3 = vmul.f32 %v5214_v47, %v5214_v47  ;;  %v2223_v23 = vmul.f32 %v5217_v58, %v5217_v58  ;;  %v5224_v44 = vsub.f32 %v5073_v34, %v2163_v31  ;;  %v5227_v5 = vsub.f32 %v5075_v60, %v2163_v31 }
 0xcd0   :  { %v2224_v4 = vmul.f32 %v5224_v44, %v5224_v44  ;;  %v2225_v33 = vmul.f32 %v5227_v5, %v5227_v5  ;;  %v2266_v48 = vadd.f32 %v2223_v23, %v2222_v3 }
 0xcd1   :  { %v2146_v21 = vpop.xlane.xlu0 %2145 }
 0xcd2   :  { %v2164_v52 = vmul.f32 0.00390625, %v2146_v21  ;;  %2267 = vadd.xlane.f32.xlu0 %v2266_v48  ;;  %v2269_v56 = vadd.f32 %v2225_v33, %v2224_v4  ;;  %v5528_v33 = vld [vmem:[#allocation20_spill] sm:$0xff] }
 0xcd3   :  { %v2149_v35 = vpop.xlane.xlu1 %2148 }
 0xcd4   :  { %v5234_v20 = vsub.f32 %v5079_v6, %v2164_v52  ;;  %v5237_v34 = vsub.f32 %v5081_v25, %v2164_v52  ;;  %2270 = vadd.xlane.f32.xlu1 %v2269_v56  ;;  %v3988_v6 = vld [vmem:[%s5509_s2 + $0x8] sm:$0xff]  ;;  %v3989_v25 = vld [vmem:[%s5509_s2 + $0x10] sm:$0xff]  ;;  %v2165_v36 = vmul.f32 0.00390625, %v2149_v35 }
 0xcd6   :  { %v2226_v60 = vmul.f32 %v5234_v20, %v5234_v20  ;;  %v2227_v29 = vmul.f32 %v5237_v34, %v5237_v34 }
 0xcd8   :  { %v2272_v50 = vadd.f32 %v2227_v29, %v2226_v60 }
 0xcda   :  { %2273 = vadd.xlane.f32.xlu0 %v2272_v50 }
 0xce5   :  { %2455 = vperm.xlu1 %3833, %v3987_v39  }
 0xce9   :  { %2459 = vperm.xlu1 %3833, %v3988_v6  }
 0xced   :  { %2463 = vperm.xlu1 %3833, %v3989_v25  }
 0xcf0   :  { %2467 = vperm.xlu0 %3834, %v5255_v0  }
 0xcf1   :  { %2475 = vperm.xlu1 %3833, %v5261_v15  }
 0xcf4   :  { %2471 = vperm.xlu0 %3834, %v5267_v38  }
 0xcf5   :  { %2479 = vperm.xlu1 %3833, %v5273_v2  }
 0xcf8   :  { %2483 = vperm.xlu0 %3834, %v4867_v1   ;;  %v5288_v1 = vsub.f32 %v5085_v7, %v2165_v36 }
 0xcf9   :  { %2491 = vperm.xlu1 %3833, %v4873_v19   ;;  %v5291_v19 = vsub.f32 %v5087_v30, %v2165_v36 }
 0xcfa   :  { %v2228_v51 = vmul.f32 %v5288_v1, %v5288_v1 }
 0xcfc   :  { %2487 = vperm.xlu0 %3834, %v5281_v46  }
 0xcfd   :  { %2495 = vperm.xlu1 %3833, %v4879_v28   ;;  %v2229_v28 = vmul.f32 %v5291_v19, %v5291_v19 }
 0xcff   :  { %v2275_v26 = vadd.f32 %v2229_v28, %v2228_v51 }
 0xd00   :  { %2499 = vperm.xlu0 %3834, %v5526_v17  }
 0xd04   :  { %2503 = vperm.xlu0 %3834, %v5527_v16  }
 0xd08   :  { %3835 = vset.pattern.permute.xlu0 %v4110_v49 }
 0xd21   :  { %2276 = vadd.xlane.f32.xlu1 %v2275_v26 }
 0xd2f   :  { %v2232_v54 = vpop.xlane.xlu0 %2231 }
 0xd30   :  { %v2278_v31 = vmul.f32 0.00390625, %v2232_v54 }
 0xd31   :  { %v2235_v3 = vpop.xlane.xlu1 %2234 }
 0xd32   :  { %v2294_v23 = vadd.f32 1e-05, %v2278_v31  ;;  %v2279_v4 = vmul.f32 0.00390625, %v2235_v3  ;;  %2507 = vperm.xlu1 %3833, %v5528_v33  }
 0xd34   :  { %3947 = vrsqrt.f32 %v2294_v23  ;;  %v2295_v7 = vadd.f32 1e-05, %v2279_v4 }
 0xd36   :  { %3949 = vrsqrt.f32 %v2295_v7  ;;  %3836 = vset.pattern.permute.xlu1 %v4110_v49 }
 0xd37   :  { %v2238_v30 = vpop.xlane.xlu0 %2237 }
 0xd38   :  { %v2280_v48 = vmul.f32 0.00390625, %v2238_v30 }
 0xd3a   :  { %v2296_v21 = vadd.f32 1e-05, %v2280_v48 }
 0xd3b   :  { %v2241_v52 = vpop.xlane.xlu1 %2240 }
 0xd3c   :  { %3951 = vrsqrt.f32 %v2296_v21  ;;  %v2281_v56 = vmul.f32 0.00390625, %v2241_v52 }
 0xd3e   :  { %v3948_v60 = vpop.eup %3947  ;;  %v2297_v29 = vadd.f32 1e-05, %v2281_v56 }
 0xd3f   :  { %v2244_v50 = vpop.xlane.xlu0 %2243  ;;  %v2326_v17 = vmul.f32 %v3987_v39, %v3948_v60 }
 0xd40   :  { %v3950_v16 = vpop.eup %3949  ;;  %3953 = vrsqrt.f32 %v2297_v29  ;;  %v2282_v35 = vmul.f32 0.00390625, %v2244_v50 }
 0xd41   :  { %2344 = vperm.xlu0 %3835, %v2326_v17   ;;  %v2247_v36 = vpop.xlane.xlu1 %2246  ;;  %v2327_v51 = vmul.f32 %v3988_v6, %v3950_v16 }
 0xd42   :  { %v2298_v28 = vadd.f32 1e-05, %v2282_v35  ;;  %v2283_v26 = vmul.f32 0.00390625, %v2247_v36 }
 0xd43   :  { %2349 = vperm.xlu1 %3836, %v2327_v51  }
 0xd44   :  { %3955 = vrsqrt.f32 %v2298_v28  ;;  %v2299_v49 = vadd.f32 1e-05, %v2283_v26 }
 0xd46   :  { %v3952_v54 = vpop.eup %3951  ;;  %3957 = vrsqrt.f32 %v2299_v49 }
 0xd47   :  { %v2250_v31 = vpop.xlane.xlu0 %2249  ;;  %v2328_v3 = vmul.f32 %v3989_v25, %v3952_v54  ;;  %v3995_v54 = vld [vmem:[%s5509_s2 + $0x38] sm:$0xff] }
 0xd48   :  { %v2284_v23 = vmul.f32 0.00390625, %v2250_v31 }
 0xd49   :  { %2354 = vperm.xlu1 %3836, %v2328_v3   ;;  %v2253_v4 = vpop.xlane.xlu1 %2252 }
 0xd4a   :  { %v3954_v33 = vpop.eup %3953  ;;  %v2300_v39 = vadd.f32 1e-05, %v2284_v23  ;;  %v2285_v7 = vmul.f32 0.00390625, %v2253_v4 }
 0xd4b   :  { %v2329_v30 = vmul.f32 %v5255_v0, %v3954_v33 }
 0xd4c   :  { %3959 = vrsqrt.f32 %v2300_v39  ;;  %v2301_v48 = vadd.f32 1e-05, %v2285_v7  ;;  %v3996_v7 = vld [vmem:[%s5509_s2 + $0x48] sm:$0xff] }
 0xd4d   :  { %2359 = vperm.xlu1 %3836, %v2329_v30  }
 0xd4e   :  { %v3956_v6 = vpop.eup %3955  ;;  %3961 = vrsqrt.f32 %v2301_v48 }
 0xd4f   :  { %v2256_v21 = vpop.xlane.xlu0 %2255  ;;  %v2330_v52 = vmul.f32 %v5267_v38, %v3956_v6 }
 0xd50   :  { %v3958_v56 = vpop.eup %3957  ;;  %v2286_v60 = vmul.f32 0.00390625, %v2256_v21 }
 0xd51   :  { %2364 = vperm.xlu1 %3836, %v2330_v52   ;;  %v2259_v25 = vpop.xlane.xlu1 %2258  ;;  %v2331_v17 = vmul.f32 %v5261_v15, %v3958_v56 }
 0xd52   :  { %v2302_v29 = vadd.f32 1e-05, %v2286_v60  ;;  %v2287_v50 = vmul.f32 0.00390625, %v2259_v25 }
 0xd54   :  { %3963 = vrsqrt.f32 %v2302_v29  ;;  %v2303_v16 = vadd.f32 1e-05, %v2287_v50 }
 0xd55   :  { %2369 = vperm.xlu1 %3836, %v2331_v17   ;;  %v3998_v17 = vld [vmem:[%s5509_s2 + $0x58] sm:$0xff] }
 0xd56   :  { %v3960_v0 = vpop.eup %3959  ;;  %3965 = vrsqrt.f32 %v2303_v16 }
 0xd57   :  { %v2262_v35 = vpop.xlane.xlu0 %2261  ;;  %v2332_v36 = vmul.f32 %v5273_v2, %v3960_v0 }
 0xd58   :  { %v3962_v51 = vpop.eup %3961  ;;  %v2288_v28 = vmul.f32 0.00390625, %v2262_v35  ;;  %v3999_v35 = vld [vmem:[%s5509_s2 + $0x60] sm:$0xff] }
 0xd59   :  { %2374 = vperm.xlu1 %3836, %v2332_v36   ;;  %v2265_v38 = vpop.xlane.xlu1 %2264  ;;  %v2333_v31 = vmul.f32 %v3995_v54, %v3962_v51 }
 0xd5a   :  { %v2304_v26 = vadd.f32 1e-05, %v2288_v28  ;;  %v2289_v49 = vmul.f32 0.00390625, %v2265_v38  ;;  %v4000_v28 = vld [vmem:[%s5509_s2 + $0x68] sm:$0xff] }
 0xd5c   :  { %3967 = vrsqrt.f32 %v2304_v26  ;;  %v2305_v15 = vadd.f32 1e-05, %v2289_v49  ;;  %v5529_v49 = vld [vmem:[#allocation22_spill] sm:$0xff] }
 0xd5d   :  { %2379 = vperm.xlu1 %3836, %v2333_v31  }
 0xd5e   :  { %v3964_v3 = vpop.eup %3963  ;;  %3969 = vrsqrt.f32 %v2305_v15 }
 0xd5f   :  { %v2268_v23 = vpop.xlane.xlu0 %2267  ;;  %v2334_v4 = vmul.f32 %v5281_v46, %v3964_v3  ;;  %v3997_v46 = vld [vmem:[%s5509_s2 + $0x50] sm:$0xff] }
 0xd60   :  { %v3966_v2 = vpop.eup %3965  ;;  %v2290_v33 = vmul.f32 0.00390625, %v2268_v23 }
 0xd61   :  { %2384 = vperm.xlu0 %3835, %v2334_v4   ;;  %v2271_v39 = vpop.xlane.xlu1 %2270  ;;  %v2335_v30 = vmul.f32 %v3996_v7, %v3966_v2 }
 0xd62   :  { %v2306_v48 = vadd.f32 1e-05, %v2290_v33  ;;  %v2291_v6 = vmul.f32 0.00390625, %v2271_v39 }
 0xd63   :  { %2389 = vperm.xlu1 %3836, %v2335_v30  }
 0xd64   :  { %3971 = vrsqrt.f32 %v2306_v48  ;;  %v2307_v21 = vadd.f32 1e-05, %v2291_v6 }
 0xd65   :  { %v5324_v31 = vpop.permute.xlu1 %2455 }
 0xd66   :  { %v3968_v52 = vpop.eup %3967  ;;  %3973 = vrsqrt.f32 %v2307_v21 }
 0xd67   :  { %v2274_v56 = vpop.xlane.xlu0 %2273  ;;  %v2336_v60 = vmul.f32 %v3997_v46, %v3968_v52 }
 0xd68   :  { %v3970_v25 = vpop.eup %3969  ;;  %v2292_v29 = vmul.f32 0.00390625, %v2274_v56 }
 0xd69   :  { %2394 = vperm.xlu1 %3836, %v2336_v60   ;;  %v2337_v16 = vmul.f32 %v3998_v17, %v3970_v25  ;;  %v2460_v15 = vpop.permute.xlu1 %2459 }
 0xd6a   :  { %v2308_v50 = vadd.f32 1e-05, %v2292_v29  ;;  %v4001_v29 = vld [vmem:[%s5509_s2 + $0x78] sm:$0xff] }
 0xd6c   :  { %3975 = vrsqrt.f32 %v2308_v50 }
 0xd6d   :  { %2399 = vperm.xlu1 %3836, %v2337_v16   ;;  %v5326_v3 = vpop.permute.xlu1 %2463 }
 0xd6e   :  { %v3972_v0 = vpop.eup %3971 }
 0xd6f   :  { %v2338_v36 = vmul.f32 %v3999_v35, %v3972_v0  ;;  %v5330_v4 = vpop.permute.xlu0 %2467 }
 0xd70   :  { %v3974_v51 = vpop.eup %3973 }
 0xd71   :  { %2404 = vperm.xlu0 %3835, %v2338_v36   ;;  %v2339_v38 = vmul.f32 %v4000_v28, %v3974_v51  ;;  %v5328_v23 = vpop.permute.xlu1 %2475 }
 0xd73   :  { %2409 = vperm.xlu1 %3836, %v2339_v38   ;;  %v5334_v33 = vpop.permute.xlu0 %2471 }
 0xd75   :  { %3837 = vset.pattern.permute.xlu0 %v4109_v27  ;;  %v5332_v2 = vpop.permute.xlu1 %2479 }
 0xd76   :  { %v3976_v26 = vpop.eup %3975  ;;  %2511 = vperm.xlu0 %3837, %v5529_v49  }
 0xd77   :  { %v2340_v54 = vmul.f32 %v3976_v26, %v5529_v49  ;;  %v5338_v7 = vpop.permute.xlu0 %2483 }
 0xd79   :  { %2414 = vperm.xlu1 %3836, %v2340_v54   ;;  %v5336_v39 = vpop.permute.xlu1 %2491 }
 0xd7b   :  { %v5342_v6 = vpop.permute.xlu0 %2487 }
 0xd7d   :  { %v5340_v30 = vpop.permute.xlu1 %2495 }
 0xd7f   :  { %v5344_v56 = vpop.permute.xlu0 %2499 }
 0xd83   :  { %v5346_v46 = vpop.permute.xlu0 %2503 }
 0xdae   :  { %v2277_v48 = vpop.xlane.xlu1 %2276 }
 0xdaf   :  { %v2293_v21 = vmul.f32 0.00390625, %v2277_v48 }
 0xdb1   :  { %v2309_v52 = vadd.f32 1e-05, %v2293_v21 }
 0xdb2   :  { %v5348_v25 = vpop.permute.xlu1 %2507 }
 0xdb3   :  { %3977 = vrsqrt.f32 %v2309_v52 }
 0xdbd   :  { %v3978_v60 = vpop.eup %3977 }
 0xdbe   :  { %v2341_v50 = vmul.f32 %v4001_v29, %v3978_v60 }
 0xdc0   :  { %v2345_v17 = vpop.permute.xlu0 %2344  ;;  %2419 = vperm.xlu1 %3836, %v2341_v50  }
 0xdc1   :  { %v2422_v16 = vmul.f32 %v2345_v17, %v5094_v40 }
 0xdc2   :  { %v2350_v0 = vpop.permute.xlu1 %2349 }
 0xdc3   :  { %v2518_v35 = vadd.f32 %v5324_v31, %v2422_v16  ;;  %v2424_v36 = vmul.f32 %v2350_v0, %v5104_v8 }
 0xdc4   :  { %3838 = vset.pattern.permute.xlu1 %v4109_v27 }
 0xdc5   :  { %v2520_v51 = vadd.f32 %v2460_v15, %v2424_v36  ;;  %2515 = vperm.xlu1 %3838, %v4001_v29   ;;  %v2550_v28 = vmax.f32 %v2518_v35, 0.0 }
 0xdc7   :  { %v2552_v38 = vmax.f32 %v2520_v51, 0.0 }
 0xdc8   :  { %v2355_v26 = vpop.permute.xlu1 %2354 }
 0xdc9   :  { %v2582_v49 = vpack.c.bf16 %v2552_v38, %v2550_v28  ;;  %v2426_v54 = vmul.f32 %v2355_v26, %v5114_v42 }
 0xdcb   :  { %2598 = vxpose.xlu0.c.b16.start [1/8] %v2582_v49, 128  ;;  %v2522_v21 = vadd.f32 %v5326_v3, %v2426_v54  ;;  %v2425_v49 = vmul.f32 %v2350_v0, %v5107_v12 }
 0xdcc   :  { %v2360_v48 = vpop.permute.xlu1 %2359 }
 0xdcd   :  { %v2428_v40 = vmul.f32 %v2360_v48, %v5124_v9  ;;  %v2554_v8 = vmax.f32 %v2522_v21, 0.0  ;;  %v2423_v21 = vmul.f32 %v2345_v17, %v5097_v24 }
 0xdcf   :  { %v2524_v52 = vadd.f32 %v5330_v4, %v2428_v40  ;;  %v2429_v40 = vmul.f32 %v2360_v48, %v5127_v55 }
 0xdd0   :  { %v2365_v60 = vpop.permute.xlu1 %2364 }
 0xdd1   :  { %v2556_v50 = vmax.f32 %v2524_v52, 0.0  ;;  %v2430_v27 = vmul.f32 %v2365_v60, %v5134_v10  ;;  %v2525_v12 = vadd.f32 %v5330_v4, %v2429_v40 }
 0xdd3   :  { %v2584_v29 = vpack.c.bf16 %v2556_v50, %v2554_v8  ;;  %v2526_v35 = vadd.f32 %v5334_v33, %v2430_v27  ;;  %v2521_v8 = vadd.f32 %v2460_v15, %v2425_v49  ;;  %v2427_v50 = vmul.f32 %v2355_v26, %v5117_v62 }
 0xdd4   :  { %v2370_v16 = vpop.permute.xlu1 %2369  ;;  %v2431_v62 = vmul.f32 %v2365_v60, %v5137_v63 }
 0xdd5   :  { %v2432_v36 = vmul.f32 %v2370_v16, %v5144_v13  ;;  %2599 = vxpose.xlu0.c.b16.cont [2/8] %v2584_v29, 128  ;;  %v2558_v28 = vmax.f32 %v2526_v35, 0.0  ;;  %v2553_v55 = vmax.f32 %v2521_v8, 0.0  ;;  %v2433_v48 = vmul.f32 %v2370_v16, %v5147_v45 }
 0xdd7   :  { %v2528_v42 = vadd.f32 %v5328_v23, %v2432_v36 }
 0xdd8   :  { %v2375_v51 = vpop.permute.xlu1 %2374 }
 0xdd9   :  { %v2560_v38 = vmax.f32 %v2528_v42, 0.0  ;;  %v2434_v9 = vmul.f32 %v2375_v51, %v5154_v22  ;;  %v2519_v22 = vadd.f32 %v5324_v31, %v2423_v21  ;;  %v2557_v42 = vmax.f32 %v2525_v12, 0.0 }
 0xddb   :  { %v2586_v54 = vpack.c.bf16 %v2560_v38, %v2558_v28  ;;  %v2530_v52 = vadd.f32 %v5332_v2, %v2434_v9  ;;  %v2551_v36 = vmax.f32 %v2519_v22, 0.0  ;;  %v2529_v28 = vadd.f32 %v5328_v23, %v2433_v48 }
 0xddc   :  { %v2380_v10 = vpop.permute.xlu1 %2379  ;;  %v2435_v38 = vmul.f32 %v2375_v51, %v5157_v61 }
 0xddd   :  { %v2436_v13 = vmul.f32 %v2380_v10, %v5164_v41  ;;  %2600 = vxpose.xlu0.c.b16.cont [3/8] %v2586_v54, 128  ;;  %v2562_v0 = vmax.f32 %v2530_v52, 0.0  ;;  %v2523_v41 = vadd.f32 %v5326_v3, %v2427_v50  ;;  %v2583_v4 = vpack.c.bf16 %v2553_v55, %v2551_v36 }
 0xdde   :  { %v2527_v3 = vadd.f32 %v5334_v33, %v2431_v62  ;;  %v2561_v54 = vmax.f32 %v2529_v28, 0.0  ;;  %v2531_v33 = vadd.f32 %v5332_v2, %v2435_v38 }
 0xddf   :  { %v2532_v27 = vadd.f32 %v5338_v7, %v2436_v13  ;;  %v2555_v16 = vmax.f32 %v2523_v41, 0.0 }
 0xde0   :  { %v2385_v29 = vpop.permute.xlu0 %2384  ;;  %v2559_v40 = vmax.f32 %v2527_v3, 0.0  ;;  %v2563_v2 = vmax.f32 %v2531_v33, 0.0 }
 0xde1   :  { %v2564_v24 = vmax.f32 %v2532_v27, 0.0  ;;  %v2438_v17 = vmul.f32 %v2385_v29, %v5174_v14  ;;  %v2437_v14 = vmul.f32 %v2380_v10, %v5167_v57  ;;  %v2585_v49 = vpack.c.bf16 %v2557_v42, %v2555_v16 }
 0xde2   :  { %v2390_v35 = vpop.permute.xlu1 %2389  ;;  %v2439_v10 = vmul.f32 %v2385_v29, %v5177_v53  ;;  %v2587_v13 = vpack.c.bf16 %v2561_v54, %v2559_v40 }
 0xde3   :  { %v2588_v15 = vpack.c.bf16 %v2564_v24, %v2562_v0  ;;  %v2534_v26 = vadd.f32 %v5342_v6, %v2438_v17  ;;  %v2440_v31 = vmul.f32 %v2390_v35, %v5184_v18  ;;  %v2533_v21 = vadd.f32 %v5338_v7, %v2437_v14 }
 0xde4   :  { %v2441_v23 = vmul.f32 %v2390_v35, %v5187_v32  ;;  %v2535_v32 = vadd.f32 %v5342_v6, %v2439_v10 }
 0xde5   :  { %2601 = vxpose.xlu0.c.b16.cont [4/8] %v2588_v15, 128  ;;  %v2536_v45 = vadd.f32 %v5336_v39, %v2440_v31  ;;  %v2566_v9 = vmax.f32 %v2534_v26, 0.0 }
 0xde6   :  { %v2537_v8 = vadd.f32 %v5336_v39, %v2441_v23  ;;  %v2567_v17 = vmax.f32 %v2535_v32, 0.0 }
 0xde7   :  { %v2568_v63 = vmax.f32 %v2536_v45, 0.0 }
 0xde8   :  { %2614 = vxpose.xlu1.c.b16.start [1/8] %v2583_v4, 128  ;;  %v2395_v60 = vpop.permute.xlu1 %2394  ;;  %v2569_v0 = vmax.f32 %v2537_v8, 0.0 }
 0xde9   :  { %v2442_v18 = vmul.f32 %v2395_v60, %v5194_v11  ;;  %v2590_v57 = vpack.c.bf16 %v2568_v63, %v2566_v9  ;;  %v2565_v11 = vmax.f32 %v2533_v21, 0.0  ;;  %v2443_v53 = vmul.f32 %v2395_v60, %v5197_v37 }
 0xdeb   :  { %2602 = vxpose.xlu0.c.b16.cont [5/8] %v2590_v57, 128  ;;  %v2538_v51 = vadd.f32 %v5340_v30, %v2442_v18 }
 0xdec   :  { %2615 = vxpose.xlu1.c.b16.cont [2/8] %v2585_v49, 128  ;;  %v2400_v61 = vpop.permute.xlu1 %2399 }
 0xded   :  { %v2444_v52 = vmul.f32 %v2400_v61, %v5204_v59  ;;  %v2445_v7 = vmul.f32 %v2400_v61, %v5207_v43  ;;  %v2570_v22 = vmax.f32 %v2538_v51, 0.0  ;;  %v2589_v59 = vpack.c.bf16 %v2565_v11, %v2563_v2 }
 0xdee   :  { %v2539_v43 = vadd.f32 %v5340_v30, %v2443_v53 }
 0xdef   :  { %v2540_v50 = vadd.f32 %v5344_v56, %v2444_v52  ;;  %v2541_v24 = vadd.f32 %v5344_v56, %v2445_v7 }
 0xdf0   :  { %v2405_v27 = vpop.permute.xlu0 %2404  ;;  %2616 = vxpose.xlu1.c.b16.cont [3/8] %v2587_v13, 128  ;;  %v2571_v36 = vmax.f32 %v2539_v43, 0.0 }
 0xdf1   :  { %v2572_v29 = vmax.f32 %v2540_v50, 0.0  ;;  %v2446_v12 = vmul.f32 %v2405_v27, %v5214_v47  ;;  %v2447_v37 = vmul.f32 %v2405_v27, %v5217_v58  ;;  %v2591_v47 = vpack.c.bf16 %v2569_v0, %v2567_v17 }
 0xdf2   :  { %v2410_v39 = vpop.permute.xlu1 %2409  ;;  %v2573_v41 = vmax.f32 %v2541_v24, 0.0 }
 0xdf3   :  { %v2592_v6 = vpack.c.bf16 %v2572_v29, %v2570_v22  ;;  %v2542_v55 = vadd.f32 %v5346_v46, %v2446_v12  ;;  %v2448_v48 = vmul.f32 %v2410_v39, %v5224_v44  ;;  %v2449_v35 = vmul.f32 %v2410_v39, %v5227_v5 }
 0xdf4   :  { %2617 = vxpose.xlu1.c.b16.cont [4/8] %v2589_v59, 128  ;;  %v2543_v30 = vadd.f32 %v5346_v46, %v2447_v37  ;;  %v2593_v58 = vpack.c.bf16 %v2573_v41, %v2571_v36 }
 0xdf5   :  { %2603 = vxpose.xlu0.c.b16.cont [6/8] %v2592_v6, 128  ;;  %v2544_v15 = vadd.f32 %v5348_v25, %v2448_v48  ;;  %v2545_v56 = vadd.f32 %v5348_v25, %v2449_v35  ;;  %v2574_v62 = vmax.f32 %v2542_v55, 0.0  ;;  %v2512_v45 = vpop.permute.xlu0 %2511 }
 0xdf6   :  { %v2575_v44 = vmax.f32 %v2543_v30, 0.0 }
 0xdf7   :  { %v2576_v26 = vmax.f32 %v2544_v15, 0.0  ;;  %v2577_v31 = vmax.f32 %v2545_v56, 0.0 }
 0xdf8   :  { %2618 = vxpose.xlu1.c.b16.cont [5/8] %v2591_v47, 128  ;;  %v2415_v4 = vpop.permute.xlu1 %2414 }
 0xdf9   :  { %v2594_v42 = vpack.c.bf16 %v2576_v26, %v2574_v62  ;;  %v2595_v5 = vpack.c.bf16 %v2577_v31, %v2575_v44  ;;  %v2450_v28 = vmul.f32 %v2415_v4, %v5234_v20  ;;  %v2451_v14 = vmul.f32 %v2415_v4, %v5237_v34 }
 0xdfb   :  { %2604 = vxpose.xlu0.c.b16.cont [7/8] %v2594_v42, 128  ;;  %v2546_v16 = vadd.f32 %v2512_v45, %v2450_v28  ;;  %v2547_v46 = vadd.f32 %v2512_v45, %v2451_v14 }
 0xdfc   :  { %2619 = vxpose.xlu1.c.b16.cont [6/8] %v2593_v58, 128 }
 0xdfd   :  { %v2578_v49 = vmax.f32 %v2546_v16, 0.0  ;;  %v2579_v18 = vmax.f32 %v2547_v46, 0.0 }
 0xe00   :  { %2620 = vxpose.xlu1.c.b16.cont [7/8] %v2595_v5, 128 }
 0xe3f   :  { %v2420_v25 = vpop.permute.xlu1 %2419 }
 0xe40   :  { %v2452_v3 = vmul.f32 %v2420_v25, %v5288_v1  ;;  %v2453_v38 = vmul.f32 %v2420_v25, %v5291_v19 }
 0xe44   :  { %v2516_v9 = vpop.permute.xlu1 %2515 }
 0xe45   :  { %v2548_v63 = vadd.f32 %v2516_v9, %v2452_v3  ;;  %v2549_v60 = vadd.f32 %v2516_v9, %v2453_v38 }
 0xe47   :  { %v2580_v54 = vmax.f32 %v2548_v63, 0.0  ;;  %v2581_v21 = vmax.f32 %v2549_v60, 0.0 }
 0xe49   :  { %v2596_v23 = vpack.c.bf16 %v2580_v54, %v2578_v49  ;;  %v2597_v57 = vpack.c.bf16 %v2581_v21, %v2579_v18 }
 0xe4b   :  { %2621 = vxpose.xlu1.c.b16.end [8/8] %v2597_v57, 128  ;;  %2605 = vxpose.xlu0.c.b16.end [8/8] %v2596_v23, 128 }
 0xe95   :  { %v2622_v20 = vpop.trf.xlu1  ;;  %v2606_v34 = vpop.trf.xlu0 }
 0xe99   :  { %v2623_v10 = vpop.trf.xlu1  ;;  %v2607_v40 = vpop.trf.xlu0 }
 0xe9a   :  { %v2656_v1 = vmax.bf16 %v2623_v10, %v2622_v20  ;;  %v2630_v51 = vmax.bf16 %v2607_v40, %v2606_v34 }
 0xe9d   :  { %v2624_v33 = vpop.trf.xlu1  ;;  %v2608_v61 = vpop.trf.xlu0 }
 0xe9e   :  { %v2657_v19 = vmax.bf16 %v2656_v1, %v2624_v33  ;;  %v2631_v52 = vmax.bf16 %v2630_v51, %v2608_v61 }
 0xea1   :  { %v2625_v13 = vpop.trf.xlu1  ;;  %v2609_v11 = vpop.trf.xlu0 }
 0xea2   :  { %v2658_v8 = vmax.bf16 %v2657_v19, %v2625_v13  ;;  %v2632_v7 = vmax.bf16 %v2631_v52, %v2609_v11 }
 0xea4   :  { %v2659_v32 = vunpack.i.l.bf16 %v2658_v8  ;;  %v2660_v53 = vunpack.i.h.bf16 %v2658_v8  ;;  %v2633_v50 = vunpack.i.l.bf16 %v2632_v7  ;;  %v2634_v2 = vunpack.i.h.bf16 %v2632_v7 }
 0xea5   :  { %v2626_v27 = vpop.trf.xlu1  ;;  %v2610_v22 = vpop.trf.xlu0 }
 0xea6   :  { %v2661_v29 = vmax.f32 %v2659_v32, %v2660_v53  ;;  %v2635_v12 = vmax.f32 %v2633_v50, %v2634_v2 }
 0xea8   :  { %v2662_v59 = vrot.slane %v2661_v29, 4  ;;  %v2636_v0 = vrot.slane %v2635_v12, 4 }
 0xea9   :  { %v2627_v24 = vpop.trf.xlu1  ;;  %v2611_v39 = vpop.trf.xlu0 }
 0xeaa   :  { %v2663_v17 = vmax.f32 %v2661_v29, %v2662_v59  ;;  %v2637_v43 = vmax.f32 %v2635_v12, %v2636_v0  ;;  %v2669_v41 = vmax.bf16 %v2627_v24, %v2626_v27  ;;  %v2643_v15 = vmax.bf16 %v2611_v39, %v2610_v22 }
 0xeac   :  { %v2664_v6 = vrot.slane %v2663_v17, 2  ;;  %v2638_v37 = vrot.slane %v2637_v43, 2 }
 0xead   :  { %v2628_v55 = vpop.trf.xlu1  ;;  %v2612_v48 = vpop.trf.xlu0 }
 0xeae   :  { %v2665_v35 = vmax.f32 %v2663_v17, %v2664_v6  ;;  %v2639_v47 = vmax.f32 %v2637_v43, %v2638_v37  ;;  %v2670_v30 = vmax.bf16 %v2669_v41, %v2628_v55  ;;  %v2644_v62 = vmax.bf16 %v2643_v15, %v2612_v48 }
 0xeb0   :  { %v2666_v56 = vrot.slane %v2665_v35, 1  ;;  %v2640_v36 = vrot.slane %v2639_v47, 1 }
 0xeb1   :  { %v2629_v26 = vpop.trf.xlu1  ;;  %v2613_v58 = vpop.trf.xlu0 }
 0xeb2   :  { %v2667_v31 = vmax.f32 %v2665_v35, %v2666_v56  ;;  %v2641_v42 = vmax.f32 %v2639_v47, %v2640_v36  ;;  %v2671_v44 = vmax.bf16 %v2670_v30, %v2629_v26  ;;  %v2645_v5 = vmax.bf16 %v2644_v62, %v2613_v58 }
 0xeb4   :  { %v2668_v4 = vpack.i.bf16 %v2667_v31, %v2667_v31  ;;  %v2642_v28 = vpack.i.bf16 %v2641_v42, %v2641_v42  ;;  %v2672_v14 = vunpack.i.l.bf16 %v2671_v44  ;;  %v2673_v25 = vunpack.i.h.bf16 %v2671_v44 }
 0xeb5   :  { %v2646_v45 = vunpack.i.l.bf16 %v2645_v5  ;;  %v2647_v16 = vunpack.i.h.bf16 %v2645_v5 }
 0xeb6   :  { %v5412_v46 = vunpack.c.l.bf16 %v2668_v4  ;;  %v5414_v3 = vunpack.c.l.bf16 %v2642_v28  ;;  %v2674_v38 = vmax.f32 %v2672_v14, %v2673_v25 }
 0xeb7   :  { %v2648_v9 = vmax.f32 %v2646_v45, %v2647_v16 }
 0xeb8   :  { %v2675_v63 = vrot.slane %v2674_v38, 4 }
 0xeb9   :  { %v2649_v60 = vrot.slane %v2648_v9, 4 }
 0xeba   :  { %v2676_v49 = vmax.f32 %v2674_v38, %v2675_v63 }
 0xebb   :  { %v2650_v18 = vmax.f32 %v2648_v9, %v2649_v60 }
 0xebc   :  { %v2677_v54 = vrot.slane %v2676_v49, 2 }
 0xebd   :  { %v2651_v21 = vrot.slane %v2650_v18, 2 }
 0xebe   :  { %v2678_v23 = vmax.f32 %v2676_v49, %v2677_v54 }
 0xebf   :  { %v2652_v57 = vmax.f32 %v2650_v18, %v2651_v21 }
 0xec0   :  { %v2679_v20 = vrot.slane %v2678_v23, 1 }
 0xec1   :  { %v2653_v34 = vrot.slane %v2652_v57, 1 }
 0xec2   :  { %v2680_v10 = vmax.f32 %v2678_v23, %v2679_v20 }
 0xec3   :  { %v2654_v40 = vmax.f32 %v2652_v57, %v2653_v34 }
 0xec4   :  { %v2681_v33 = vpack.i.bf16 %v2680_v10, %v2680_v10 }
 0xec5   :  { %v2655_v61 = vpack.i.bf16 %v2654_v40, %v2654_v40 }
 0xec6   :  { %v5416_v1 = vunpack.c.l.bf16 %v2681_v33 }
 0xec7   :  { %v5418_v51 = vunpack.c.l.bf16 %v2655_v61 }
 0xec8   :  { %4082 = dma.done.wait [#allocation4], 20480 }
 0xec9   :  { %4083 = vsyncadd [#allocation4], 4294946816  ;;  %v4111_v19 = vmov 0.0   ;;  %v2691_v52 = vld [vmem:[#allocation2 + $0x8] sm:$0xff]  ;;  %v2693_v13 = vld [vmem:[#allocation2 + $0x18] sm:$0xff]  ;;  %vm2726_vm4 = vcmask 1041409  }
 0xeca   :  { %2797 = vmatprep.mubr.f32.mxu1 %v4111_v19  ;;  %v2690_v11 = vld [vmem:[#allocation2] sm:$0xff]  ;;  %v3616_v8 = vpack.c.bf16 %v2693_v13, %v2691_v52  ;;  %v2692_v7 = vld [vmem:[#allocation2 + $0x10] sm:$0xff]  ;;  %v2695_v32 = vld [vmem:[#allocation2 + $0x28] sm:$0xff]  ;;  %v2727_v49 = vsel %vm2726_vm4, %v5418_v51, %v5414_v3  ;;  %vm2728_vm5 = vcmask 1042434   ;;  %vm2730_vm6 = vcmask 1043459  }
 0xecb   :  { %v2697_v53 = vld [vmem:[#allocation2 + $0x38] sm:$0xff]  ;;  %v3618_v50 = vpack.c.bf16 %v2692_v7, %v2690_v11  ;;  %v2694_v27 = vld [vmem:[#allocation2 + $0x20] sm:$0xff]  ;;  %v2696_v22 = vld [vmem:[#allocation2 + $0x30] sm:$0xff]  ;;  %v2729_v54 = vsel %vm2728_vm5, %v5412_v46, %v2727_v49  ;;  %vm2807_vm7 = vcmask 1043456  }
 0xecc   :  { %v3620_v2 = vpack.c.bf16 %v2697_v53, %v2695_v32  ;;  %v2699_v29 = vld [vmem:[#allocation2 + $0x48] sm:$0xff]  ;;  %3617 = vmatprep.subr.bf16.mxu1 %v3616_v8  ;;  %v2701_v12 = vld [vmem:[#allocation2 + $0x58] sm:$0xff]  ;;  %v3622_v59 = vpack.c.bf16 %v2696_v22, %v2694_v27  ;;  %v2698_v24 = vld [vmem:[#allocation2 + $0x40] sm:$0xff]  ;;  %v2731_v21 = vsel %vm2730_vm6, %v5416_v1, %v2729_v54 }
 0xecd   :  { %3619 = vmatpush1.bf16.msra.mxu1 %v3618_v50  ;;  %v3624_v0 = vpack.c.bf16 %v2701_v12, %v2699_v29  ;;  %v2700_v39 = vld [vmem:[#allocation2 + $0x50] sm:$0xff]  ;;  %v2703_v17 = vld [vmem:[#allocation2 + $0x68] sm:$0xff]  ;;  %v2705_v43 = vld [vmem:[#allocation2 + $0x78] sm:$0xff] }
 0xece   :  { %3621 = vmatprep.subr.bf16.mxu1 %v3620_v2  ;;  %v3626_v6 = vpack.c.bf16 %v2700_v39, %v2698_v24  ;;  %v3628_v37 = vpack.c.bf16 %v2705_v43, %v2703_v17  ;;  %v2702_v55 = vld [vmem:[#allocation2 + $0x60] sm:$0xff]  ;;  %v2704_v48 = vld [vmem:[#allocation2 + $0x70] sm:$0xff]  ;;  %v2707_v35 = vld [vmem:[#allocation2 + $0x88] sm:$0xff] }
 0xecf   :  { %v2709_v47 = vld [vmem:[#allocation2 + $0x98] sm:$0xff]  ;;  %v3630_v41 = vpack.c.bf16 %v2704_v48, %v2702_v55  ;;  %v2706_v56 = vld [vmem:[#allocation2 + $0x80] sm:$0xff]  ;;  %v2708_v36 = vld [vmem:[#allocation2 + $0x90] sm:$0xff] }
 0xed0   :  { %v3632_v15 = vpack.c.bf16 %v2709_v47, %v2707_v35  ;;  %v2711_v30 = vld [vmem:[#allocation2 + $0xa8] sm:$0xff]  ;;  %v2713_v62 = vld [vmem:[#allocation2 + $0xb8] sm:$0xff]  ;;  %v3634_v26 = vpack.c.bf16 %v2708_v36, %v2706_v56  ;;  %v2710_v31 = vld [vmem:[#allocation2 + $0xa0] sm:$0xff] }
 0xed1   :  { %3623 = vmatpush1.bf16.msra.mxu1 %v3622_v59  ;;  %v3636_v58 = vpack.c.bf16 %v2713_v62, %v2711_v30  ;;  %v2712_v42 = vld [vmem:[#allocation2 + $0xb0] sm:$0xff]  ;;  %v2715_v44 = vld [vmem:[#allocation2 + $0xc8] sm:$0xff]  ;;  %v2717_v5 = vld [vmem:[#allocation2 + $0xd8] sm:$0xff] }
 0xed2   :  { %3625 = vmatprep.subr.bf16.mxu1 %v3624_v0  ;;  %v3638_v4 = vpack.c.bf16 %v2712_v42, %v2710_v31  ;;  %v3640_v28 = vpack.c.bf16 %v2717_v5, %v2715_v44  ;;  %v2714_v14 = vld [vmem:[#allocation2 + $0xc0] sm:$0xff]  ;;  %v2716_v25 = vld [vmem:[#allocation2 + $0xd0] sm:$0xff]  ;;  %v2719_v45 = vld [vmem:[#allocation2 + $0xe8] sm:$0xff] }
 0xed3   :  { %v2721_v16 = vld [vmem:[#allocation2 + $0xf8] sm:$0xff]  ;;  %v3642_v38 = vpack.c.bf16 %v2716_v25, %v2714_v14  ;;  %v2718_v63 = vld [vmem:[#allocation2 + $0xe0] sm:$0xff]  ;;  %v2720_v60 = vld [vmem:[#allocation2 + $0xf0] sm:$0xff] }
 0xed4   :  { %v3644_v9 = vpack.c.bf16 %v2721_v16, %v2719_v45  ;;  %v3646_v18 = vpack.c.bf16 %v2720_v60, %v2718_v63  ;;  %v2897_v23 = vld [vmem:[#allocation2 + $0x108] sm:$0xff]  ;;  %v2899_v57 = vld [vmem:[#allocation2 + $0x118] sm:$0xff]  ;;  %v2896_v34 = vld [vmem:[#allocation2 + $0x100] sm:$0xff] }
 0xed5   :  { %3627 = vmatpush1.bf16.msra.mxu1 %v3626_v6  ;;  %v3648_v20 = vpack.c.bf16 %v2899_v57, %v2897_v23  ;;  %v2898_v10 = vld [vmem:[#allocation2 + $0x110] sm:$0xff]  ;;  %v2901_v3 = vld [vmem:[#allocation2 + $0x128] sm:$0xff]  ;;  %v2903_v33 = vld [vmem:[#allocation2 + $0x138] sm:$0xff] }
 0xed6   :  { %3629 = vmatprep.subr.bf16.mxu1 %v3628_v37  ;;  %v3650_v40 = vpack.c.bf16 %v2898_v10, %v2896_v34  ;;  %v3652_v61 = vpack.c.bf16 %v2903_v33, %v2901_v3  ;;  %v2900_v51 = vld [vmem:[#allocation2 + $0x120] sm:$0xff]  ;;  %v2902_v19 = vld [vmem:[#allocation2 + $0x130] sm:$0xff]  ;;  %v2905_v46 = vld [vmem:[#allocation2 + $0x148] sm:$0xff] }
 0xed7   :  { %3649 = vmatprep.subr.bf16.mxu0 %v3648_v20  ;;  %v3654_v52 = vpack.c.bf16 %v2902_v19, %v2900_v51  ;;  %v2907_v13 = vld [vmem:[#allocation2 + $0x158] sm:$0xff]  ;;  %v2904_v11 = vld [vmem:[#allocation2 + $0x140] sm:$0xff]  ;;  %v2906_v8 = vld [vmem:[#allocation2 + $0x150] sm:$0xff] }
 0xed8   :  { %3651 = vmatpush1.bf16.msra.mxu0 %v3650_v40  ;;  %v3656_v1 = vpack.c.bf16 %v2907_v13, %v2905_v46  ;;  %v3658_v7 = vpack.c.bf16 %v2906_v8, %v2904_v11  ;;  %v2909_v32 = vld [vmem:[#allocation2 + $0x168] sm:$0xff]  ;;  %v2911_v53 = vld [vmem:[#allocation2 + $0x178] sm:$0xff]  ;;  %v2908_v2 = vld [vmem:[#allocation2 + $0x160] sm:$0xff] }
 0xed9   :  { %3631 = vmatpush1.bf16.msra.mxu1 %v3630_v41  ;;  %3653 = vmatprep.subr.bf16.mxu0 %v3652_v61  ;;  %v3660_v50 = vpack.c.bf16 %v2911_v53, %v2909_v32  ;;  %v2910_v27 = vld [vmem:[#allocation2 + $0x170] sm:$0xff]  ;;  %v2913_v29 = vld [vmem:[#allocation2 + $0x188] sm:$0xff]  ;;  %v2915_v12 = vld [vmem:[#allocation2 + $0x198] sm:$0xff] }
 0xeda   :  { %3633 = vmatprep.subr.bf16.mxu1 %v3632_v15  ;;  %v3662_v22 = vpack.c.bf16 %v2910_v27, %v2908_v2  ;;  %v3664_v59 = vpack.c.bf16 %v2915_v12, %v2913_v29  ;;  %v2912_v0 = vld [vmem:[#allocation2 + $0x180] sm:$0xff]  ;;  %v2914_v24 = vld [vmem:[#allocation2 + $0x190] sm:$0xff]  ;;  %v2917_v17 = vld [vmem:[#allocation2 + $0x1a8] sm:$0xff] }
 0xedb   :  { %v3666_v39 = vpack.c.bf16 %v2914_v24, %v2912_v0  ;;  %v2919_v43 = vld [vmem:[#allocation2 + $0x1b8] sm:$0xff]  ;;  %v2916_v37 = vld [vmem:[#allocation2 + $0x1a0] sm:$0xff]  ;;  %v2918_v55 = vld [vmem:[#allocation2 + $0x1b0] sm:$0xff] }
 0xedc   :  { %3655 = vmatpush1.bf16.msra.mxu0 %v3654_v52  ;;  %v3668_v6 = vpack.c.bf16 %v2919_v43, %v2917_v17  ;;  %v3670_v48 = vpack.c.bf16 %v2918_v55, %v2916_v37  ;;  %v2921_v35 = vld [vmem:[#allocation2 + $0x1c8] sm:$0xff]  ;;  %v2923_v47 = vld [vmem:[#allocation2 + $0x1d8] sm:$0xff]  ;;  %v2920_v15 = vld [vmem:[#allocation2 + $0x1c0] sm:$0xff] }
 0xedd   :  { %3635 = vmatpush1.bf16.msra.mxu1 %v3634_v26  ;;  %3657 = vmatprep.subr.bf16.mxu0 %v3656_v1  ;;  %v3672_v41 = vpack.c.bf16 %v2923_v47, %v2921_v35  ;;  %v2922_v56 = vld [vmem:[#allocation2 + $0x1d0] sm:$0xff]  ;;  %v2925_v30 = vld [vmem:[#allocation2 + $0x1e8] sm:$0xff]  ;;  %v2927_v62 = vld [vmem:[#allocation2 + $0x1f8] sm:$0xff] }
 0xede   :  { %3637 = vmatprep.subr.bf16.mxu1 %v3636_v58  ;;  %v3674_v36 = vpack.c.bf16 %v2922_v56, %v2920_v15  ;;  %v3676_v26 = vpack.c.bf16 %v2927_v62, %v2925_v30  ;;  %v2924_v58 = vld [vmem:[#allocation2 + $0x1e0] sm:$0xff]  ;;  %v2926_v31 = vld [vmem:[#allocation2 + $0x1f0] sm:$0xff]  ;;  %v2929_v44 = vld [vmem:[#allocation2 + $0x208] sm:$0xff] }
 0xedf   :  { %v3678_v42 = vpack.c.bf16 %v2926_v31, %v2924_v58  ;;  %v2931_v5 = vld [vmem:[#allocation2 + $0x218] sm:$0xff]  ;;  %v2930_v14 = vld [vmem:[#allocation2 + $0x210] sm:$0xff]  ;;  %v2933_v45 = vld [vmem:[#allocation2 + $0x228] sm:$0xff] }
 0xee0   :  { %3659 = vmatpush1.bf16.msra.mxu0 %v3658_v7  ;;  %v2935_v16 = vld [vmem:[#allocation2 + $0x238] sm:$0xff]  ;;  %v2934_v63 = vld [vmem:[#allocation2 + $0x230] sm:$0xff]  ;;  %v2937_v49 = vld [vmem:[#allocation2 + $0x248] sm:$0xff] }
 0xee1   :  { %3639 = vmatpush1.bf16.msra.mxu1 %v3638_v4  ;;  %3661 = vmatprep.subr.bf16.mxu0 %v3660_v50  ;;  %v3680_v4 = vpack.c.bf16 %v2931_v5, %v2929_v44  ;;  %v2936_v54 = vld [vmem:[#allocation2 + $0x240] sm:$0xff]  ;;  %v2938_v23 = vld [vmem:[#allocation2 + $0x250] sm:$0xff]  ;;  %v2941_v57 = vld [vmem:[#allocation2 + $0x268] sm:$0xff] }
 0xee2   :  { %3641 = vmatprep.subr.bf16.mxu1 %v3640_v28  ;;  %v2928_v28 = vld [vmem:[#allocation2 + $0x200] sm:$0xff]  ;;  %v2943_v20 = vld [vmem:[#allocation2 + $0x278] sm:$0xff]  ;;  %v3690_v34 = vpack.c.bf16 %v2938_v23, %v2936_v54  ;;  %v2942_v3 = vld [vmem:[#allocation2 + $0x270] sm:$0xff] }
 0xee3   :  { %v3682_v25 = vpack.c.bf16 %v2930_v14, %v2928_v28  ;;  %v3692_v10 = vpack.c.bf16 %v2943_v20, %v2941_v57  ;;  %v2940_v40 = vld [vmem:[#allocation2 + $0x260] sm:$0xff]  ;;  %v2945_v33 = vld [vmem:[#allocation2 + $0x288] sm:$0xff]  ;;  %v2947_v61 = vld [vmem:[#allocation2 + $0x298] sm:$0xff] }
 0xee4   :  { %3663 = vmatpush1.bf16.msra.mxu0 %v3662_v22  ;;  %v3694_v51 = vpack.c.bf16 %v2942_v3, %v2940_v40  ;;  %v3696_v19 = vpack.c.bf16 %v2947_v61, %v2945_v33  ;;  %v2944_v52 = vld [vmem:[#allocation2 + $0x280] sm:$0xff]  ;;  %v2946_v46 = vld [vmem:[#allocation2 + $0x290] sm:$0xff]  ;;  %v2949_v13 = vld [vmem:[#allocation2 + $0x2a8] sm:$0xff]  ;;  %v4112_v61 = vmov 1966171168  }
 0xee5   :  { %3643 = vmatpush1.bf16.msra.mxu1 %v3642_v38  ;;  %3665 = vmatprep.subr.bf16.mxu0 %v3664_v59  ;;  %v3684_v38 = vpack.c.bf16 %v2935_v16, %v2933_v45  ;;  %v2951_v1 = vld [vmem:[#allocation2 + $0x2b8] sm:$0xff]  ;;  %v3698_v11 = vpack.c.bf16 %v2946_v46, %v2944_v52  ;;  %v2948_v7 = vld [vmem:[#allocation2 + $0x2a0] sm:$0xff]  ;;  %v2950_v32 = vld [vmem:[#allocation2 + $0x2b0] sm:$0xff] }
 0xee6   :  { %3645 = vmatprep.subr.bf16.mxu1 %v3644_v9  ;;  %v2932_v9 = vld [vmem:[#allocation2 + $0x220] sm:$0xff]  ;;  %v3700_v8 = vpack.c.bf16 %v2951_v1, %v2949_v13  ;;  %v2953_v53 = vld [vmem:[#allocation2 + $0x2c8] sm:$0xff]  ;;  %v2955_v50 = vld [vmem:[#allocation2 + $0x2d8] sm:$0xff]  ;;  %v3702_v2 = vpack.c.bf16 %v2950_v32, %v2948_v7 }
 0xee7   :  { %v3686_v60 = vpack.c.bf16 %v2934_v63, %v2932_v9  ;;  %v3704_v27 = vpack.c.bf16 %v2955_v50, %v2953_v53  ;;  %v2952_v22 = vld [vmem:[#allocation2 + $0x2c0] sm:$0xff]  ;;  %v2954_v29 = vld [vmem:[#allocation2 + $0x2d0] sm:$0xff]  ;;  %v2957_v12 = vld [vmem:[#allocation2 + $0x2e8] sm:$0xff] }
 0xee8   :  { %3667 = vmatpush1.bf16.msra.mxu0 %v3666_v39  ;;  %v2959_v59 = vld [vmem:[#allocation2 + $0x2f8] sm:$0xff]  ;;  %v3706_v0 = vpack.c.bf16 %v2954_v29, %v2952_v22  ;;  %v2956_v39 = vld [vmem:[#allocation2 + $0x2e0] sm:$0xff]  ;;  %v2958_v17 = vld [vmem:[#allocation2 + $0x2f0] sm:$0xff] }
 0xee9   :  { %3647 = vmatpush1.bf16.msra.mxu1 %v3646_v18  ;;  %3669 = vmatprep.subr.bf16.mxu0 %v3668_v6  ;;  %v2939_v18 = vld [vmem:[#allocation2 + $0x258] sm:$0xff]  ;;  %v3708_v24 = vpack.c.bf16 %v2959_v59, %v2957_v12  ;;  %v3710_v43 = vpack.c.bf16 %v2958_v17, %v2956_v39  ;;  %v2804_v32 = vld [vmem:[%s5510_s3] ss:$8 sm:$0x3] }
 0xeec   :  { %2798 = vmatmul.mubr.f32.vlgmr.msra.gmra.mrb[48].mxu1 %v2731_v21  ;;  %3671 = vmatpush1.bf16.msra.mxu0 %v3670_v48  ;;  %v3688_v21 = vpack.c.bf16 %v2939_v18, %v2937_v49 }
 0xeed   :  { %3673 = vmatprep.subr.bf16.mxu0 %v3672_v41 }
 0xef0   :  { %3675 = vmatpush1.bf16.msra.mxu0 %v3674_v36 }
 0xef1   :  { %3677 = vmatprep.subr.bf16.mxu0 %v3676_v26 }
 0xef4   :  { %3679 = vmatpush1.bf16.msra.mxu0 %v3678_v42 }
 0xef5   :  { %3681 = vmatprep.subr.bf16.mxu0 %v3680_v4 }
 0xef8   :  { %3683 = vmatpush1.bf16.msra.mxu0 %v3682_v25 }
 0xef9   :  { %3685 = vmatprep.subr.bf16.mxu0 %v3684_v38 }
 0xefc   :  { %3687 = vmatpush1.bf16.msra.mxu0 %v3686_v60 }
 0xefd   :  { %3689 = vmatprep.subr.bf16.mxu0 %v3688_v21 }
 0xf00   :  { %3691 = vmatpush1.bf16.msra.mxu0 %v3690_v34 }
 0xf01   :  { %3693 = vmatprep.subr.bf16.mxu0 %v3692_v10 }
 0xf04   :  { %3695 = vmatpush1.bf16.msra.mxu0 %v3694_v51  ;;  %v2853_v51 = vunpack.c.l.s4 %v4112_v61 }
 0xf05   :  { %3697 = vmatprep.subr.bf16.mxu0 %v3696_v19  ;;  %v2855_v19 = vlaneseq }
 0xf06   :  { %v2854_v52 = vunpack.c.0.s8 %v2853_v51  ;;  %v3146_v51 = vld [vmem:[#allocation2 + $0x3c0] sm:$0xff] }
 0xf07   :  { %v5428_v46 = vshrl.u32 %v2855_v19, 7  ;;  %v3148_v19 = vld [vmem:[#allocation2 + $0x3d0] sm:$0xff] }
 0xf08   :  { %3699 = vmatpush1.bf16.msra.mxu0 %v3698_v11 }
 0xf09   :  { %3701 = vmatprep.subr.bf16.mxu0 %v3700_v8  ;;  %v5431_v1 = vsub.s32 %v2854_v52, %v5428_v46  ;;  %v5439_v50 = vsub.s32 0, %v5428_v46  ;;  %v3738_v52 = vpack.c.bf16 %v3148_v19, %v3146_v51 }
 0xf0c   :  { %3703 = vmatpush1.bf16.msra.mxu0 %v3702_v2  ;;  %v5442_v2 = vsub.s32 1, %v5428_v46 }
 0xf0d   :  { %3705 = vmatprep.subr.bf16.mxu0 %v3704_v27  ;;  %v3586_v27 = vld [vmem:[%s5510_s3 + $0x1] ss:$8 sm:$0x3] }
 0xf0e   :  { %v2885_v12 = vrot.slane %v3586_v27, %v5439_v50  ;;  %v2889_v59 = vrot.slane %v3586_v27, %v5442_v2  ;;  %v3155_v27 = vld [vmem:[#allocation2 + $0x408] sm:$0xff] }
 0xf10   :  { %3707 = vmatpush1.bf16.msra.mxu0 %v3706_v0 }
 0xf11   :  { %3709 = vmatprep.subr.bf16.mxu0 %v3708_v24 }
 0xf14   :  { %3711 = vmatpush1.bf16.msra.mxu0 %v3710_v43 }
 0xfbf   :  { %v2799_v6 = vpop.f32.mrb[48].mxu1 }
 0xfc0   :  { %v2808_v37 = vsel %vm2807_vm7, %v2799_v6, 0.0  ;;  %v2801_v55 = vpop.f32.mrb[49].mxu1 }
 0xfc1   :  { %v2809_v48 = vrot.slane %v2808_v37, 4  ;;  %v2815_v35 = vsel %vm2807_vm7, %v2801_v55, 0.0 }
 0xfc2   :  { %v2816_v47 = vrot.slane %v2815_v35, 4 }
 0xfc3   :  { %v2810_v41 = vadd.f32 %v2809_v48, %v2808_v37  ;;  %v3125_v48 = vld [vmem:[#allocation2 + $0x318] sm:$0xff] }
 0xfc4   :  { %v2817_v15 = vadd.f32 %v2816_v47, %v2815_v35  ;;  %v3122_v47 = vld [vmem:[#allocation2 + $0x300] sm:$0xff] }
 0xfc5   :  { %v2811_v56 = vrot.slane %v2810_v41, 2 }
 0xfc6   :  { %v2818_v36 = vrot.slane %v2817_v15, 2 }
 0xfc7   :  { %v2812_v30 = vadd.f32 %v2811_v56, %v2810_v41  ;;  %v3124_v41 = vld [vmem:[#allocation2 + $0x310] sm:$0xff]  ;;  %v3127_v56 = vld [vmem:[#allocation2 + $0x328] sm:$0xff] }
 0xfc8   :  { %v2819_v62 = vadd.f32 %v2818_v36, %v2817_v15  ;;  %v3714_v15 = vpack.c.bf16 %v3124_v41, %v3122_v47  ;;  %v3129_v36 = vld [vmem:[#allocation2 + $0x338] sm:$0xff]  ;;  %v3162_v47 = vld [vmem:[#allocation2 + $0x440] sm:$0xff]  ;;  %v3164_v41 = vld [vmem:[#allocation2 + $0x450] sm:$0xff] }
 0xfc9   :  { %v2813_v26 = vrot.slane %v2812_v30, 1 }
 0xfca   :  { %v2820_v58 = vrot.slane %v2819_v62, 1 }
 0xfcb   :  { %v2814_v31 = vadd.f32 %v2813_v26, %v2812_v30  ;;  %v3716_v30 = vpack.c.bf16 %v3129_v36, %v3127_v56  ;;  %v3128_v26 = vld [vmem:[#allocation2 + $0x330] sm:$0xff]  ;;  %v3167_v56 = vld [vmem:[#allocation2 + $0x468] sm:$0xff]  ;;  %v3169_v36 = vld [vmem:[#allocation2 + $0x478] sm:$0xff] }
 0xfcc   :  { %v2821_v42 = vadd.f32 %v2820_v58, %v2819_v62  ;;  %v3126_v62 = vld [vmem:[#allocation2 + $0x320] sm:$0xff] }
 0xfcd   :  { %v2823_v44 = vmul.f32 0.25, %v2814_v31  ;;  %v3718_v58 = vpack.c.bf16 %v3128_v26, %v3126_v62  ;;  %v3131_v31 = vld [vmem:[#allocation2 + $0x348] sm:$0xff]  ;;  %v3166_v62 = vld [vmem:[#allocation2 + $0x460] sm:$0xff]  ;;  %v3168_v26 = vld [vmem:[#allocation2 + $0x470] sm:$0xff] }
 0xfce   :  { %v2824_v5 = vmul.f32 0.25, %v2821_v42  ;;  %v3133_v42 = vld [vmem:[#allocation2 + $0x358] sm:$0xff] }
 0xfcf   :  { %v2825_v4 = vsub.f32 %v2799_v6, %v2823_v44  ;;  %v3720_v44 = vpack.c.bf16 %v3133_v42, %v3131_v31  ;;  %v3171_v31 = vld [vmem:[#allocation2 + $0x488] sm:$0xff]  ;;  %v3173_v42 = vld [vmem:[#allocation2 + $0x498] sm:$0xff] }
 0xfd0   :  { %v2826_v28 = vsub.f32 %v2801_v55, %v2824_v5  ;;  %v3123_v55 = vld [vmem:[#allocation2 + $0x308] sm:$0xff]  ;;  %v3130_v5 = vld [vmem:[#allocation2 + $0x340] sm:$0xff] }
 0xfd1   :  { %v2827_v14 = vmul.f32 %v2825_v4, %v2825_v4  ;;  %v3712_v35 = vpack.c.bf16 %v3125_v48, %v3123_v55  ;;  %v3163_v55 = vld [vmem:[#allocation2 + $0x448] sm:$0xff]  ;;  %v3165_v48 = vld [vmem:[#allocation2 + $0x458] sm:$0xff] }
 0xfd2   :  { %v2828_v25 = vmul.f32 %v2826_v28, %v2826_v28 }
 0xfd3   :  { %v2829_v45 = vsel %vm2807_vm7, %v2827_v14, 0.0  ;;  %3713 = vmatprep.subr.bf16.mxu1 %v3712_v35  ;;  %v3135_v14 = vld [vmem:[#allocation2 + $0x368] sm:$0xff]  ;;  %v3752_v35 = vpack.c.bf16 %v3165_v48, %v3163_v55 }
 0xfd4   :  { %v2830_v16 = vrot.slane %v2829_v45, 4  ;;  %v2836_v38 = vsel %vm2807_vm7, %v2828_v25, 0.0  ;;  %3715 = vmatpush1.bf16.msra.mxu1 %v3714_v15  ;;  %v3137_v25 = vld [vmem:[#allocation2 + $0x378] sm:$0xff]  ;;  %v3754_v15 = vpack.c.bf16 %v3164_v41, %v3162_v47 }
 0xfd5   :  { %v2837_v9 = vrot.slane %v2836_v38, 4  ;;  %3717 = vmatprep.subr.bf16.mxu1 %v3716_v30  ;;  %v3756_v30 = vpack.c.bf16 %v3169_v36, %v3167_v56 }
 0xfd6   :  { %v2831_v63 = vadd.f32 %v2830_v16, %v2829_v45  ;;  %v3724_v45 = vpack.c.bf16 %v3137_v25, %v3135_v14  ;;  %v3134_v16 = vld [vmem:[#allocation2 + $0x360] sm:$0xff]  ;;  %v3175_v14 = vld [vmem:[#allocation2 + $0x4a8] sm:$0xff]  ;;  %v3177_v25 = vld [vmem:[#allocation2 + $0x4b8] sm:$0xff] }
 0xfd7   :  { %v2838_v60 = vadd.f32 %v2837_v9, %v2836_v38  ;;  %v3136_v38 = vld [vmem:[#allocation2 + $0x370] sm:$0xff] }
 0xfd8   :  { %v2832_v49 = vrot.slane %v2831_v63, 2  ;;  %3719 = vmatpush1.bf16.msra.mxu1 %v3718_v58  ;;  %v3726_v9 = vpack.c.bf16 %v3136_v38, %v3134_v16  ;;  %v3758_v58 = vpack.c.bf16 %v3168_v26, %v3166_v62  ;;  %v3174_v16 = vld [vmem:[#allocation2 + $0x4a0] sm:$0xff]  ;;  %v3176_v38 = vld [vmem:[#allocation2 + $0x4b0] sm:$0xff] }
 0xfd9   :  { %v2839_v18 = vrot.slane %v2838_v60, 2  ;;  %3721 = vmatprep.subr.bf16.mxu1 %v3720_v44  ;;  %v3760_v44 = vpack.c.bf16 %v3173_v42, %v3171_v31 }
 0xfda   :  { %v2833_v54 = vadd.f32 %v2832_v49, %v2831_v63  ;;  %v3139_v63 = vld [vmem:[#allocation2 + $0x388] sm:$0xff] }
 0xfdb   :  { %v2840_v21 = vadd.f32 %v2839_v18, %v2838_v60  ;;  %v3141_v60 = vld [vmem:[#allocation2 + $0x398] sm:$0xff]  ;;  %v3138_v18 = vld [vmem:[#allocation2 + $0x380] sm:$0xff] }
 0xfdc   :  { %v2834_v23 = vrot.slane %v2833_v54, 1  ;;  %v3728_v49 = vpack.c.bf16 %v3141_v60, %v3139_v63  ;;  %v3179_v63 = vld [vmem:[#allocation2 + $0x4c8] sm:$0xff]  ;;  %v3181_v60 = vld [vmem:[#allocation2 + $0x4d8] sm:$0xff] }
 0xfdd   :  { %v2841_v57 = vrot.slane %v2840_v21, 1 }
 0xfde   :  { %v2835_v20 = vadd.f32 %v2834_v23, %v2833_v54  ;;  %v3140_v54 = vld [vmem:[#allocation2 + $0x390] sm:$0xff]  ;;  %v3143_v23 = vld [vmem:[#allocation2 + $0x3a8] sm:$0xff] }
 0xfdf   :  { %v2842_v34 = vadd.f32 %v2841_v57, %v2840_v21  ;;  %v3730_v21 = vpack.c.bf16 %v3140_v54, %v3138_v18  ;;  %v3145_v57 = vld [vmem:[#allocation2 + $0x3b8] sm:$0xff]  ;;  %v3178_v18 = vld [vmem:[#allocation2 + $0x4c0] sm:$0xff]  ;;  %v3180_v54 = vld [vmem:[#allocation2 + $0x4d0] sm:$0xff] }
 0xfe0   :  { %v2843_v10 = vmul.f32 0.25, %v2835_v20  ;;  %v3732_v20 = vpack.c.bf16 %v3145_v57, %v3143_v23  ;;  %v3183_v23 = vld [vmem:[#allocation2 + $0x4e8] sm:$0xff]  ;;  %v3185_v57 = vld [vmem:[#allocation2 + $0x4f8] sm:$0xff] }
 0xfe1   :  { %v2844_v40 = vmul.f32 0.25, %v2842_v34  ;;  %v3142_v34 = vld [vmem:[#allocation2 + $0x3a0] sm:$0xff] }
 0xfe2   :  { %v2845_v3 = vadd.f32 1e-05, %v2843_v10  ;;  %v3144_v10 = vld [vmem:[#allocation2 + $0x3b0] sm:$0xff] }
 0xfe3   :  { %v2846_v33 = vadd.f32 1e-05, %v2844_v40  ;;  %v3734_v40 = vpack.c.bf16 %v3144_v10, %v3142_v34  ;;  %v3772_v34 = vpack.c.bf16 %v3185_v57, %v3183_v23  ;;  %v3184_v10 = vld [vmem:[#allocation2 + $0x4f0] sm:$0xff] }
 0xfe4   :  { %4002 = vrsqrt.f32 %v2845_v3  ;;  %v3147_v3 = vld [vmem:[#allocation2 + $0x3c8] sm:$0xff] }
 0xfe5   :  { %4004 = vrsqrt.f32 %v2846_v33  ;;  %v3149_v33 = vld [vmem:[#allocation2 + $0x3d8] sm:$0xff] }
 0xfe6   :  { %v3736_v61 = vpack.c.bf16 %v3149_v33, %v3147_v3 }
 0xfee   :  { %v4003_v13 = vpop.eup %4002 }
 0xfef   :  { %v4005_v11 = vpop.eup %4004 }
 0xff0   :  { %v2851_v8 = vcombine.low %v4003_v13, %v4005_v11  ;;  %v3151_v13 = vld [vmem:[#allocation2 + $0x3e8] sm:$0xff]  ;;  %v3153_v11 = vld [vmem:[#allocation2 + $0x3f8] sm:$0xff] }
 0xff2   :  { %v2858_v7 = vrot.slane %v2851_v8, %v5431_v1  ;;  %v3740_v8 = vpack.c.bf16 %v3153_v11, %v3151_v13 }
 0xff4   :  { %v2865_v53 = vrot.slane %v2858_v7, %v5431_v1  ;;  %v3150_v7 = vld [vmem:[#allocation2 + $0x3e0] sm:$0xff] }
 0xff6   :  { %v2867_v22 = vmul.f32 %v2865_v53, %v2804_v32  ;;  %v3152_v32 = vld [vmem:[#allocation2 + $0x3f0] sm:$0xff] }
 0xff7   :  { %v3742_v53 = vpack.c.bf16 %v3152_v32, %v3150_v7 }
 0xff8   :  { %v2876_v29 = vrot.slane %v2867_v22, %v5442_v2  ;;  %v2872_v0 = vrot.slane %v2867_v22, %v5439_v50  ;;  %v3157_v22 = vld [vmem:[#allocation2 + $0x418] sm:$0xff] }
 0xffa   :  { %v2880_v24 = vmul.f32 %v2876_v29, %v2826_v28  ;;  %v2879_v39 = vmul.f32 %v2872_v0, %v2825_v4  ;;  %v3132_v4 = vld [vmem:[#allocation2 + $0x350] sm:$0xff]  ;;  %v3744_v29 = vpack.c.bf16 %v3157_v22, %v3155_v27 }
 0xffb   :  { %v3722_v28 = vpack.c.bf16 %v3132_v4, %v3130_v5  ;;  %v3170_v5 = vld [vmem:[#allocation2 + $0x480] sm:$0xff]  ;;  %v3172_v4 = vld [vmem:[#allocation2 + $0x490] sm:$0xff] }
 0xffc   :  { %v2893_v17 = vadd.f32 %v2889_v59, %v2880_v24  ;;  %v2892_v43 = vadd.f32 %v2885_v12, %v2879_v39  ;;  %v3154_v12 = vld [vmem:[#allocation2 + $0x400] sm:$0xff]  ;;  %v3156_v59 = vld [vmem:[#allocation2 + $0x410] sm:$0xff]  ;;  %v3159_v24 = vld [vmem:[#allocation2 + $0x428] sm:$0xff] }
 0xffd   :  { %3723 = vmatpush1.bf16.msra.mxu1 %v3722_v28  ;;  %v3746_v0 = vpack.c.bf16 %v3156_v59, %v3154_v12  ;;  %v3161_v39 = vld [vmem:[#allocation2 + $0x438] sm:$0xff]  ;;  %v3762_v28 = vpack.c.bf16 %v3172_v4, %v3170_v5 }
 0xffe   :  { %v2895_v6 = vmax.f32 %v2893_v17, 0.0  ;;  %v2894_v37 = vmax.f32 %v2892_v43, 0.0  ;;  %3725 = vmatprep.subr.bf16.mxu1 %v3724_v45  ;;  %v3748_v17 = vpack.c.bf16 %v3161_v39, %v3159_v24  ;;  %v3158_v43 = vld [vmem:[#allocation2 + $0x420] sm:$0xff]  ;;  %v3764_v45 = vpack.c.bf16 %v3177_v25, %v3175_v14 }
0x1000   :  { %3024 = vmatprep.mubr.f32.mxu0 %v2895_v6  ;;  %v3160_v6 = vld [vmem:[#allocation2 + $0x430] sm:$0xff] }
0x1001   :  { %3025 = vmatmul.mubr.f32.vlgmr.msra.gmra.mrb[64].mxu0 %v2894_v37  ;;  %3727 = vmatpush1.bf16.msra.mxu1 %v3726_v9  ;;  %v3750_v37 = vpack.c.bf16 %v3160_v6, %v3158_v43  ;;  %v3766_v9 = vpack.c.bf16 %v3176_v38, %v3174_v16  ;;  %v3588_v38 = vld [vmem:[%s5510_s3 + $0x3] ss:$8 sm:$0x3] }
0x1002   :  { %3729 = vmatprep.subr.bf16.mxu1 %v3728_v49  ;;  %v3768_v49 = vpack.c.bf16 %v3181_v60, %v3179_v63 }
0x1005   :  { %3731 = vmatpush1.bf16.msra.mxu1 %v3730_v21  ;;  %v3770_v21 = vpack.c.bf16 %v3180_v54, %v3178_v18  ;;  %v3115_v18 = vrot.slane %v3588_v38, %v5442_v2 }
0x1006   :  { %3733 = vmatprep.subr.bf16.mxu1 %v3732_v20  ;;  %v3182_v20 = vld [vmem:[#allocation2 + $0x4e0] sm:$0xff] }
0x1009   :  { %3735 = vmatpush1.bf16.msra.mxu1 %v3734_v40  ;;  %v3774_v40 = vpack.c.bf16 %v3184_v10, %v3182_v20 }
0x100a   :  { %3737 = vmatprep.subr.bf16.mxu1 %v3736_v61 }
0x100d   :  { %3739 = vmatpush1.bf16.msra.mxu1 %v3738_v52 }
0x100e   :  { %3741 = vmatprep.subr.bf16.mxu1 %v3740_v8 }
0x1011   :  { %3743 = vmatpush1.bf16.msra.mxu1 %v3742_v53 }
0x1012   :  { %3745 = vmatprep.subr.bf16.mxu1 %v3744_v29 }
0x1015   :  { %3747 = vmatpush1.bf16.msra.mxu1 %v3746_v0 }
0x1016   :  { %3749 = vmatprep.subr.bf16.mxu1 %v3748_v17 }
0x1019   :  { %3751 = vmatpush1.bf16.msra.mxu1 %v3750_v37 }
0x101a   :  { %3753 = vmatprep.subr.bf16.mxu1 %v3752_v35 }
0x101d   :  { %3755 = vmatpush1.bf16.msra.mxu1 %v3754_v15 }
0x101e   :  { %3757 = vmatprep.subr.bf16.mxu1 %v3756_v30 }
0x1021   :  { %3759 = vmatpush1.bf16.msra.mxu1 %v3758_v58 }
0x1022   :  { %3761 = vmatprep.subr.bf16.mxu1 %v3760_v44 }
0x1025   :  { %3763 = vmatpush1.bf16.msra.mxu1 %v3762_v28 }
0x1026   :  { %3765 = vmatprep.subr.bf16.mxu1 %v3764_v45  ;;  %v3587_v45 = vld [vmem:[%s5510_s3 + $0x2] ss:$8 sm:$0x3] }
0x1029   :  { %3767 = vmatpush1.bf16.msra.mxu1 %v3766_v9 }
0x102a   :  { %3769 = vmatprep.subr.bf16.mxu1 %v3768_v49  ;;  %v3111_v49 = vrot.slane %v3588_v38, %v5439_v50 }
0x102d   :  { %3771 = vmatpush1.bf16.msra.mxu1 %v3770_v21 }
0x102e   :  { %3773 = vmatprep.subr.bf16.mxu1 %v3772_v34 }
0x1031   :  { %3775 = vmatpush1.bf16.msra.mxu1 %v3774_v40 }
0x10d4   :  { %v3026_v3 = vpop.f32.mrb[64].mxu0 }
0x10d5   :  { %v3035_v33 = vsel %vm2807_vm7, %v3026_v3, 0.0  ;;  %v3028_v61 = vpop.f32.mrb[65].mxu0 }
0x10d6   :  { %v3036_v51 = vrot.slane %v3035_v33, 4  ;;  %v3042_v19 = vsel %vm2807_vm7, %v3028_v61, 0.0 }
0x10d7   :  { %v3043_v52 = vrot.slane %v3042_v19, 4 }
0x10d8   :  { %v3037_v13 = vadd.f32 %v3036_v51, %v3035_v33 }
0x10d9   :  { %v3044_v11 = vadd.f32 %v3043_v52, %v3042_v19 }
0x10da   :  { %v3038_v8 = vrot.slane %v3037_v13, 2 }
0x10db   :  { %v3045_v7 = vrot.slane %v3044_v11, 2 }
0x10dc   :  { %v3039_v32 = vadd.f32 %v3038_v8, %v3037_v13 }
0x10dd   :  { %v3046_v53 = vadd.f32 %v3045_v7, %v3044_v11 }
0x10de   :  { %v3040_v27 = vrot.slane %v3039_v32, 1 }
0x10df   :  { %v3047_v22 = vrot.slane %v3046_v53, 1 }
0x10e0   :  { %v3041_v29 = vadd.f32 %v3040_v27, %v3039_v32 }
0x10e1   :  { %v3048_v12 = vadd.f32 %v3047_v22, %v3046_v53 }
0x10e2   :  { %v3049_v59 = vmul.f32 0.25, %v3041_v29 }
0x10e3   :  { %v3050_v0 = vmul.f32 0.25, %v3048_v12 }
0x10e4   :  { %v3051_v24 = vsub.f32 %v3026_v3, %v3049_v59 }
0x10e5   :  { %v3052_v39 = vsub.f32 %v3028_v61, %v3050_v0 }
0x10e6   :  { %v3053_v17 = vmul.f32 %v3051_v24, %v3051_v24 }
0x10e7   :  { %v3054_v43 = vmul.f32 %v3052_v39, %v3052_v39 }
0x10e8   :  { %v3055_v6 = vsel %vm2807_vm7, %v3053_v17, 0.0 }
0x10e9   :  { %v3056_v37 = vrot.slane %v3055_v6, 4  ;;  %v3062_v55 = vsel %vm2807_vm7, %v3054_v43, 0.0 }
0x10ea   :  { %v3063_v48 = vrot.slane %v3062_v55, 4 }
0x10eb   :  { %v3057_v35 = vadd.f32 %v3056_v37, %v3055_v6 }
0x10ec   :  { %v3064_v47 = vadd.f32 %v3063_v48, %v3062_v55 }
0x10ed   :  { %v3058_v41 = vrot.slane %v3057_v35, 2 }
0x10ee   :  { %v3065_v15 = vrot.slane %v3064_v47, 2 }
0x10ef   :  { %v3059_v56 = vadd.f32 %v3058_v41, %v3057_v35 }
0x10f0   :  { %v3066_v36 = vadd.f32 %v3065_v15, %v3064_v47 }
0x10f1   :  { %v3060_v30 = vrot.slane %v3059_v56, 1 }
0x10f2   :  { %v3067_v62 = vrot.slane %v3066_v36, 1 }
0x10f3   :  { %v3061_v26 = vadd.f32 %v3060_v30, %v3059_v56 }
0x10f4   :  { %v3068_v58 = vadd.f32 %v3067_v62, %v3066_v36 }
0x10f5   :  { %v3069_v31 = vmul.f32 0.25, %v3061_v26 }
0x10f6   :  { %v3070_v42 = vmul.f32 0.25, %v3068_v58 }
0x10f7   :  { %v3071_v44 = vadd.f32 1e-05, %v3069_v31 }
0x10f8   :  { %v3072_v5 = vadd.f32 1e-05, %v3070_v42 }
0x10f9   :  { %4006 = vrsqrt.f32 %v3071_v44 }
0x10fa   :  { %4008 = vrsqrt.f32 %v3072_v5 }
0x1103   :  { %v4007_v4 = vpop.eup %4006 }
0x1104   :  { %v4009_v28 = vpop.eup %4008 }
0x1105   :  { %v3077_v14 = vcombine.low %v4007_v4, %v4009_v28 }
0x1107   :  { %v3084_v25 = vrot.slane %v3077_v14, %v5431_v1  ;;  %v3589_v14 = vld [vmem:[%s5510_s3 + $0x4] ss:$8 sm:$0x3] }
0x1109   :  { %v3091_v16 = vrot.slane %v3084_v25, %v5431_v1 }
0x110b   :  { %v3093_v9 = vmul.f32 %v3587_v45, %v3091_v16  ;;  %v3590_v45 = vld [vmem:[%s5510_s3 + $0x5] ss:$8 sm:$0x3] }
0x110d   :  { %v3098_v63 = vrot.slane %v3093_v9, %v5439_v50  ;;  %v3102_v60 = vrot.slane %v3093_v9, %v5442_v2 }
0x110f   :  { %v3106_v54 = vmul.f32 %v3102_v60, %v3052_v39  ;;  %v3105_v21 = vmul.f32 %v3098_v63, %v3051_v24  ;;  %v3337_v63 = vrot.slane %v3590_v45, %v5439_v50  ;;  %v3341_v60 = vrot.slane %v3590_v45, %v5442_v2 }
0x1111   :  { %v3119_v23 = vadd.f32 %v3115_v18, %v3106_v54  ;;  %v3118_v57 = vadd.f32 %v3111_v49, %v3105_v21 }
0x1113   :  { %v3121_v20 = vmax.f32 %v3119_v23, 0.0  ;;  %v3120_v34 = vmax.f32 %v3118_v57, 0.0 }
0x1115   :  { %3250 = vmatprep.mubr.f32.mxu1 %v3121_v20 }
0x1116   :  { %3251 = vmatmul.mubr.f32.vlgmr.msra.gmra.mrb[50].mxu1 %v3120_v34 }
0x11e9   :  { %v3252_v10 = vpop.f32.mrb[50].mxu1 }
0x11ea   :  { %v3261_v40 = vsel %vm2807_vm7, %v3252_v10, 0.0  ;;  %v3254_v3 = vpop.f32.mrb[51].mxu1 }
0x11eb   :  { %v3262_v33 = vrot.slane %v3261_v40, 4  ;;  %v3268_v61 = vsel %vm2807_vm7, %v3254_v3, 0.0 }
0x11ec   :  { %v3269_v51 = vrot.slane %v3268_v61, 4 }
0x11ed   :  { %v3263_v19 = vadd.f32 %v3262_v33, %v3261_v40 }
0x11ee   :  { %v3270_v52 = vadd.f32 %v3269_v51, %v3268_v61 }
0x11ef   :  { %v3264_v13 = vrot.slane %v3263_v19, 2 }
0x11f0   :  { %v3271_v11 = vrot.slane %v3270_v52, 2 }
0x11f1   :  { %v3265_v8 = vadd.f32 %v3264_v13, %v3263_v19 }
0x11f2   :  { %v3272_v7 = vadd.f32 %v3271_v11, %v3270_v52 }
0x11f3   :  { %v3266_v32 = vrot.slane %v3265_v8, 1 }
0x11f4   :  { %v3273_v53 = vrot.slane %v3272_v7, 1 }
0x11f5   :  { %v3267_v27 = vadd.f32 %v3266_v32, %v3265_v8 }
0x11f6   :  { %v3274_v22 = vadd.f32 %v3273_v53, %v3272_v7 }
0x11f7   :  { %v3275_v29 = vmul.f32 0.25, %v3267_v27 }
0x11f8   :  { %v3276_v12 = vmul.f32 0.25, %v3274_v22 }
0x11f9   :  { %v3277_v59 = vsub.f32 %v3252_v10, %v3275_v29 }
0x11fa   :  { %v3278_v0 = vsub.f32 %v3254_v3, %v3276_v12 }
0x11fb   :  { %v3279_v24 = vmul.f32 %v3277_v59, %v3277_v59 }
0x11fc   :  { %v3280_v39 = vmul.f32 %v3278_v0, %v3278_v0 }
0x11fd   :  { %v3281_v17 = vsel %vm2807_vm7, %v3279_v24, 0.0 }
0x11fe   :  { %v3282_v43 = vrot.slane %v3281_v17, 4  ;;  %v3288_v6 = vsel %vm2807_vm7, %v3280_v39, 0.0 }
0x11ff   :  { %v3289_v37 = vrot.slane %v3288_v6, 4 }
0x1200   :  { %v3283_v55 = vadd.f32 %v3282_v43, %v3281_v17 }
0x1201   :  { %v3290_v48 = vadd.f32 %v3289_v37, %v3288_v6 }
0x1202   :  { %v3284_v35 = vrot.slane %v3283_v55, 2 }
0x1203   :  { %v3291_v47 = vrot.slane %v3290_v48, 2 }
0x1204   :  { %v3285_v41 = vadd.f32 %v3284_v35, %v3283_v55 }
0x1205   :  { %v3292_v15 = vadd.f32 %v3291_v47, %v3290_v48 }
0x1206   :  { %v3286_v56 = vrot.slane %v3285_v41, 1 }
0x1207   :  { %v3293_v36 = vrot.slane %v3292_v15, 1 }
0x1208   :  { %v3287_v30 = vadd.f32 %v3286_v56, %v3285_v41 }
0x1209   :  { %v3294_v62 = vadd.f32 %v3293_v36, %v3292_v15 }
0x120a   :  { %v3295_v26 = vmul.f32 0.25, %v3287_v30 }
0x120b   :  { %v3296_v58 = vmul.f32 0.25, %v3294_v62 }
0x120c   :  { %v3297_v31 = vadd.f32 1e-05, %v3295_v26 }
0x120d   :  { %v3298_v42 = vadd.f32 1e-05, %v3296_v58 }
0x120e   :  { %4010 = vrsqrt.f32 %v3297_v31 }
0x120f   :  { %4012 = vrsqrt.f32 %v3298_v42 }
0x1218   :  { %v4011_v44 = vpop.eup %4010 }
0x1219   :  { %v4013_v5 = vpop.eup %4012 }
0x121a   :  { %v3303_v4 = vcombine.low %v4011_v44, %v4013_v5 }
0x121c   :  { %v3310_v28 = vrot.slane %v3303_v4, %v5431_v1 }
0x121e   :  { %v3317_v25 = vrot.slane %v3310_v28, %v5431_v1 }
0x1220   :  { %v3319_v16 = vmul.f32 %v3589_v14, %v3317_v25 }
0x1222   :  { %v3324_v38 = vrot.slane %v3319_v16, %v5439_v50  ;;  %v3328_v9 = vrot.slane %v3319_v16, %v5442_v2 }
0x1224   :  { %v3331_v49 = vmul.f32 %v3324_v38, %v3277_v59  ;;  %v3332_v18 = vmul.f32 %v3328_v9, %v3278_v0 }
0x1226   :  { %v5483_v54 = vadd.f32 %v3337_v63, %v3331_v49  ;;  %v3345_v21 = vadd.f32 %v3341_v60, %v3332_v18 }
0x1228   :  { %v3346_v1 = vmax.f32 %v5483_v54, 0.0  ;;  %v3347_v23 = vmax.f32 %v3345_v21, 0.0 }
0x1229   :  { %4084 = dma.done.wait [#allocation4 + $0x1], 6144 }
0x122a   :  { %4085 = vsyncadd [#allocation4 + $0x1], 4294961152  ;;  %v3355_v57 = vpack.c.bf16 %v3347_v23, %v3347_v23  ;;  %v3357_v20 = vld [vmem:[#allocation3 + $0x8] sm:$0xff]  ;;  %v3356_v34 = vld [vmem:[#allocation3] sm:$0xff]  ;;  %v3354_v36 = vpack.c.bf16 %v3346_v1, %v3346_v1  ;;  %v3415_v16 = vsub.s32 2, %v5428_v46  ;;  %s4113_s9 = smov [#allocation8]  }
0x122b   :  { %v3360_v10 = vld [vmem:[#allocation3 + $0x20] sm:$0xff]  ;;  %3420 = vmatprep.subr.bf16.mxu0 %v3357_v20  ;;  %v3359_v40 = vld [vmem:[#allocation3 + $0x18] sm:$0xff]  ;;  %v3382_v33 = vld [vmem:[#allocation3 + $0xd0] sm:$0xff]  ;;  %s3513_s10 = sshll.u32 %s4113_s9, 4  ;;  %s3514_s10 = int_to_ptr.vmem [resolvable:$true] %s3513_s10 }
0x122c   :  { %3493 = vmatprep.mubr.bf16.mxu1 %v3355_v57  ;;  %3452 = vmatprep.mubr.bf16.mxu0 %v3355_v57  ;;  %v3363_v3 = vld [vmem:[#allocation3 + $0x38] sm:$0xff]  ;;  %v3358_v61 = vld [vmem:[#allocation3 + $0x10] sm:$0xff]  ;;  %v3385_v51 = vld [vmem:[#allocation3 + $0xe8] sm:$0xff]  ;;  %p4063_p3 = scmp.lt.s32.totalorder %s3514_s10, %s3514_s10 }
0x122d   :  { %3421 = vmatpush1.bf16.msra.mxu0 %v3356_v34  ;;  %3594 = vmatprep.subr.bf16.mxu1 %v3382_v33  ;;  %v3362_v19 = vld [vmem:[#allocation3 + $0x30] sm:$0xff]  ;;  %v3361_v13 = vld [vmem:[#allocation3 + $0x28] sm:$0xff]  ;;  %v3388_v11 = vld [vmem:[#allocation3 + $0x100] sm:$0xff] }
0x122e   :  { %3422 = vmatprep.subr.bf16.mxu0 %v3360_v10  ;;  %3595 = vmatpush3.bf16.msra.mxu1 %v3358_v61  ;;  %v3366_v52 = vld [vmem:[#allocation3 + $0x50] sm:$0xff]  ;;  %v3365_v8 = vld [vmem:[#allocation3 + $0x48] sm:$0xff]  ;;  %v3364_v32 = vld [vmem:[#allocation3 + $0x40] sm:$0xff] }
0x122f   :  { %3596 = vmatprep.subr.bf16.mxu1 %v3385_v51  ;;  %v3369_v7 = vld [vmem:[#allocation3 + $0x68] sm:$0xff]  ;;  %v3391_v53 = vld [vmem:[#allocation3 + $0x118] sm:$0xff]  ;;  %v3368_v27 = vld [vmem:[#allocation3 + $0x60] sm:$0xff] }
0x1230   :  { %v3372_v22 = vld [vmem:[#allocation3 + $0x80] sm:$0xff]  ;;  %v3367_v29 = vld [vmem:[#allocation3 + $0x58] sm:$0xff]  ;;  %v3394_v12 = vld [vmem:[#allocation3 + $0x130] sm:$0xff] }
0x1231   :  { %3423 = vmatpush1.bf16.msra.mxu0 %v3359_v40  ;;  %v3371_v59 = vld [vmem:[#allocation3 + $0x78] sm:$0xff]  ;;  %v3370_v24 = vld [vmem:[#allocation3 + $0x70] sm:$0xff]  ;;  %v3397_v39 = vld [vmem:[#allocation3 + $0x148] sm:$0xff] }
0x1232   :  { %3424 = vmatprep.subr.bf16.mxu0 %v3363_v3  ;;  %3597 = vmatpush3.bf16.msra.mxu1 %v3361_v13  ;;  %v3375_v0 = vld [vmem:[#allocation3 + $0x98] sm:$0xff]  ;;  %v3374_v17 = vld [vmem:[#allocation3 + $0x90] sm:$0xff]  ;;  %v3373_v6 = vld [vmem:[#allocation3 + $0x88] sm:$0xff] }
0x1233   :  { %3598 = vmatprep.subr.bf16.mxu1 %v3388_v11  ;;  %v3378_v43 = vld [vmem:[#allocation3 + $0xb0] sm:$0xff]  ;;  %v3400_v37 = vld [vmem:[#allocation3 + $0x160] sm:$0xff]  ;;  %v3377_v55 = vld [vmem:[#allocation3 + $0xa8] sm:$0xff] }
0x1234   :  { %v3381_v48 = vld [vmem:[#allocation3 + $0xc8] sm:$0xff]  ;;  %v3376_v35 = vld [vmem:[#allocation3 + $0xa0] sm:$0xff]  ;;  %v3403_v47 = vld [vmem:[#allocation3 + $0x178] sm:$0xff] }
0x1235   :  { %3425 = vmatpush1.bf16.msra.mxu0 %v3362_v19  ;;  %v3380_v41 = vld [vmem:[#allocation3 + $0xc0] sm:$0xff]  ;;  %v3379_v56 = vld [vmem:[#allocation3 + $0xb8] sm:$0xff]  ;;  %v3386_v26 = vld [vmem:[#allocation3 + $0xf0] sm:$0xff] }
0x1236   :  { %3426 = vmatprep.subr.bf16.mxu0 %v3366_v52  ;;  %3599 = vmatpush3.bf16.msra.mxu1 %v3364_v32  ;;  %v3384_v15 = vld [vmem:[#allocation3 + $0xe0] sm:$0xff]  ;;  %v3383_v30 = vld [vmem:[#allocation3 + $0xd8] sm:$0xff]  ;;  %v3390_v58 = vld [vmem:[#allocation3 + $0x110] sm:$0xff] }
0x1237   :  { %3600 = vmatprep.subr.bf16.mxu1 %v3391_v53  ;;  %v3387_v62 = vld [vmem:[#allocation3 + $0xf8] sm:$0xff]  ;;  %v3389_v31 = vld [vmem:[#allocation3 + $0x108] sm:$0xff]  ;;  %v3392_v44 = vld [vmem:[#allocation3 + $0x120] sm:$0xff] }
0x1238   :  { %v3393_v42 = vld [vmem:[#allocation3 + $0x128] sm:$0xff]  ;;  %v3396_v5 = vld [vmem:[#allocation3 + $0x140] sm:$0xff]  ;;  %v3395_v4 = vld [vmem:[#allocation3 + $0x138] sm:$0xff] }
0x1239   :  { %3427 = vmatpush1.bf16.msra.mxu0 %v3365_v8  ;;  %v3399_v28 = vld [vmem:[#allocation3 + $0x158] sm:$0xff]  ;;  %v3398_v14 = vld [vmem:[#allocation3 + $0x150] sm:$0xff]  ;;  %v3401_v45 = vld [vmem:[#allocation3 + $0x168] sm:$0xff] }
0x123a   :  { %3428 = vmatprep.subr.bf16.mxu0 %v3369_v7  ;;  %3601 = vmatpush3.bf16.msra.mxu1 %v3367_v29  ;;  %v3402_v25 = vld [vmem:[#allocation3 + $0x170] sm:$0xff] }
0x123b   :  { %3602 = vmatprep.subr.bf16.mxu1 %v3394_v12  ;;  %v3591_v38 = vld [vmem:[%s5510_s3 + $0x6] ss:$8 sm:$0x7]  ;;  %s4058_s3 = scalar_lea.vmem %s3514_s10, 192 }
0x123c   :  { %v3416_v63 = vrot.slane %v3591_v38, %v3415_v16  ;;  %v3408_v1 = vrot.slane %v3591_v38, %v5439_v50  ;;  %v3412_v23 = vrot.slane %v3591_v38, %v5442_v2  ;;  %p4059_p2 = scmp.ne.s32.totalorder %s3514_s10, %s4058_s3  ;;  %p4064_p4 = scmp.lt.s32.totalorder %s4058_s3, %s4058_s3 }
0x123d   :  { %3429 = vmatpush1.bf16.msra.mxu0 %v3368_v27 }
0x123e   :  { %3430 = vmatprep.subr.bf16.mxu0 %v3372_v22  ;;  %3603 = vmatpush3.bf16.msra.mxu1 %v3370_v24  ;;  %p4065_p5 = por %p4064_p4, %p4063_p3 }
0x123f   :  { %3604 = vmatprep.subr.bf16.mxu1 %v3397_v39 }
0x1240   :  { %p4066_p6 = pnand %p4065_p5, %p4059_p2 }
0x1241   :  { %3431 = vmatpush1.bf16.msra.mxu0 %v3371_v59 }
0x1242   :  { %3432 = vmatprep.subr.bf16.mxu0 %v3375_v0  ;;  %3605 = vmatpush3.bf16.msra.mxu1 %v3373_v6 }
0x1243   :  { %3606 = vmatprep.subr.bf16.mxu1 %v3400_v37 }
0x1245   :  { %3433 = vmatpush1.bf16.msra.mxu0 %v3374_v17 }
0x1246   :  { %3434 = vmatprep.subr.bf16.mxu0 %v3378_v43  ;;  %3607 = vmatpush3.bf16.msra.mxu1 %v3376_v35 }
0x1247   :  { %3608 = vmatprep.subr.bf16.mxu1 %v3403_v47 }
0x1249   :  { %3435 = vmatpush1.bf16.msra.mxu0 %v3377_v55 }
0x124a   :  { %3436 = vmatprep.subr.bf16.mxu0 %v3381_v48  ;;  %3609 = vmatpush3.bf16.msra.mxu1 %v3379_v56 }
0x124d   :  { %3437 = vmatpush1.bf16.msra.mxu0 %v3380_v41  ;;  %3494 = vmatmul.mubr.bf16.vlgmr.msra.gmra.mrb[52].mxu1 %v3354_v36 }
0x124e   :  { %3438 = vmatprep.subr.bf16.mxu0 %v3384_v15 }
0x1251   :  { %3439 = vmatpush1.bf16.msra.mxu0 %v3383_v30 }
0x1252   :  { %3440 = vmatprep.subr.bf16.mxu0 %v3387_v62 }
0x1255   :  { %3441 = vmatpush1.bf16.msra.mxu0 %v3386_v26 }
0x1256   :  { %3442 = vmatprep.subr.bf16.mxu0 %v3390_v58 }
0x1259   :  { %3443 = vmatpush1.bf16.msra.mxu0 %v3389_v31 }
0x125a   :  { %3444 = vmatprep.subr.bf16.mxu0 %v3393_v42 }
0x125d   :  { %3445 = vmatpush1.bf16.msra.mxu0 %v3392_v44 }
0x125e   :  { %3446 = vmatprep.subr.bf16.mxu0 %v3396_v5 }
0x1261   :  { %3447 = vmatpush1.bf16.msra.mxu0 %v3395_v4 }
0x1262   :  { %3448 = vmatprep.subr.bf16.mxu0 %v3399_v28 }
0x1265   :  { %3449 = vmatpush1.bf16.msra.mxu0 %v3398_v14 }
0x1266   :  { %3450 = vmatprep.subr.bf16.mxu0 %v3402_v25 }
0x1269   :  { %3451 = vmatpush1.bf16.msra.mxu0 %v3401_v45 }
0x126c   :  { %3453 = vmatmul.mubr.bf16.vlgmr.msra.gmra.mrb[68].mxu0 %v3354_v36 }
0x1320   :  { %v3610_v9 = vpop.f32.mrb[52].mxu1 }
0x1321   :  { %v3611_v60 = vpop.f32.mrb[53].mxu1 }
0x1322   :  { %v3612_v49 = vadd.f32 %v3611_v60, %v3610_v9  ;;  %v3613_v18 = vpop.f32.mrb[54].mxu1 }
0x1323   :  { %v3614_v54 = vpop.f32.mrb[55].mxu1 }
0x1324   :  { %v3496_v21 = vadd.f32 %v3612_v49, %v3416_v63 }
0x1326   :  { %3506 = vst [vmem:[#allocation8 + $0x8] sm:$0xf] %v3496_v21 }
0x133f   :  { %v3454_v57 = vpop.f32.mrb[68].mxu0 }
0x1340   :  { %v3455_v20 = vadd.f32 %v3454_v57, %v3408_v1  ;;  %v3456_v34 = vpop.f32.mrb[69].mxu0 }
0x1341   :  { %v3457_v46 = vadd.f32 %v3456_v34, %v3412_v23  ;;  %v3458_v10 = vpop.f32.mrb[70].mxu0 }
0x1342   :  { %v3459_v40 = vpop.f32.mrb[71].mxu0 }
0x1343   :  { %v3503_v3 = vcombine.low %v3455_v20, %v3457_v46 }
0x1345   :  { %3505 = vst [vmem:[#allocation8] sm:$0xff] %v3503_v3 }
0x1346   :  { %4069 = shalt.err (!%p4066_p6)
}
0x1347   :  { %s4070_s13 = scalar_lea.hbm %s5513_s6, 192 }
0x1348   :  { %p4071_p7 = scmp.ne.s32.totalorder %s5513_s6, %s4070_s13  ;;  %p4074_p8 = scmp.lt.u32.totalorder %s4070_s13, %s5513_s6 }
0x134a   :  { %p4076_p9 = pnand %p4074_p8, %p4071_p7 }
0x134c   :  { %4079 = shalt.err (!%p4076_p9)
}
0x134d   :  { %3516 = dma.vmem_to_hbm [thread:$0]  %s3514_s10, 192, %s5513_s6, [#allocation7]  }
0x134e   :  { %4086 = dma.done.wait [#allocation7], 192  }
0x134f   :  { %4087 = vsyncadd [#allocation7], 4294967104 }
0x1350   :  { %3520 = vsyncpa [#allocation6], 1 }
0x1351   :  { %3521 = vsyncpa [#allocation7], 1 }
0x1352   :  { %3522 = vsyncmov [#allocation4] }
0x1355   :  { %s3523_s16 = vpop.sfrf %3522 }
0x1356   :  { %p3592_p10 = scmp.ne.s32.totalorder %s3523_s16, 0 }
0x1358   :  { %3527 = shalt.err (%p3592_p10)  }
0x1359   :  { %3529 = vsyncmov [#allocation4 + $0x1] }
0x135c   :  { %s3530_s17 = vpop.sfrf %3529 }
0x135d   :  { %p3593_p11 = scmp.ne.s32.totalorder %s3530_s17, 0 }
0x135f   :  { %3534 = shalt.err (%p3593_p11)  }

</bundles_post_ra>
